<compile_context>
chip_gen: v7x
topology: tpu7x:2x2x1
jax: 0.10.0
libtpu: 0.0.40
codegen_flags: <defaults>
</compile_context>

<pallas_src>
import math

import jax
import jax.numpy as jnp
from jax.experimental import pallas as pl
from jax.experimental.pallas import tpu as pltpu

D = 768                      # model width
NHEAD = 8
DK = D // NHEAD              # 96  (true head dim)
DPH = 128                    # padded head dim (lane aligned)
DP = NHEAD * DPH             # 1024 (padded projection width)
_VMEM_LIMIT = 48 * 1024 * 1024  # fits v7x (64 MiB phys), raises v5e/v6e defaults


# ------------------------------ tile pickers -------------------------------- #
def _pick_tile(n, candidates=(512, 256, 128, 64, 32, 16), min_steps=2):
    """Largest candidate dividing n that still leaves >= min_steps grid steps
    (so both v7x TensorCores get work); falls back to the largest divisor and
    finally to n itself (one full block: correct, just unpipelined)."""
    divisors = [t for t in candidates if n % t == 0]
    for t in divisors:
        if n // t >= min_steps:
            return t
    return divisors[0] if divisors else n


def _pick_q_tile(batch, seq, candidates=(256, 128, 64, 32, 16)):
    """Q-row tile: capped at 256 (vreg/score-matrix pressure), prefers a grid
    with >= 2 total steps so the v7x megacore is not idled."""
    divisors = [t for t in candidates if seq % t == 0]
    for t in divisors:
        if batch * (seq // t) >= 2:
            return t
    return divisors[0] if divisors else seq


# ----------------------- Fused Q/K/V projection kernel ---------------------- #
def _qkv_kernel(xq_ref, xk_ref, xv_ref, wq_ref, wk_ref, wv_ref,
                bq_ref, bk_ref, bv_ref, q_ref, k_ref, v_ref):
    def proj(x_ref, w_ref, b_ref, o_ref):
        acc = jnp.dot(x_ref[...].astype(jnp.bfloat16), w_ref[...],
                      preferred_element_type=jnp.float32)   # bf16 MXU, f32 acc
        o_ref[...] = (acc + b_ref[...]).astype(o_ref.dtype)

    proj(xq_ref, wq_ref, bq_ref, q_ref)
    proj(xk_ref, wk_ref, bk_ref, k_ref)
    proj(xv_ref, wv_ref, bv_ref, v_ref)


def qkv_projection(xq, xk, xv, wq_p, wk_p, wv_p, bq_p, bk_p, bv_p):
    """x*: (M, 768) f32; w*_p: (768, 1024) bf16 head-padded; b*_p: (1024,) f32
    -> three (M, 1024) bf16 head-padded projections."""
    M = xq.shape[0]
    tm = _pick_tile(M)
    x_spec = pl.BlockSpec((tm, D), lambda i: (i, 0))
    w_spec = pl.BlockSpec((D, DP), lambda i: (0, 0))   # resident across M tiles
    b_spec = pl.BlockSpec((1, DP), lambda i: (0, 0))
    o_spec = pl.BlockSpec((tm, DP), lambda i: (i, 0))
    out_sds = jax.ShapeDtypeStruct((M, DP), jnp.bfloat16)
    return pl.pallas_call(
        _qkv_kernel,
        out_shape=(out_sds, out_sds, out_sds),
        grid=(M // tm,),
        in_specs=[x_spec, x_spec, x_spec,
                  w_spec, w_spec, w_spec,
                  b_spec, b_spec, b_spec],
        out_specs=(o_spec, o_spec, o_spec),
        compiler_params=pltpu.CompilerParams(
            dimension_semantics=("parallel",),
            vmem_limit_bytes=_VMEM_LIMIT),
    )(xq, xk, xv, wq_p, wk_p, wv_p,
      bq_p.reshape(1, DP), bk_p.reshape(1, DP), bv_p.reshape(1, DP))


# -------------------- Attention + output-projection kernel ------------------ #
def _attn_proj_kernel(q_ref, k_ref, v_ref, wp_ref, bp_ref, o_ref, acc_ref):
    # q_ref: (1, TQ, 1024) bf16 (query pre-scaled by 1/sqrt(d_k) via weights)
    # k_ref/v_ref: (1, S, 1024) bf16; wp_ref: (1024, 768) bf16; bp_ref: (1, 768)
    # o_ref: (1, TQ, 768) f32; acc_ref: (TQ, 768) f32 VMEM scratch.
    acc_ref[...] = jnp.broadcast_to(bp_ref[...], acc_ref.shape)
    for h in range(NHEAD):
        lo = h * DPH                                   # 128-lane aligned slices
        qh = q_ref[0, :, lo:lo + DPH]                  # (TQ, 128)
        kh = k_ref[0, :, lo:lo + DPH]                  # (S, 128)
        vh = v_ref[0, :, lo:lo + DPH]                  # (S, 128)
        s = jax.lax.dot_general(                       # q @ k^T, no transpose
            qh, kh, dimension_numbers=(((1,), (1,)), ((), ())),
            preferred_element_type=jnp.float32)        # (TQ, S)
        m = jnp.max(s, axis=-1, keepdims=True)
        p = jnp.exp(s - m)
        inv = pl.reciprocal(jnp.sum(p, axis=-1, keepdims=True), approx=True)
        # Normalize AFTER the PV matmul: TQ*128 multiplies instead of TQ*S.
        oh = jnp.dot(p.astype(jnp.bfloat16), vh,
                     preferred_element_type=jnp.float32) * inv   # (TQ, 128)
        # Fused output projection: accumulate this head's contribution.
        acc_ref[...] += jnp.dot(oh.astype(jnp.bfloat16),
                                wp_ref[lo:lo + DPH, :],
                                preferred_element_type=jnp.float32)
    o_ref[0] = acc_ref[...].astype(o_ref.dtype)        # lane-dense 768-wide store


def attention_proj(qp, kp, vp, wp_p, bp):
    """qp/kp/vp: (B, S, 1024) bf16 head-padded; wp_p: (1024, 768) bf16;
    bp: (768,) f32 -> (B, S, 768) f32 (attention + output projection)."""
    B, S, _ = qp.shape
    tq = _pick_q_tile(B, S)
    q_spec = pl.BlockSpec((1, tq, DP), lambda b, i: (b, i, 0))
    kv_spec = pl.BlockSpec((1, S, DP), lambda b, i: (b, 0, 0))
    wp_spec = pl.BlockSpec((DP, D), lambda b, i: (0, 0))   # resident
    bp_spec = pl.BlockSpec((1, D), lambda b, i: (0, 0))
    o_spec = pl.BlockSpec((1, tq, D), lambda b, i: (b, i, 0))
    return pl.pallas_call(
        _attn_proj_kernel,
        out_shape=jax.ShapeDtypeStruct((B, S, D), jnp.float32),
        grid=(B, S // tq),
        in_specs=[q_spec, kv_spec, kv_spec, wp_spec, bp_spec],
        out_specs=o_spec,
        scratch_shapes=[pltpu.VMEM((tq, D), jnp.float32)],
        compiler_params=pltpu.CompilerParams(
            dimension_semantics=("parallel", "parallel"),
            vmem_limit_bytes=_VMEM_LIMIT),
    )(qp, kp, vp, wp_p, bp.reshape(1, D))


# ------------------------------ parameter prep ------------------------------ #
def init_params(key):
    ks = jax.random.split(key, 8)
    scale = 0.02

    def w(k):  # PyTorch Linear weight layout: (out, in)
        return (scale * jax.random.normal(k, (D, D))).astype(jnp.float32)

    def b(k):
        return (scale * jax.random.normal(k, (D,))).astype(jnp.float32)

    return {
        "Wq": w(ks[0]), "bq": b(ks[1]),
        "Wk": w(ks[2]), "bk": b(ks[3]),
        "Wv": w(ks[4]), "bv": b(ks[5]),
        "Wp": w(ks[6]), "bp": b(ks[7]),
    }


def _pad_out_cols(w_t):
    # (768, 768) -> (768, 1024): each head's 96 output columns -> 128 (zeros)
    w = w_t.reshape(D, NHEAD, DK)
    w = jnp.pad(w, ((0, 0), (0, 0), (0, DPH - DK)))
    return w.reshape(D, DP)


def _pad_in_rows(w_t):
    # (768, 768) -> (1024, 768): each head's 96 input rows -> 128 (zero rows)
    w = w_t.reshape(NHEAD, DK, D)
    w = jnp.pad(w, ((0, 0), (0, DPH - DK), (0, 0)))
    return w.reshape(DP, D)


def _pad_bias(b):
    # (768,) -> (1024,)
    return jnp.pad(b.reshape(NHEAD, DK), ((0, 0), (0, DPH - DK))).reshape(DP)


def prepare_params(params):
    """One-time weight prep (outside the forward pass):
      * transpose PyTorch (out, in) weights to (in, out),
      * fold 1/sqrt(d_k) into the query weights/bias,
      * pad each head's 96 lanes out to 128 (zero columns / rows),
      * cast weights to bf16 for the MXU (biases stay f32)."""
    inv_sqrt_dk = 1.0 / math.sqrt(DK)
    return {
        "Wq_p": _pad_out_cols(params["Wq"].T * inv_sqrt_dk).astype(jnp.bfloat16),
        "bq_p": _pad_bias(params["bq"] * inv_sqrt_dk),
        "Wk_p": _pad_out_cols(params["Wk"].T).astype(jnp.bfloat16),
        "bk_p": _pad_bias(params["bk"]),
        "Wv_p": _pad_out_cols(params["Wv"].T).astype(jnp.bfloat16),
        "bv_p": _pad_bias(params["bv"]),
        "Wp_p": _pad_in_rows(params["Wp"].T).astype(jnp.bfloat16),
        "bp": params["bp"],
    }


# ------------------------------ MHA forward --------------------------------- #
def mha_forward(prepared, q, k, v):
    B, S, _ = q.shape
    M = B * S
    qp, kp, vp = qkv_projection(
        q.reshape(M, D), k.reshape(M, D), v.reshape(M, D),
        prepared["Wq_p"], prepared["Wk_p"], prepared["Wv_p"],
        prepared["bq_p"], prepared["bk_p"], prepared["bv_p"])
    # (M, 1024) -> (B, S, 1024); heads live at lane offsets h*128 (last 32
    # lanes of each head are zero), so no (B,S,H,DK)<->(B,H,S,DK) transposes
    # ever touch HBM and the output projection consumes the padded layout.
    return attention_proj(qp.reshape(B, S, DP), kp.reshape(B, S, DP),
                          vp.reshape(B, S, DP),
                          prepared["Wp_p"], prepared["bp"])


def mha_reference(params, q, k, v):
    def lin(x, W, bias):
        return jnp.einsum("bsd,od->bso", x, W) + bias

    B, S, _ = q.shape
    qp = lin(q, params["Wq"], params["bq"]).reshape(B, S, NHEAD, DK).transpose(0, 2, 1, 3)
    kp = lin(k, params["Wk"], params["bk"]).reshape(B, S, NHEAD, DK).transpose(0, 2, 1, 3)
    vp = lin(v, params["Wv"], params["bv"]).reshape(B, S, NHEAD, DK).transpose(0, 2, 1, 3)
    s = jnp.einsum("bhqd,bhkd->bhqk", qp, kp) / math.sqrt(DK)
    p = jax.nn.softmax(s, axis=-1)
    o = jnp.einsum("bhqk,bhkd->bhqd", p, vp).transpose(0, 2, 1, 3).reshape(B, S, D)
    return lin(o, params["Wp"], params["bp"])


if __name__ == "__main__":
    key = jax.random.PRNGKey(0)
    kp_, kq_, kk_, kv_ = jax.random.split(key, 4)
    B, S = 2, 8
    params = init_params(kp_)
    prepared = prepare_params(params)
    q = jax.random.normal(kq_, (B, S, D), dtype=jnp.float32)
    k = jax.random.normal(kk_, (B, S, D), dtype=jnp.float32)
    v = jax.random.normal(kv_, (B, S, D), dtype=jnp.float32)

    out = mha_forward(prepared, q, k, v)
    out = jax.block_until_ready(out)

    ref = mha_reference(params, q, k, v)
    assert out.shape == (B, S, D)
    # Tolerance reflects bf16 MXU matmuls (vs. the full-f32 reference) and the
    # EUP approx reciprocal in the softmax denominator.
    max_err = float(jnp.max(jnp.abs(out - ref)))
    assert jnp.allclose(out, ref, atol=2e-2, rtol=2e-2), f"max_err={max_err}"
    print("KERNEL_OK")
</pallas_src>

<mosaic_0001>
module attributes {stable_mosaic.version = 11 : i64} {
  func.func @_qkv_kernel(%arg0: i32, %arg1: memref<16x768xf32, #tpu.memory_space<vmem>>, %arg2: memref<16x768xf32, #tpu.memory_space<vmem>>, %arg3: memref<16x768xf32, #tpu.memory_space<vmem>>, %arg4: memref<768x1024xbf16, #tpu.memory_space<vmem>>, %arg5: memref<768x1024xbf16, #tpu.memory_space<vmem>>, %arg6: memref<768x1024xbf16, #tpu.memory_space<vmem>>, %arg7: memref<1x1024xf32, #tpu.memory_space<vmem>>, %arg8: memref<1x1024xf32, #tpu.memory_space<vmem>>, %arg9: memref<1x1024xf32, #tpu.memory_space<vmem>>, %arg10: memref<16x1024xbf16, #tpu.memory_space<vmem>>, %arg11: memref<16x1024xbf16, #tpu.memory_space<vmem>>, %arg12: memref<16x1024xbf16, #tpu.memory_space<vmem>>) attributes {dimension_semantics = [#tpu.dimension_semantics<parallel>], iteration_bounds = array<i64: 1>, scalar_prefetch = 0 : i64, scratch_operands = 0 : i64, tpu.core_type = #tpu.core_type<tc>, window_params = [{transform_indices = @transform_0, window_bounds = array<i64: 16, 768>}, {transform_indices = @transform_1, window_bounds = array<i64: 16, 768>}, {transform_indices = @transform_2, window_bounds = array<i64: 16, 768>}, {pipeline_mode = #tpu.pipeline_mode<synchronous>, transform_indices = @transform_3, window_bounds = array<i64: 768, 1024>}, {pipeline_mode = #tpu.pipeline_mode<synchronous>, transform_indices = @transform_4, window_bounds = array<i64: 768, 1024>}, {pipeline_mode = #tpu.pipeline_mode<synchronous>, transform_indices = @transform_5, window_bounds = array<i64: 768, 1024>}, {pipeline_mode = #tpu.pipeline_mode<synchronous>, transform_indices = @transform_6, window_bounds = array<i64: 1, 1024>}, {pipeline_mode = #tpu.pipeline_mode<synchronous>, transform_indices = @transform_7, window_bounds = array<i64: 1, 1024>}, {pipeline_mode = #tpu.pipeline_mode<synchronous>, transform_indices = @transform_8, window_bounds = array<i64: 1, 1024>}, {transform_indices = @transform_9, window_bounds = array<i64: 16, 1024>}, {transform_indices = @transform_10, window_bounds = array<i64: 16, 1024>}, {transform_indices = @transform_11, window_bounds = array<i64: 16, 1024>}]} {
    %c0 = arith.constant 0 : index
    %c0_0 = arith.constant 0 : index
    %0 = vector.load %arg1[%c0, %c0_0] : memref<16x768xf32, #tpu.memory_space<vmem>>, vector<16x768xf32>
    %1 = arith.truncf %0 : vector<16x768xf32> to vector<16x768xbf16>
    %c0_1 = arith.constant 0 : index
    %c0_2 = arith.constant 0 : index
    %2 = vector.load %arg4[%c0_1, %c0_2] : memref<768x1024xbf16, #tpu.memory_space<vmem>>, vector<768x1024xbf16>
    %cst = arith.constant dense<0.000000e+00> : vector<16x1024xf32>
    %3 = tpu.matmul %1, %2, %cst {dimension_numbers = #tpu.dot_dimension_numbers<[1], [0], [0], [1], [0, 0, 1, 1], [], []>} : vector<16x768xbf16>, vector<768x1024xbf16>, vector<16x1024xf32> -> vector<16x1024xf32>
    %c0_3 = arith.constant 0 : index
    %c0_4 = arith.constant 0 : index
    %4 = vector.load %arg7[%c0_3, %c0_4] : memref<1x1024xf32, #tpu.memory_space<vmem>>, vector<1x1024xf32>
    %5 = vector.broadcast %4 : vector<1x1024xf32> to vector<16x1024xf32>
    %6 = arith.addf %3, %5 : vector<16x1024xf32>
    %7 = arith.truncf %6 : vector<16x1024xf32> to vector<16x1024xbf16>
    %c0_5 = arith.constant 0 : index
    %c0_6 = arith.constant 0 : index
    %8 = vector.load %arg10[%c0_5, %c0_6] : memref<16x1024xbf16, #tpu.memory_space<vmem>>, vector<16x1024xbf16>
    tpu.vector_store %arg10[%c0_5, %c0_6], %7 {strides = array<i32>} : memref<16x1024xbf16, #tpu.memory_space<vmem>>, vector<16x1024xbf16>,
    %c0_7 = arith.constant 0 : index
    %c0_8 = arith.constant 0 : index
    %9 = vector.load %arg2[%c0_7, %c0_8] : memref<16x768xf32, #tpu.memory_space<vmem>>, vector<16x768xf32>
    %10 = arith.truncf %9 : vector<16x768xf32> to vector<16x768xbf16>
    %c0_9 = arith.constant 0 : index
    %c0_10 = arith.constant 0 : index
    %11 = vector.load %arg5[%c0_9, %c0_10] : memref<768x1024xbf16, #tpu.memory_space<vmem>>, vector<768x1024xbf16>
    %cst_11 = arith.constant dense<0.000000e+00> : vector<16x1024xf32>
    %12 = tpu.matmul %10, %11, %cst_11 {dimension_numbers = #tpu.dot_dimension_numbers<[1], [0], [0], [1], [0, 0, 1, 1], [], []>} : vector<16x768xbf16>, vector<768x1024xbf16>, vector<16x1024xf32> -> vector<16x1024xf32>
    %c0_12 = arith.constant 0 : index
    %c0_13 = arith.constant 0 : index
    %13 = vector.load %arg8[%c0_12, %c0_13] : memref<1x1024xf32, #tpu.memory_space<vmem>>, vector<1x1024xf32>
    %14 = vector.broadcast %13 : vector<1x1024xf32> to vector<16x1024xf32>
    %15 = arith.addf %12, %14 : vector<16x1024xf32>
    %16 = arith.truncf %15 : vector<16x1024xf32> to vector<16x1024xbf16>
    %c0_14 = arith.constant 0 : index
    %c0_15 = arith.constant 0 : index
    %17 = vector.load %arg11[%c0_14, %c0_15] : memref<16x1024xbf16, #tpu.memory_space<vmem>>, vector<16x1024xbf16>
    tpu.vector_store %arg11[%c0_14, %c0_15], %16 {strides = array<i32>} : memref<16x1024xbf16, #tpu.memory_space<vmem>>, vector<16x1024xbf16>,
    %c0_16 = arith.constant 0 : index
    %c0_17 = arith.constant 0 : index
    %18 = vector.load %arg3[%c0_16, %c0_17] : memref<16x768xf32, #tpu.memory_space<vmem>>, vector<16x768xf32>
    %19 = arith.truncf %18 : vector<16x768xf32> to vector<16x768xbf16>
    %c0_18 = arith.constant 0 : index
    %c0_19 = arith.constant 0 : index
    %20 = vector.load %arg6[%c0_18, %c0_19] : memref<768x1024xbf16, #tpu.memory_space<vmem>>, vector<768x1024xbf16>
    %cst_20 = arith.constant dense<0.000000e+00> : vector<16x1024xf32>
    %21 = tpu.matmul %19, %20, %cst_20 {dimension_numbers = #tpu.dot_dimension_numbers<[1], [0], [0], [1], [0, 0, 1, 1], [], []>} : vector<16x768xbf16>, vector<768x1024xbf16>, vector<16x1024xf32> -> vector<16x1024xf32>
    %c0_21 = arith.constant 0 : index
    %c0_22 = arith.constant 0 : index
    %22 = vector.load %arg9[%c0_21, %c0_22] : memref<1x1024xf32, #tpu.memory_space<vmem>>, vector<1x1024xf32>
    %23 = vector.broadcast %22 : vector<1x1024xf32> to vector<16x1024xf32>
    %24 = arith.addf %21, %23 : vector<16x1024xf32>
    %25 = arith.truncf %24 : vector<16x1024xf32> to vector<16x1024xbf16>
    %c0_23 = arith.constant 0 : index
    %c0_24 = arith.constant 0 : index
    %26 = vector.load %arg12[%c0_23, %c0_24] : memref<16x1024xbf16, #tpu.memory_space<vmem>>, vector<16x1024xbf16>
    tpu.vector_store %arg12[%c0_23, %c0_24], %25 {strides = array<i32>} : memref<16x1024xbf16, #tpu.memory_space<vmem>>, vector<16x1024xbf16>,
    return
  }
  func.func @transform_0(%arg0: i32) -> (i32, i32) {
    %c0_i32 = arith.constant 0 : i32
    %c0_i32_0 = arith.constant 0 : i32
    return %arg0, %c0_i32 : i32, i32
  }
  func.func @transform_1(%arg0: i32) -> (i32, i32) {
    %c0_i32 = arith.constant 0 : i32
    %c0_i32_0 = arith.constant 0 : i32
    return %arg0, %c0_i32 : i32, i32
  }
  func.func @transform_2(%arg0: i32) -> (i32, i32) {
    %c0_i32 = arith.constant 0 : i32
    %c0_i32_0 = arith.constant 0 : i32
    return %arg0, %c0_i32 : i32, i32
  }
  func.func @transform_3(%arg0: i32) -> (i32, i32) {
    %c0_i32 = arith.constant 0 : i32
    %c0_i32_0 = arith.constant 0 : i32
    %c0_i32_1 = arith.constant 0 : i32
    return %c0_i32, %c0_i32_0 : i32, i32
  }
  func.func @transform_4(%arg0: i32) -> (i32, i32) {
    %c0_i32 = arith.constant 0 : i32
    %c0_i32_0 = arith.constant 0 : i32
    %c0_i32_1 = arith.constant 0 : i32
    return %c0_i32, %c0_i32_0 : i32, i32
  }
  func.func @transform_5(%arg0: i32) -> (i32, i32) {
    %c0_i32 = arith.constant 0 : i32
    %c0_i32_0 = arith.constant 0 : i32
    %c0_i32_1 = arith.constant 0 : i32
    return %c0_i32, %c0_i32_0 : i32, i32
  }
  func.func @transform_6(%arg0: i32) -> (i32, i32) {
    %c0_i32 = arith.constant 0 : i32
    %c0_i32_0 = arith.constant 0 : i32
    %c0_i32_1 = arith.constant 0 : i32
    return %c0_i32, %c0_i32_0 : i32, i32
  }
  func.func @transform_7(%arg0: i32) -> (i32, i32) {
    %c0_i32 = arith.constant 0 : i32
    %c0_i32_0 = arith.constant 0 : i32
    %c0_i32_1 = arith.constant 0 : i32
    return %c0_i32, %c0_i32_0 : i32, i32
  }
  func.func @transform_8(%arg0: i32) -> (i32, i32) {
    %c0_i32 = arith.constant 0 : i32
    %c0_i32_0 = arith.constant 0 : i32
    %c0_i32_1 = arith.constant 0 : i32
    return %c0_i32, %c0_i32_0 : i32, i32
  }
  func.func @transform_9(%arg0: i32) -> (i32, i32) {
    %c0_i32 = arith.constant 0 : i32
    %c0_i32_0 = arith.constant 0 : i32
    return %arg0, %c0_i32 : i32, i32
  }
  func.func @transform_10(%arg0: i32) -> (i32, i32) {
    %c0_i32 = arith.constant 0 : i32
    %c0_i32_0 = arith.constant 0 : i32
    return %arg0, %c0_i32 : i32, i32
  }
  func.func @transform_11(%arg0: i32) -> (i32, i32) {
    %c0_i32 = arith.constant 0 : i32
    %c0_i32_0 = arith.constant 0 : i32
    return %arg0, %c0_i32 : i32, i32
  }
}

</mosaic_0001>

<bundles_post_ra>
// kernel: tpu_custom_call.1
= control target key start
LH: loop header
LB: loop body
LE: loop exit
PB: predicated region body
PF: predicated region fallthrough
CT: control target
= control target key end

     0   :  { %17 = vsyncpa [#allocation3], 0  ;;  %s11082_s0 = inlined_call_operand.hbm [shape: f32[16,768], index: 0, kind: input, shape index: {}]   ;;  %s11083_s1 = inlined_call_operand.hbm [shape: f32[16,768], index: 1, kind: input, shape index: {}]   ;;  %s11084_s2 = inlined_call_operand.hbm [shape: f32[16,768], index: 2, kind: input, shape index: {}]   ;;  %s11085_s3 = inlined_call_operand.hbm [shape: bf16[768,1024], index: 3, kind: input, shape index: {}]   ;;  %s11086_s4 = inlined_call_operand.hbm [shape: bf16[768,1024], index: 4, kind: input, shape index: {}]   ;;  %s11087_s5 = inlined_call_operand.hbm [shape: bf16[768,1024], index: 5, kind: input, shape index: {}]   ;;  %s11088_s6 = inlined_call_operand.hbm [shape: f32[1,1024], index: 6, kind: input, shape index: {}]   ;;  %s11089_s7 = inlined_call_operand.hbm [shape: f32[1,1024], index: 7, kind: input, shape index: {}]   ;;  %s11090_s8 = inlined_call_operand.hbm [shape: f32[1,1024], index: 8, kind: input, shape index: {}]   ;;  %s11091_s9 = inlined_call_operand.hbm [shape: bf16[16,1024], index: 9, kind: output, shape index: {0}]   ;;  %s11092_s10 = inlined_call_operand.hbm [shape: bf16[16,1024], index: 10, kind: output, shape index: {1}]   ;;  %s11093_s11 = inlined_call_operand.hbm [shape: bf16[16,1024], index: 11, kind: output, shape index: {2}]  }
   0x1   :  { %18 = vsyncpa [#allocation6], 0 }
   0x2   :  { %19 = vsyncpa [#allocation9], 0 }
   0x3   :  { %20 = vsyncpa [#allocation12], 0 }
   0x4   :  { %21 = vsyncpa [#allocation15], 0 }
   0x5   :  { %22 = vsyncpa [#allocation4], 0 }
   0x6   :  { %23 = vsyncpa [#allocation19], 0  ;;  %s10653_s17 = smov [#allocation5]   ;;  %s10654_s19 = smov [#allocation8]  }
   0x7   :  { %s41_s18 = sshll.u32 %s10653_s17, 4  ;;  %s65_s20 = sshll.u32 %s10654_s19, 4  ;;  %s42_s18 = int_to_ptr.vmem [resolvable:$true] %s41_s18  ;;  %s10729_s20 = int_to_ptr.vmem [resolvable:$true] %s65_s20 }
   0x8   :  { %s10375_s23 = scalar_lea.hbm %s11083_s1, 1536 }
   0x9   :  { %p10376_p0 = scmp.ne.s32.totalorder %s11083_s1, %s10375_s23  ;;  %p10379_p1 = scmp.lt.u32.totalorder %s10375_s23, %s11083_s1 }
   0xb   :  { %p10381_p2 = pnand %p10379_p1, %p10376_p0 }
   0xd   :  { %10384 = shalt.err (!%p10381_p2)
}
   0xe   :  { %s10385_s28 = scalar_lea.vmem %s42_s18, 1536  ;;  %p10390_p4 = scmp.lt.s32.totalorder %s42_s18, %s42_s18 }
   0xf   :  { %p10386_p3 = scmp.ne.s32.totalorder %s42_s18, %s10385_s28  ;;  %p10391_p5 = scmp.lt.s32.totalorder %s10385_s28, %s10385_s28 }
  0x11   :  { %p10392_p6 = por %p10391_p5, %p10390_p4 }
  0x13   :  { %p10393_p7 = pnand %p10392_p6, %p10386_p3 }
  0x15   :  { %10396 = shalt.err (!%p10393_p7)
}
  0x16   :  { %s10655_s29 = smov 768   ;;  %s10656_s30 = smov 48  }
  0x17   :  { %47 = dma.hbm_to_vmem [thread:$0]  %s11083_s1, 1536, %s42_s18, [#allocation6], %s10655_s29, %s10655_s29, %s10656_s30  }
  0x18   :  { %s10397_s16 = scalar_lea.hbm %s11085_s3, 49152 }
  0x19   :  { %p10398_p8 = scmp.ne.s32.totalorder %s11085_s3, %s10397_s16  ;;  %p10401_p9 = scmp.lt.u32.totalorder %s10397_s16, %s11085_s3 }
  0x1b   :  { %p10403_p10 = pnand %p10401_p9, %p10398_p8 }
  0x1d   :  { %10406 = shalt.err (!%p10403_p10)
}
  0x1e   :  { %s10407_s23 = scalar_lea.vmem %s10729_s20, 49152  ;;  %p10412_p12 = scmp.lt.s32.totalorder %s10729_s20, %s10729_s20 }
  0x1f   :  { %p10408_p11 = scmp.ne.s32.totalorder %s10729_s20, %s10407_s23  ;;  %p10413_p13 = scmp.lt.s32.totalorder %s10407_s23, %s10407_s23 }
  0x21   :  { %p10414_p0 = por %p10413_p13, %p10412_p12 }
  0x23   :  { %p10415_p1 = pnand %p10414_p0, %p10408_p11 }
  0x25   :  { %10418 = shalt.err (!%p10415_p1)
}
  0x26   :  { %s10657_s1 = smov 512   ;;  %s10658_s18 = smov 32  }
  0x27   :  { %71 = dma.hbm_to_vmem [thread:$0]  %s11085_s3, 49152, %s10729_s20, [#allocation9], %s10657_s1, %s10657_s1, %s10658_s18  }
  0x28   :  { %s10659_s26 = smov [#allocation11]   ;;  %s10660_s28 = smov [#allocation14]  }
  0x29   :  { %s89_s27 = sshll.u32 %s10659_s26, 4  ;;  %s112_s12 = sshll.u32 %s10660_s28, 4  ;;  %s90_s27 = int_to_ptr.vmem [resolvable:$true] %s89_s27  ;;  %s113_s12 = int_to_ptr.vmem [resolvable:$true] %s112_s12 }
  0x2a   :  { %s10419_s15 = scalar_lea.hbm %s11087_s5, 49152 }
  0x2b   :  { %p10420_p2 = scmp.ne.s32.totalorder %s11087_s5, %s10419_s15  ;;  %p10423_p3 = scmp.lt.u32.totalorder %s10419_s15, %s11087_s5 }
  0x2d   :  { %p10425_p4 = pnand %p10423_p3, %p10420_p2 }
  0x2f   :  { %10428 = shalt.err (!%p10425_p4)
}
  0x30   :  { %s10429_s3 = scalar_lea.vmem %s90_s27, 49152  ;;  %p10434_p6 = scmp.lt.s32.totalorder %s90_s27, %s90_s27 }
  0x31   :  { %p10430_p5 = scmp.ne.s32.totalorder %s90_s27, %s10429_s3  ;;  %p10435_p7 = scmp.lt.s32.totalorder %s10429_s3, %s10429_s3 }
  0x33   :  { %p10436_p8 = por %p10435_p7, %p10434_p6 }
  0x35   :  { %p10437_p9 = pnand %p10436_p8, %p10430_p5 }
  0x37   :  { %10440 = shalt.err (!%p10437_p9)
}
  0x38   :  { %95 = dma.hbm_to_vmem [thread:$0]  %s11087_s5, 49152, %s90_s27, [#allocation12], %s10657_s1, %s10657_s1, %s10658_s18  }
  0x39   :  { %s10441_s25 = scalar_lea.hbm %s11089_s7, 128 }
  0x3a   :  { %p10442_p10 = scmp.ne.s32.totalorder %s11089_s7, %s10441_s25  ;;  %p10445_p11 = scmp.lt.u32.totalorder %s10441_s25, %s11089_s7 }
  0x3c   :  { %p10447_p12 = pnand %p10445_p11, %p10442_p10 }
  0x3e   :  { %10450 = shalt.err (!%p10447_p12)
}
  0x3f   :  { %s10451_s15 = scalar_lea.vmem %s113_s12, 128  ;;  %p10456_p0 = scmp.lt.s32.totalorder %s113_s12, %s113_s12 }
  0x40   :  { %p10452_p13 = scmp.ne.s32.totalorder %s113_s12, %s10451_s15  ;;  %p10457_p1 = scmp.lt.s32.totalorder %s10451_s15, %s10451_s15 }
  0x42   :  { %p10458_p2 = por %p10457_p1, %p10456_p0 }
  0x44   :  { %p10459_p3 = pnand %p10458_p2, %p10452_p13 }
  0x46   :  { %10462 = shalt.err (!%p10459_p3)
}
  0x47   :  { %115 = dma.hbm_to_vmem [thread:$0]  %s11089_s7, 128, %s113_s12, [#allocation15]  }
  0x48   :  { %s10661_s16 = smov [#allocation2]   ;;  %s10662_s19 = smov [#allocation7]  }
  0x49   :  { %s29_s17 = sshll.u32 %s10661_s16, 4  ;;  %s53_s21 = sshll.u32 %s10662_s19, 4  ;;  %s30_s17 = int_to_ptr.vmem [resolvable:$true] %s29_s17  ;;  %s10793_s21 = int_to_ptr.vmem [resolvable:$true] %s53_s21 }
  0x4a   :  { %s10463_s22 = scalar_lea.hbm %s11082_s0, 1536 }
  0x4b   :  { %p10464_p4 = scmp.ne.s32.totalorder %s11082_s0, %s10463_s22  ;;  %p10467_p5 = scmp.lt.u32.totalorder %s10463_s22, %s11082_s0 }
  0x4d   :  { %p10469_p6 = pnand %p10467_p5, %p10464_p4 }
  0x4f   :  { %10472 = shalt.err (!%p10469_p6)
}
  0x50   :  { %s10473_s7 = scalar_lea.vmem %s30_s17, 1536  ;;  %p10478_p8 = scmp.lt.s32.totalorder %s30_s17, %s30_s17 }
  0x51   :  { %p10474_p7 = scmp.ne.s32.totalorder %s30_s17, %s10473_s7  ;;  %p10479_p9 = scmp.lt.s32.totalorder %s10473_s7, %s10473_s7 }
  0x53   :  { %p10480_p10 = por %p10479_p9, %p10478_p8 }
  0x55   :  { %p10481_p11 = pnand %p10480_p10, %p10474_p7 }
  0x57   :  { %10484 = shalt.err (!%p10481_p11)
}
  0x58   :  { %35 = dma.hbm_to_vmem [thread:$0]  %s11082_s0, 1536, %s30_s17, [#allocation3], %s10655_s29, %s10655_s29, %s10656_s30  }
  0x59   :  { %s10485_s15 = scalar_lea.hbm %s11084_s2, 1536 }
  0x5a   :  { %p10486_p12 = scmp.ne.s32.totalorder %s11084_s2, %s10485_s15  ;;  %p10489_p13 = scmp.lt.u32.totalorder %s10485_s15, %s11084_s2 }
  0x5c   :  { %p10491_p0 = pnand %p10489_p13, %p10486_p12 }
  0x5e   :  { %10494 = shalt.err (!%p10491_p0)
}
  0x5f   :  { %s10495_s3 = scalar_lea.vmem %s10793_s21, 1536  ;;  %p10500_p2 = scmp.lt.s32.totalorder %s10793_s21, %s10793_s21 }
  0x60   :  { %p10496_p1 = scmp.ne.s32.totalorder %s10793_s21, %s10495_s3  ;;  %p10501_p3 = scmp.lt.s32.totalorder %s10495_s3, %s10495_s3 }
  0x62   :  { %p10502_p4 = por %p10501_p3, %p10500_p2 }
  0x64   :  { %p10503_p5 = pnand %p10502_p4, %p10496_p1 }
  0x66   :  { %10506 = shalt.err (!%p10503_p5)
}
  0x67   :  { %59 = dma.hbm_to_vmem [thread:$0]  %s11084_s2, 1536, %s10793_s21, [#allocation6], %s10655_s29, %s10655_s29, %s10656_s30  }
  0x68   :  { %s10663_s20 = smov [#allocation10]   ;;  %s10664_s23 = smov [#allocation13]  }
  0x69   :  { %s77_s22 = sshll.u32 %s10663_s20, 4  ;;  %s102_s24 = sshll.u32 %s10664_s23, 4  ;;  %s78_s22 = int_to_ptr.vmem [resolvable:$true] %s77_s22  ;;  %s103_s24 = int_to_ptr.vmem [resolvable:$true] %s102_s24 }
  0x6a   :  { %s10507_s7 = scalar_lea.hbm %s11086_s4, 49152 }
  0x6b   :  { %p10508_p6 = scmp.ne.s32.totalorder %s11086_s4, %s10507_s7  ;;  %p10511_p7 = scmp.lt.u32.totalorder %s10507_s7, %s11086_s4 }
  0x6d   :  { %p10513_p8 = pnand %p10511_p7, %p10508_p6 }
  0x6f   :  { %10516 = shalt.err (!%p10513_p8)
}
  0x70   :  { %s10517_s2 = scalar_lea.vmem %s78_s22, 49152  ;;  %p10522_p10 = scmp.lt.s32.totalorder %s78_s22, %s78_s22 }
  0x71   :  { %p10518_p9 = scmp.ne.s32.totalorder %s78_s22, %s10517_s2  ;;  %p10523_p11 = scmp.lt.s32.totalorder %s10517_s2, %s10517_s2 }
  0x73   :  { %p10524_p12 = por %p10523_p11, %p10522_p10 }
  0x75   :  { %p10525_p13 = pnand %p10524_p12, %p10518_p9 }
  0x77   :  { %10528 = shalt.err (!%p10525_p13)
}
  0x78   :  { %83 = dma.hbm_to_vmem [thread:$0]  %s11086_s4, 49152, %s78_s22, [#allocation9], %s10657_s1, %s10657_s1, %s10658_s18  }
  0x79   :  { %s10529_s5 = scalar_lea.hbm %s11088_s6, 128 }
  0x7a   :  { %p10530_p0 = scmp.ne.s32.totalorder %s11088_s6, %s10529_s5  ;;  %p10533_p1 = scmp.lt.u32.totalorder %s10529_s5, %s11088_s6 }
  0x7c   :  { %p10535_p2 = pnand %p10533_p1, %p10530_p0 }
  0x7e   :  { %10538 = shalt.err (!%p10535_p2)
}
  0x7f   :  { %s10539_s0 = scalar_lea.vmem %s103_s24, 128  ;;  %p10544_p4 = scmp.lt.s32.totalorder %s103_s24, %s103_s24 }
  0x80   :  { %p10540_p3 = scmp.ne.s32.totalorder %s103_s24, %s10539_s0  ;;  %p10545_p5 = scmp.lt.s32.totalorder %s10539_s0, %s10539_s0 }
  0x82   :  { %p10546_p6 = por %p10545_p5, %p10544_p4 }
  0x84   :  { %p10547_p7 = pnand %p10546_p6, %p10540_p3 }
  0x86   :  { %10550 = shalt.err (!%p10547_p7)
}
  0x87   :  { %105 = dma.hbm_to_vmem [thread:$0]  %s11088_s6, 128, %s103_s24, [#allocation12]  }
  0x88   :  { %s10665_s20 = smov [#allocation16]   ;;  %s10551_s26 = scalar_lea.hbm %s11090_s8, 128 }
  0x89   :  { %s122_s22 = sshll.u32 %s10665_s20, 4  ;;  %p10552_p8 = scmp.ne.s32.totalorder %s11090_s8, %s10551_s26  ;;  %s123_s22 = int_to_ptr.vmem [resolvable:$true] %s122_s22 }
  0x8a   :  { %p10555_p9 = scmp.lt.u32.totalorder %s10551_s26, %s11090_s8 }
  0x8c   :  { %p10557_p10 = pnand %p10555_p9, %p10552_p8 }
  0x8e   :  { %10560 = shalt.err (!%p10557_p10)
}
  0x8f   :  { %s10561_s14 = scalar_lea.vmem %s123_s22, 128  ;;  %p10566_p12 = scmp.lt.s32.totalorder %s123_s22, %s123_s22 }
  0x90   :  { %p10562_p11 = scmp.ne.s32.totalorder %s123_s22, %s10561_s14  ;;  %p10567_p13 = scmp.lt.s32.totalorder %s10561_s14, %s10561_s14 }
  0x92   :  { %p10568_p0 = por %p10567_p13, %p10566_p12 }
  0x94   :  { %p10569_p1 = pnand %p10568_p0, %p10562_p11 }
  0x96   :  { %10572 = shalt.err (!%p10569_p1)
}
  0x97   :  { %125 = dma.hbm_to_vmem [thread:$0]  %s11090_s8, 128, %s123_s22, [#allocation15]  }
  0x98   :  { %10639 = dma.done.wait [#allocation3], 1536  }
  0x99   :  { %10640 = vsyncadd [#allocation3], 4294965760 }
  0x9a   :  { %10641 = dma.done.wait [#allocation6], 3072  }
  0x9b   :  { %10642 = vsyncadd [#allocation6], 4294964224 }
  0x9c   :  { %10643 = dma.done.wait [#allocation9], 98304  }
  0x9d   :  { %10644 = vsyncadd [#allocation9], 4294868992 }
  0x9e   :  { %10645 = dma.done.wait [#allocation12], 49280  }
  0x9f   :  { %10646 = vsyncadd [#allocation12], 4294918016 }
  0xa0   :  { %10647 = dma.done.wait [#allocation15], 256  }
  0xa1   :  { %10648 = vsyncadd [#allocation15], 4294967040  ;;  %v171_v0 = vld [vmem:[#allocation8] sm:$0xff]  ;;  %v172_v2 = vld [vmem:[#allocation8 + $0x8] sm:$0xff]  ;;  %s10666_s8 = smov [#allocation18]   ;;  %s10667_s29 = smov [#allocation17]  }
  0xa2   :  { %v175_v1 = vld [vmem:[#allocation8 + $0x20] sm:$0xff]  ;;  %v176_v4 = vld [vmem:[#allocation8 + $0x28] sm:$0xff]  ;;  %v160_v54 = vld [vmem:[#allocation2 + $0x38] sm:$0xff]  ;;  %s8978_s2 = sshll.u32 %s10666_s8, 4  ;;  %s8966_s30 = sshll.u32 %s10667_s29, 4  ;;  %s8979_s2 = int_to_ptr.vmem [resolvable:$true] %s8978_s2  ;;  %s8967_s30 = int_to_ptr.vmem [resolvable:$true] %s8966_s30 }
  0xa3   :  { %v9014_v3 = vcombine.high %v171_v0, %v175_v1  ;;  %v9013_v5 = vcombine.low %v171_v0, %v175_v1  ;;  %v179_v6 = vld [vmem:[#allocation8 + $0x40] sm:$0xff]  ;;  %v9016_v8 = vcombine.high %v172_v2, %v176_v4  ;;  %v9015_v9 = vcombine.low %v172_v2, %v176_v4  ;;  %v180_v11 = vld [vmem:[#allocation8 + $0x48] sm:$0xff]  ;;  %s10573_s21 = scalar_lea.vmem %s8979_s2, 1024  ;;  %p10578_p3 = scmp.lt.s32.totalorder %s8979_s2, %s8979_s2 }
  0xa4   :  { %v183_v7 = vld [vmem:[#allocation8 + $0x60] sm:$0xff]  ;;  %v184_v12 = vld [vmem:[#allocation8 + $0x68] sm:$0xff]  ;;  %p10574_p2 = scmp.ne.s32.totalorder %s8979_s2, %s10573_s21  ;;  %p10579_p4 = scmp.lt.s32.totalorder %s10573_s21, %s10573_s21 }
  0xa5   :  { %v9022_v10 = vcombine.high %v179_v6, %v183_v7  ;;  %v187_v13 = vld [vmem:[#allocation8 + $0x80] sm:$0xff]  ;;  %2517 = vmatprep.subr.bf16.mxu0 %v9014_v3  ;;  %v9024_v14 = vcombine.high %v180_v11, %v184_v12  ;;  %v188_v16 = vld [vmem:[#allocation8 + $0x88] sm:$0xff]  ;;  %2646 = vmatprep.subr.bf16.mxu1 %v9016_v8  ;;  %v9021_v18 = vcombine.low %v179_v6, %v183_v7 }
  0xa6   :  { %v191_v15 = vld [vmem:[#allocation8 + $0xa0] sm:$0xff]  ;;  %v192_v17 = vld [vmem:[#allocation8 + $0xa8] sm:$0xff]  ;;  %2518 = vmatpush1.bf16.msra.mxu0 %v9013_v5  ;;  %2647 = vmatpush1.bf16.msra.mxu1 %v9015_v9  ;;  %v9023_v19 = vcombine.low %v180_v11, %v184_v12  ;;  %p10580_p5 = por %p10579_p4, %p10578_p3 }
  0xa7   :  { %2519 = vmatprep.subr.bf16.mxu0 %v9022_v10  ;;  %v9030_v20 = vcombine.high %v187_v13, %v191_v15  ;;  %2648 = vmatprep.subr.bf16.mxu1 %v9024_v14  ;;  %v9032_v21 = vcombine.high %v188_v16, %v192_v17  ;;  %v195_v22 = vld [vmem:[#allocation8 + $0xc0] sm:$0xff]  ;;  %v196_v24 = vld [vmem:[#allocation8 + $0xc8] sm:$0xff]  ;;  %v9029_v26 = vcombine.low %v187_v13, %v191_v15 }
  0xa8   :  { %v199_v23 = vld [vmem:[#allocation8 + $0xe0] sm:$0xff]  ;;  %v200_v25 = vld [vmem:[#allocation8 + $0xe8] sm:$0xff]  ;;  %v9031_v27 = vcombine.low %v188_v16, %v192_v17  ;;  %p10581_p6 = pnand %p10580_p5, %p10574_p2 }
  0xa9   :  { %v9038_v28 = vcombine.high %v195_v22, %v199_v23  ;;  %v9040_v29 = vcombine.high %v196_v24, %v200_v25  ;;  %v203_v30 = vld [vmem:[#allocation8 + $0x100] sm:$0xff]  ;;  %v204_v32 = vld [vmem:[#allocation8 + $0x108] sm:$0xff]  ;;  %v9037_v34 = vcombine.low %v195_v22, %v199_v23  ;;  %v9039_v35 = vcombine.low %v196_v24, %v200_v25 }
  0xaa   :  { %2520 = vmatpush1.bf16.msra.mxu0 %v9021_v18  ;;  %2649 = vmatpush1.bf16.msra.mxu1 %v9023_v19  ;;  %v207_v31 = vld [vmem:[#allocation8 + $0x120] sm:$0xff]  ;;  %v208_v33 = vld [vmem:[#allocation8 + $0x128] sm:$0xff] }
  0xab   :  { %2521 = vmatprep.subr.bf16.mxu0 %v9030_v20  ;;  %2650 = vmatprep.subr.bf16.mxu1 %v9032_v21  ;;  %v9046_v36 = vcombine.high %v203_v30, %v207_v31  ;;  %v9048_v37 = vcombine.high %v204_v32, %v208_v33  ;;  %v211_v38 = vld [vmem:[#allocation8 + $0x140] sm:$0xff]  ;;  %v212_v40 = vld [vmem:[#allocation8 + $0x148] sm:$0xff]  ;;  %v9045_v42 = vcombine.low %v203_v30, %v207_v31 }
  0xac   :  { %v215_v39 = vld [vmem:[#allocation8 + $0x160] sm:$0xff]  ;;  %v216_v41 = vld [vmem:[#allocation8 + $0x168] sm:$0xff]  ;;  %v9047_v43 = vcombine.low %v204_v32, %v208_v33 }
  0xad   :  { %v9054_v44 = vcombine.high %v211_v38, %v215_v39  ;;  %v9056_v45 = vcombine.high %v212_v40, %v216_v41  ;;  %v219_v46 = vld [vmem:[#allocation8 + $0x180] sm:$0xff]  ;;  %v220_v48 = vld [vmem:[#allocation8 + $0x188] sm:$0xff]  ;;  %v9053_v50 = vcombine.low %v211_v38, %v215_v39  ;;  %v9055_v51 = vcombine.low %v212_v40, %v216_v41 }
  0xae   :  { %2522 = vmatpush1.bf16.msra.mxu0 %v9029_v26  ;;  %2651 = vmatpush1.bf16.msra.mxu1 %v9031_v27  ;;  %v223_v47 = vld [vmem:[#allocation8 + $0x1a0] sm:$0xff]  ;;  %v224_v49 = vld [vmem:[#allocation8 + $0x1a8] sm:$0xff] }
  0xaf   :  { %2523 = vmatprep.subr.bf16.mxu0 %v9038_v28  ;;  %2652 = vmatprep.subr.bf16.mxu1 %v9040_v29  ;;  %v9062_v52 = vcombine.high %v219_v46, %v223_v47  ;;  %v154_v53 = vld [vmem:[#allocation2 + $0x8] sm:$0xff]  ;;  %v9064_v55 = vcombine.high %v220_v48, %v224_v49  ;;  %v227_v56 = vld [vmem:[#allocation8 + $0x1c0] sm:$0xff]  ;;  %v9061_v61 = vcombine.low %v219_v46, %v223_v47 }
  0xb0   :  { %v231_v57 = vld [vmem:[#allocation8 + $0x1e0] sm:$0xff]  ;;  %v10869_v58 = vpack.c.bf16 %v160_v54, %v154_v53  ;;  %v228_v59 = vld [vmem:[#allocation8 + $0x1c8] sm:$0xff]  ;;  %v9063_v62 = vcombine.low %v220_v48, %v224_v49 }
  0xb1   :  { %v232_v60 = vld [vmem:[#allocation8 + $0x1e8] sm:$0xff]  ;;  %v9070_v63 = vcombine.high %v227_v56, %v231_v57  ;;  %v235_v1 = vld [vmem:[#allocation8 + $0x200] sm:$0xff]  ;;  %v9069_v5 = vcombine.low %v227_v56, %v231_v57 }
  0xb2   :  { %2524 = vmatpush1.bf16.msra.mxu0 %v9037_v34  ;;  %2653 = vmatpush1.bf16.msra.mxu1 %v9039_v35  ;;  %v9072_v0 = vcombine.high %v228_v59, %v232_v60  ;;  %v239_v2 = vld [vmem:[#allocation8 + $0x220] sm:$0xff]  ;;  %v236_v3 = vld [vmem:[#allocation8 + $0x208] sm:$0xff]  ;;  %v9071_v6 = vcombine.low %v228_v59, %v232_v60 }
  0xb3   :  { %2525 = vmatprep.subr.bf16.mxu0 %v9046_v36  ;;  %2654 = vmatprep.subr.bf16.mxu1 %v9048_v37  ;;  %v240_v4 = vld [vmem:[#allocation8 + $0x228] sm:$0xff]  ;;  %v9078_v7 = vcombine.high %v235_v1, %v239_v2  ;;  %v243_v9 = vld [vmem:[#allocation8 + $0x240] sm:$0xff]  ;;  %v9077_v13 = vcombine.low %v235_v1, %v239_v2 }
  0xb4   :  { %2549 = vmatprep.mubr.bf16.mxu0 %v10869_v58  ;;  %2678 = vmatprep.mubr.bf16.mxu1 %v10869_v58  ;;  %v9080_v8 = vcombine.high %v236_v3, %v240_v4  ;;  %v247_v10 = vld [vmem:[#allocation8 + $0x260] sm:$0xff]  ;;  %v244_v11 = vld [vmem:[#allocation8 + $0x248] sm:$0xff]  ;;  %v9079_v14 = vcombine.low %v236_v3, %v240_v4 }
  0xb5   :  { %v248_v12 = vld [vmem:[#allocation8 + $0x268] sm:$0xff]  ;;  %v9086_v15 = vcombine.high %v243_v9, %v247_v10  ;;  %v251_v17 = vld [vmem:[#allocation8 + $0x280] sm:$0xff]  ;;  %v9085_v21 = vcombine.low %v243_v9, %v247_v10 }
  0xb6   :  { %2526 = vmatpush1.bf16.msra.mxu0 %v9045_v42  ;;  %2655 = vmatpush1.bf16.msra.mxu1 %v9047_v43  ;;  %v9088_v16 = vcombine.high %v244_v11, %v248_v12  ;;  %v255_v18 = vld [vmem:[#allocation8 + $0x2a0] sm:$0xff]  ;;  %v252_v19 = vld [vmem:[#allocation8 + $0x288] sm:$0xff]  ;;  %v9087_v22 = vcombine.low %v244_v11, %v248_v12 }
  0xb7   :  { %2527 = vmatprep.subr.bf16.mxu0 %v9054_v44  ;;  %2656 = vmatprep.subr.bf16.mxu1 %v9056_v45  ;;  %v256_v20 = vld [vmem:[#allocation8 + $0x2a8] sm:$0xff]  ;;  %v9094_v23 = vcombine.high %v251_v17, %v255_v18  ;;  %v259_v25 = vld [vmem:[#allocation8 + $0x2c0] sm:$0xff]  ;;  %v9093_v29 = vcombine.low %v251_v17, %v255_v18  ;;  %v156_v17 = vld [vmem:[#allocation2 + $0x18] sm:$0xff] }
  0xb8   :  { %v9096_v24 = vcombine.high %v252_v19, %v256_v20  ;;  %v263_v26 = vld [vmem:[#allocation8 + $0x2e0] sm:$0xff]  ;;  %v260_v27 = vld [vmem:[#allocation8 + $0x2c8] sm:$0xff]  ;;  %v9095_v30 = vcombine.low %v252_v19, %v256_v20 }
  0xb9   :  { %v264_v28 = vld [vmem:[#allocation8 + $0x2e8] sm:$0xff]  ;;  %v9102_v31 = vcombine.high %v259_v25, %v263_v26  ;;  %v267_v33 = vld [vmem:[#allocation8 + $0x300] sm:$0xff]  ;;  %v9101_v37 = vcombine.low %v259_v25, %v263_v26 }
  0xba   :  { %2528 = vmatpush1.bf16.msra.mxu0 %v9053_v50  ;;  %2657 = vmatpush1.bf16.msra.mxu1 %v9055_v51  ;;  %v9104_v32 = vcombine.high %v260_v27, %v264_v28  ;;  %v271_v34 = vld [vmem:[#allocation8 + $0x320] sm:$0xff]  ;;  %v268_v35 = vld [vmem:[#allocation8 + $0x308] sm:$0xff]  ;;  %v9103_v38 = vcombine.low %v260_v27, %v264_v28 }
  0xbb   :  { %2529 = vmatprep.subr.bf16.mxu0 %v9062_v52  ;;  %2658 = vmatprep.subr.bf16.mxu1 %v9064_v55  ;;  %v272_v36 = vld [vmem:[#allocation8 + $0x328] sm:$0xff]  ;;  %v9110_v39 = vcombine.high %v267_v33, %v271_v34  ;;  %v275_v41 = vld [vmem:[#allocation8 + $0x340] sm:$0xff]  ;;  %v9109_v45 = vcombine.low %v267_v33, %v271_v34 }
  0xbc   :  { %v9112_v40 = vcombine.high %v268_v35, %v272_v36  ;;  %v279_v42 = vld [vmem:[#allocation8 + $0x360] sm:$0xff]  ;;  %v276_v43 = vld [vmem:[#allocation8 + $0x348] sm:$0xff]  ;;  %v9111_v46 = vcombine.low %v268_v35, %v272_v36 }
  0xbd   :  { %v280_v44 = vld [vmem:[#allocation8 + $0x368] sm:$0xff]  ;;  %v9118_v47 = vcombine.high %v275_v41, %v279_v42  ;;  %v283_v49 = vld [vmem:[#allocation8 + $0x380] sm:$0xff]  ;;  %v9117_v53 = vcombine.low %v275_v41, %v279_v42 }
  0xbe   :  { %2530 = vmatpush1.bf16.msra.mxu0 %v9061_v61  ;;  %2659 = vmatpush1.bf16.msra.mxu1 %v9063_v62  ;;  %v9120_v48 = vcombine.high %v276_v43, %v280_v44  ;;  %v287_v50 = vld [vmem:[#allocation8 + $0x3a0] sm:$0xff]  ;;  %v284_v51 = vld [vmem:[#allocation8 + $0x388] sm:$0xff]  ;;  %v9119_v54 = vcombine.low %v276_v43, %v280_v44 }
  0xbf   :  { %2531 = vmatprep.subr.bf16.mxu0 %v9070_v63  ;;  %2660 = vmatprep.subr.bf16.mxu1 %v9072_v0  ;;  %v288_v52 = vld [vmem:[#allocation8 + $0x3a8] sm:$0xff]  ;;  %v9126_v55 = vcombine.high %v283_v49, %v287_v50  ;;  %v291_v57 = vld [vmem:[#allocation8 + $0x3c0] sm:$0xff]  ;;  %v9125_v62 = vcombine.low %v283_v49, %v287_v50 }
  0xc0   :  { %v9128_v56 = vcombine.high %v284_v51, %v288_v52  ;;  %v295_v59 = vld [vmem:[#allocation8 + $0x3e0] sm:$0xff]  ;;  %v292_v60 = vld [vmem:[#allocation8 + $0x3c8] sm:$0xff]  ;;  %v9127_v63 = vcombine.low %v284_v51, %v288_v52 }
  0xc1   :  { %v296_v61 = vld [vmem:[#allocation8 + $0x3e8] sm:$0xff]  ;;  %v9134_v0 = vcombine.high %v291_v57, %v295_v59  ;;  %v299_v2 = vld [vmem:[#allocation8 + $0x400] sm:$0xff] }
  0xc2   :  { %2532 = vmatpush1.bf16.msra.mxu0 %v9069_v5  ;;  %2661 = vmatpush1.bf16.msra.mxu1 %v9071_v6  ;;  %v9136_v1 = vcombine.high %v292_v60, %v296_v61  ;;  %v303_v3 = vld [vmem:[#allocation8 + $0x420] sm:$0xff]  ;;  %v300_v4 = vld [vmem:[#allocation8 + $0x408] sm:$0xff]  ;;  %v9133_v6 = vcombine.low %v291_v57, %v295_v59  ;;  %v9135_v9 = vcombine.low %v292_v60, %v296_v61 }
  0xc3   :  { %2533 = vmatprep.subr.bf16.mxu0 %v9078_v7  ;;  %2662 = vmatprep.subr.bf16.mxu1 %v9080_v8  ;;  %v304_v5 = vld [vmem:[#allocation8 + $0x428] sm:$0xff]  ;;  %v153_v7 = vld [vmem:[#allocation2] sm:$0xff]  ;;  %v159_v8 = vld [vmem:[#allocation2 + $0x30] sm:$0xff]  ;;  %v9142_v10 = vcombine.high %v299_v2, %v303_v3  ;;  %v9141_v19 = vcombine.low %v299_v2, %v303_v3 }
  0xc4   :  { %v9144_v11 = vcombine.high %v300_v4, %v304_v5  ;;  %v307_v12 = vld [vmem:[#allocation8 + $0x440] sm:$0xff]  ;;  %v162_v18 = vld [vmem:[#allocation2 + $0x48] sm:$0xff]  ;;  %v9143_v20 = vcombine.low %v300_v4, %v304_v5 }
  0xc5   :  { %v10875_v25 = vpack.c.bf16 %v162_v18, %v156_v17  ;;  %v316_v26 = vld [vmem:[#allocation8 + $0x488] sm:$0xff]  ;;  %v327_v33 = vld [vmem:[#allocation8 + $0x4e0] sm:$0xff] }
  0xc6   :  { %2534 = vmatpush1.bf16.msra.mxu0 %v9077_v13  ;;  %2663 = vmatpush1.bf16.msra.mxu1 %v9079_v14  ;;  %v311_v13 = vld [vmem:[#allocation8 + $0x460] sm:$0xff]  ;;  %v308_v14 = vld [vmem:[#allocation8 + $0x448] sm:$0xff] }
  0xc7   :  { %2535 = vmatprep.subr.bf16.mxu0 %v9086_v15  ;;  %2664 = vmatprep.subr.bf16.mxu1 %v9088_v16  ;;  %v10873_v15 = vpack.c.bf16 %v159_v8, %v153_v7  ;;  %v312_v16 = vld [vmem:[#allocation8 + $0x468] sm:$0xff]  ;;  %v9149_v28 = vcombine.low %v307_v12, %v311_v13  ;;  %v335_v41 = vld [vmem:[#allocation8 + $0x520] sm:$0xff] }
  0xc8   :  { %v320_v27 = vld [vmem:[#allocation8 + $0x4a8] sm:$0xff]  ;;  %v343_v49 = vld [vmem:[#allocation8 + $0x560] sm:$0xff] }
  0xc9   :  { %v324_v34 = vld [vmem:[#allocation8 + $0x4c8] sm:$0xff]  ;;  %v351_v57 = vld [vmem:[#allocation8 + $0x5a0] sm:$0xff] }
  0xca   :  { %2536 = vmatpush1.bf16.msra.mxu0 %v9085_v21  ;;  %2665 = vmatpush1.bf16.msra.mxu1 %v9087_v22  ;;  %v9150_v21 = vcombine.high %v307_v12, %v311_v13  ;;  %v9152_v22 = vcombine.high %v308_v14, %v312_v16  ;;  %v328_v35 = vld [vmem:[#allocation8 + $0x4e8] sm:$0xff]  ;;  %v359_v2 = vld [vmem:[#allocation8 + $0x5e0] sm:$0xff] }
  0xcb   :  { %2537 = vmatprep.subr.bf16.mxu0 %v9094_v23  ;;  %2666 = vmatprep.subr.bf16.mxu1 %v9096_v24  ;;  %v315_v23 = vld [vmem:[#allocation8 + $0x480] sm:$0xff]  ;;  %v332_v42 = vld [vmem:[#allocation8 + $0x508] sm:$0xff] }
  0xcc   :  { %v319_v24 = vld [vmem:[#allocation8 + $0x4a0] sm:$0xff]  ;;  %v336_v43 = vld [vmem:[#allocation8 + $0x528] sm:$0xff] }
  0xcd   :  { %v9157_v36 = vcombine.low %v315_v23, %v319_v24  ;;  %v340_v50 = vld [vmem:[#allocation8 + $0x548] sm:$0xff]  ;;  %v371_v18 = vld [vmem:[#allocation8 + $0x640] sm:$0xff] }
  0xce   :  { %2538 = vmatpush1.bf16.msra.mxu0 %v9093_v29  ;;  %2667 = vmatpush1.bf16.msra.mxu1 %v9095_v30  ;;  %v9151_v29 = vcombine.low %v308_v14, %v312_v16  ;;  %v9158_v30 = vcombine.high %v315_v23, %v319_v24  ;;  %v344_v51 = vld [vmem:[#allocation8 + $0x568] sm:$0xff] }
  0xcf   :  { %2539 = vmatprep.subr.bf16.mxu0 %v9102_v31  ;;  %2668 = vmatprep.subr.bf16.mxu1 %v9104_v32  ;;  %v9160_v31 = vcombine.high %v316_v26, %v320_v27  ;;  %v323_v32 = vld [vmem:[#allocation8 + $0x4c0] sm:$0xff]  ;;  %v348_v59 = vld [vmem:[#allocation8 + $0x588] sm:$0xff] }
  0xd0   :  { %v9165_v44 = vcombine.low %v323_v32, %v327_v33  ;;  %v352_v60 = vld [vmem:[#allocation8 + $0x5a8] sm:$0xff] }
  0xd1   :  { %v356_v3 = vld [vmem:[#allocation8 + $0x5c8] sm:$0xff] }
  0xd2   :  { %2540 = vmatpush1.bf16.msra.mxu0 %v9101_v37  ;;  %2669 = vmatpush1.bf16.msra.mxu1 %v9103_v38  ;;  %v9159_v37 = vcombine.low %v316_v26, %v320_v27  ;;  %v9166_v38 = vcombine.high %v323_v32, %v327_v33  ;;  %v360_v4 = vld [vmem:[#allocation8 + $0x5e8] sm:$0xff]  ;;  %v379_v27 = vld [vmem:[#allocation8 + $0x680] sm:$0xff] }
  0xd3   :  { %2541 = vmatprep.subr.bf16.mxu0 %v9110_v39  ;;  %2670 = vmatprep.subr.bf16.mxu1 %v9112_v40  ;;  %v9168_v39 = vcombine.high %v324_v34, %v328_v35  ;;  %v331_v40 = vld [vmem:[#allocation8 + $0x500] sm:$0xff]  ;;  %v9200_v8 = vcombine.high %v356_v3, %v360_v4  ;;  %v368_v12 = vld [vmem:[#allocation8 + $0x628] sm:$0xff]  ;;  %v9199_v14 = vcombine.low %v356_v3, %v360_v4 }
  0xd4   :  { %v9173_v52 = vcombine.low %v331_v40, %v335_v41  ;;  %v419_v4 = vld [vmem:[#allocation8 + $0x7c0] sm:$0xff] }
  0xd6   :  { %2542 = vmatpush1.bf16.msra.mxu0 %v9109_v45  ;;  %2671 = vmatpush1.bf16.msra.mxu1 %v9111_v46  ;;  %v9167_v45 = vcombine.low %v324_v34, %v328_v35  ;;  %v9174_v46 = vcombine.high %v331_v40, %v335_v41  ;;  %v387_v35 = vld [vmem:[#allocation8 + $0x6c0] sm:$0xff] }
  0xd7   :  { %2543 = vmatprep.subr.bf16.mxu0 %v9118_v47  ;;  %2672 = vmatprep.subr.bf16.mxu1 %v9120_v48  ;;  %v9176_v47 = vcombine.high %v332_v42, %v336_v43  ;;  %v339_v48 = vld [vmem:[#allocation8 + $0x540] sm:$0xff] }
  0xd8   :  { %v9181_v61 = vcombine.low %v339_v48, %v343_v49 }
  0xda   :  { %2544 = vmatpush1.bf16.msra.mxu0 %v9117_v53  ;;  %2673 = vmatpush1.bf16.msra.mxu1 %v9119_v54  ;;  %v9175_v53 = vcombine.low %v332_v42, %v336_v43  ;;  %v9182_v54 = vcombine.high %v339_v48, %v343_v49  ;;  %v395_v43 = vld [vmem:[#allocation8 + $0x700] sm:$0xff] }
  0xdb   :  { %2545 = vmatprep.subr.bf16.mxu0 %v9126_v55  ;;  %2674 = vmatprep.subr.bf16.mxu1 %v9128_v56  ;;  %v9184_v55 = vcombine.high %v340_v50, %v344_v51  ;;  %v347_v56 = vld [vmem:[#allocation8 + $0x580] sm:$0xff] }
  0xdc   :  { %v9189_v5 = vcombine.low %v347_v56, %v351_v57 }
  0xde   :  { %2546 = vmatpush1.bf16.msra.mxu0 %v9125_v62  ;;  %2675 = vmatpush1.bf16.msra.mxu1 %v9127_v63  ;;  %v9183_v62 = vcombine.low %v340_v50, %v344_v51  ;;  %v9190_v63 = vcombine.high %v347_v56, %v351_v57  ;;  %v403_v51 = vld [vmem:[#allocation8 + $0x740] sm:$0xff] }
  0xdf   :  { %2547 = vmatprep.subr.bf16.mxu0 %v9134_v0  ;;  %2676 = vmatprep.subr.bf16.mxu1 %v9136_v1  ;;  %v9192_v0 = vcombine.high %v348_v59, %v352_v60  ;;  %v355_v1 = vld [vmem:[#allocation8 + $0x5c0] sm:$0xff] }
  0xe0   :  { %v9198_v7 = vcombine.high %v355_v1, %v359_v2  ;;  %v9197_v13 = vcombine.low %v355_v1, %v359_v2 }
  0xe2   :  { %2548 = vmatpush1.bf16.msra.mxu0 %v9133_v6  ;;  %2677 = vmatpush1.bf16.msra.mxu1 %v9135_v9  ;;  %v9191_v6 = vcombine.low %v348_v59, %v352_v60  ;;  %v363_v9 = vld [vmem:[#allocation8 + $0x600] sm:$0xff] }
  0xe3   :  { %2560 = vmatprep.subr.bf16.mxu0 %v9142_v10  ;;  %2689 = vmatprep.subr.bf16.mxu1 %v9144_v11  ;;  %v367_v10 = vld [vmem:[#allocation8 + $0x620] sm:$0xff]  ;;  %v364_v11 = vld [vmem:[#allocation8 + $0x608] sm:$0xff] }
  0xe4   :  { %v9206_v16 = vcombine.high %v363_v9, %v367_v10  ;;  %v9208_v17 = vcombine.high %v364_v11, %v368_v12  ;;  %v9207_v23 = vcombine.low %v364_v11, %v368_v12  ;;  %v411_v60 = vld [vmem:[#allocation8 + $0x780] sm:$0xff] }
  0xe5   :  { %2550 = vmatmul.mubr.bf16.vlgmr.msra.gmra.mrb[0].mxu0 %v10873_v15  ;;  %2679 = vmatmul.mubr.bf16.vlgmr.msra.gmra.mrb[0].mxu1 %v10873_v15  ;;  %v427_v12 = vld [vmem:[#allocation8 + $0x800] sm:$0xff] }
  0xe6   :  { %2561 = vmatpush1.bf16.msra.mxu0 %v9141_v19  ;;  %2690 = vmatpush1.bf16.msra.mxu1 %v9143_v20  ;;  %v375_v19 = vld [vmem:[#allocation8 + $0x660] sm:$0xff]  ;;  %v372_v20 = vld [vmem:[#allocation8 + $0x648] sm:$0xff] }
  0xe7   :  { %2562 = vmatprep.subr.bf16.mxu0 %v9150_v21  ;;  %2691 = vmatprep.subr.bf16.mxu1 %v9152_v22  ;;  %v376_v21 = vld [vmem:[#allocation8 + $0x668] sm:$0xff]  ;;  %v9205_v22 = vcombine.low %v363_v9, %v367_v10  ;;  %v9214_v24 = vcombine.high %v371_v18, %v375_v19 }
  0xe8   :  { %2592 = vmatprep.mubr.bf16.mxu0 %v10875_v25  ;;  %2721 = vmatprep.mubr.bf16.mxu1 %v10875_v25  ;;  %v9216_v26 = vcombine.high %v372_v20, %v376_v21  ;;  %v9215_v32 = vcombine.low %v372_v20, %v376_v21 }
  0xea   :  { %2563 = vmatpush1.bf16.msra.mxu0 %v9149_v28  ;;  %2692 = vmatpush1.bf16.msra.mxu1 %v9151_v29  ;;  %v383_v28 = vld [vmem:[#allocation8 + $0x6a0] sm:$0xff]  ;;  %v380_v29 = vld [vmem:[#allocation8 + $0x688] sm:$0xff] }
  0xeb   :  { %2564 = vmatprep.subr.bf16.mxu0 %v9158_v30  ;;  %2693 = vmatprep.subr.bf16.mxu1 %v9160_v31  ;;  %v384_v30 = vld [vmem:[#allocation8 + $0x6a8] sm:$0xff]  ;;  %v9213_v31 = vcombine.low %v371_v18, %v375_v19  ;;  %v9222_v33 = vcombine.high %v379_v27, %v383_v28  ;;  %v155_v18 = vld [vmem:[#allocation2 + $0x10] sm:$0xff]  ;;  %v161_v19 = vld [vmem:[#allocation2 + $0x40] sm:$0xff] }
  0xec   :  { %v9224_v34 = vcombine.high %v380_v29, %v384_v30  ;;  %v9223_v40 = vcombine.low %v380_v29, %v384_v30  ;;  %v158_v29 = vld [vmem:[#allocation2 + $0x28] sm:$0xff]  ;;  %v164_v30 = vld [vmem:[#allocation2 + $0x58] sm:$0xff] }
  0xee   :  { %2565 = vmatpush1.bf16.msra.mxu0 %v9157_v36  ;;  %2694 = vmatpush1.bf16.msra.mxu1 %v9159_v37  ;;  %v391_v36 = vld [vmem:[#allocation8 + $0x6e0] sm:$0xff]  ;;  %v388_v37 = vld [vmem:[#allocation8 + $0x6c8] sm:$0xff] }
  0xef   :  { %2566 = vmatprep.subr.bf16.mxu0 %v9166_v38  ;;  %2695 = vmatprep.subr.bf16.mxu1 %v9168_v39  ;;  %v392_v38 = vld [vmem:[#allocation8 + $0x6e8] sm:$0xff]  ;;  %v9221_v39 = vcombine.low %v379_v27, %v383_v28  ;;  %v9230_v41 = vcombine.high %v387_v35, %v391_v36  ;;  %v10881_v27 = vpack.c.bf16 %v161_v19, %v155_v18 }
  0xf0   :  { %v9232_v42 = vcombine.high %v388_v37, %v392_v38  ;;  %v9231_v48 = vcombine.low %v388_v37, %v392_v38  ;;  %v440_v28 = vld [vmem:[#allocation8 + $0x868] sm:$0xff]  ;;  %v10883_v37 = vpack.c.bf16 %v164_v30, %v158_v29 }
  0xf1   :  { %v444_v38 = vld [vmem:[#allocation8 + $0x888] sm:$0xff] }
  0xf2   :  { %2567 = vmatpush1.bf16.msra.mxu0 %v9165_v44  ;;  %2696 = vmatpush1.bf16.msra.mxu1 %v9167_v45  ;;  %v399_v44 = vld [vmem:[#allocation8 + $0x720] sm:$0xff]  ;;  %v396_v45 = vld [vmem:[#allocation8 + $0x708] sm:$0xff] }
  0xf3   :  { %2568 = vmatprep.subr.bf16.mxu0 %v9174_v46  ;;  %2697 = vmatprep.subr.bf16.mxu1 %v9176_v47  ;;  %v400_v46 = vld [vmem:[#allocation8 + $0x728] sm:$0xff]  ;;  %v9229_v47 = vcombine.low %v387_v35, %v391_v36  ;;  %v9238_v49 = vcombine.high %v395_v43, %v399_v44  ;;  %v443_v35 = vld [vmem:[#allocation8 + $0x880] sm:$0xff] }
  0xf4   :  { %v9240_v50 = vcombine.high %v396_v45, %v400_v46  ;;  %v9239_v56 = vcombine.low %v396_v45, %v400_v46  ;;  %v447_v36 = vld [vmem:[#allocation8 + $0x8a0] sm:$0xff]  ;;  %v452_v46 = vld [vmem:[#allocation8 + $0x8c8] sm:$0xff] }
  0xf5   :  { %v455_v45 = vld [vmem:[#allocation8 + $0x8e0] sm:$0xff] }
  0xf6   :  { %2569 = vmatpush1.bf16.msra.mxu0 %v9173_v52  ;;  %2698 = vmatpush1.bf16.msra.mxu1 %v9175_v53  ;;  %v407_v52 = vld [vmem:[#allocation8 + $0x760] sm:$0xff]  ;;  %v404_v53 = vld [vmem:[#allocation8 + $0x748] sm:$0xff] }
  0xf7   :  { %2570 = vmatprep.subr.bf16.mxu0 %v9182_v54  ;;  %2699 = vmatprep.subr.bf16.mxu1 %v9184_v55  ;;  %v408_v54 = vld [vmem:[#allocation8 + $0x768] sm:$0xff]  ;;  %v9237_v55 = vcombine.low %v395_v43, %v399_v44  ;;  %v9246_v57 = vcombine.high %v403_v51, %v407_v52  ;;  %v451_v44 = vld [vmem:[#allocation8 + $0x8c0] sm:$0xff] }
  0xf8   :  { %v9248_v59 = vcombine.high %v404_v53, %v408_v54  ;;  %v9247_v1 = vcombine.low %v404_v53, %v408_v54  ;;  %v463_v53 = vld [vmem:[#allocation8 + $0x920] sm:$0xff]  ;;  %v460_v54 = vld [vmem:[#allocation8 + $0x908] sm:$0xff] }
  0xfa   :  { %2571 = vmatpush1.bf16.msra.mxu0 %v9181_v61  ;;  %2700 = vmatpush1.bf16.msra.mxu1 %v9183_v62  ;;  %v415_v61 = vld [vmem:[#allocation8 + $0x7a0] sm:$0xff]  ;;  %v412_v62 = vld [vmem:[#allocation8 + $0x788] sm:$0xff] }
  0xfb   :  { %2572 = vmatprep.subr.bf16.mxu0 %v9190_v63  ;;  %2701 = vmatprep.subr.bf16.mxu1 %v9192_v0  ;;  %v416_v63 = vld [vmem:[#allocation8 + $0x7a8] sm:$0xff]  ;;  %v9245_v0 = vcombine.low %v403_v51, %v407_v52  ;;  %v9254_v2 = vcombine.high %v411_v60, %v415_v61  ;;  %v459_v52 = vld [vmem:[#allocation8 + $0x900] sm:$0xff] }
  0xfc   :  { %v9256_v3 = vcombine.high %v412_v62, %v416_v63  ;;  %v9255_v9 = vcombine.low %v412_v62, %v416_v63  ;;  %v471_v62 = vld [vmem:[#allocation8 + $0x960] sm:$0xff]  ;;  %v468_v63 = vld [vmem:[#allocation8 + $0x948] sm:$0xff] }
  0xfe   :  { %2573 = vmatpush1.bf16.msra.mxu0 %v9189_v5  ;;  %2702 = vmatpush1.bf16.msra.mxu1 %v9191_v6  ;;  %v423_v5 = vld [vmem:[#allocation8 + $0x7e0] sm:$0xff]  ;;  %v420_v6 = vld [vmem:[#allocation8 + $0x7c8] sm:$0xff] }
  0xff   :  { %2574 = vmatprep.subr.bf16.mxu0 %v9198_v7  ;;  %2703 = vmatprep.subr.bf16.mxu1 %v9200_v8  ;;  %v424_v7 = vld [vmem:[#allocation8 + $0x7e8] sm:$0xff]  ;;  %v9253_v8 = vcombine.low %v411_v60, %v415_v61  ;;  %v9262_v10 = vcombine.high %v419_v4, %v423_v5  ;;  %v467_v61 = vld [vmem:[#allocation8 + $0x940] sm:$0xff] }
 0x100   :  { %v9264_v11 = vcombine.high %v420_v6, %v424_v7  ;;  %v9263_v20 = vcombine.low %v420_v6, %v424_v7  ;;  %v479_v6 = vld [vmem:[#allocation8 + $0x9a0] sm:$0xff]  ;;  %v476_v7 = vld [vmem:[#allocation8 + $0x988] sm:$0xff] }
 0x102   :  { %2575 = vmatpush1.bf16.msra.mxu0 %v9197_v13  ;;  %2704 = vmatpush1.bf16.msra.mxu1 %v9199_v14  ;;  %v431_v13 = vld [vmem:[#allocation8 + $0x820] sm:$0xff]  ;;  %v428_v14 = vld [vmem:[#allocation8 + $0x808] sm:$0xff] }
 0x103   :  { %2576 = vmatprep.subr.bf16.mxu0 %v9206_v16  ;;  %2705 = vmatprep.subr.bf16.mxu1 %v9208_v17  ;;  %v432_v16 = vld [vmem:[#allocation8 + $0x828] sm:$0xff]  ;;  %v9261_v17 = vcombine.low %v419_v4, %v423_v5  ;;  %v9270_v21 = vcombine.high %v427_v12, %v431_v13  ;;  %v475_v5 = vld [vmem:[#allocation8 + $0x980] sm:$0xff] }
 0x104   :  { %v9317_v18 = vcombine.low %v475_v5, %v479_v6 }
 0x106   :  { %2577 = vmatpush1.bf16.msra.mxu0 %v9205_v22  ;;  %2706 = vmatpush1.bf16.msra.mxu1 %v9207_v23  ;;  %v9272_v22 = vcombine.high %v428_v14, %v432_v16  ;;  %v435_v23 = vld [vmem:[#allocation8 + $0x840] sm:$0xff] }
 0x107   :  { %2578 = vmatprep.subr.bf16.mxu0 %v9214_v24  ;;  %2707 = vmatprep.subr.bf16.mxu1 %v9216_v26  ;;  %v439_v24 = vld [vmem:[#allocation8 + $0x860] sm:$0xff]  ;;  %v436_v26 = vld [vmem:[#allocation8 + $0x848] sm:$0xff] }
 0x10a   :  { %2579 = vmatpush1.bf16.msra.mxu0 %v9213_v31  ;;  %2708 = vmatpush1.bf16.msra.mxu1 %v9215_v32  ;;  %v9269_v31 = vcombine.low %v427_v12, %v431_v13  ;;  %v9271_v32 = vcombine.low %v428_v14, %v432_v16  ;;  %v483_v13 = vld [vmem:[#allocation8 + $0x9c0] sm:$0xff]  ;;  %v484_v16 = vld [vmem:[#allocation8 + $0x9c8] sm:$0xff] }
 0x10b   :  { %2580 = vmatprep.subr.bf16.mxu0 %v9222_v33  ;;  %2709 = vmatprep.subr.bf16.mxu1 %v9224_v34  ;;  %v9278_v33 = vcombine.high %v435_v23, %v439_v24  ;;  %v9280_v34 = vcombine.high %v436_v26, %v440_v28  ;;  %v487_v14 = vld [vmem:[#allocation8 + $0x9e0] sm:$0xff] }
 0x10e   :  { %2581 = vmatpush1.bf16.msra.mxu0 %v9221_v39  ;;  %2710 = vmatpush1.bf16.msra.mxu1 %v9223_v40  ;;  %v448_v39 = vld [vmem:[#allocation8 + $0x8a8] sm:$0xff]  ;;  %v9277_v40 = vcombine.low %v435_v23, %v439_v24  ;;  %v495_v23 = vld [vmem:[#allocation8 + $0xa20] sm:$0xff] }
 0x10f   :  { %2582 = vmatprep.subr.bf16.mxu0 %v9230_v41  ;;  %2711 = vmatprep.subr.bf16.mxu1 %v9232_v42  ;;  %v9279_v41 = vcombine.low %v436_v26, %v440_v28  ;;  %v9286_v42 = vcombine.high %v443_v35, %v447_v36  ;;  %v9288_v43 = vcombine.high %v444_v38, %v448_v39  ;;  %v492_v24 = vld [vmem:[#allocation8 + $0xa08] sm:$0xff] }
 0x110   :  { %v496_v26 = vld [vmem:[#allocation8 + $0xa28] sm:$0xff]  ;;  %v9325_v28 = vcombine.low %v483_v13, %v487_v14 }
 0x112   :  { %2583 = vmatpush1.bf16.msra.mxu0 %v9229_v47  ;;  %2712 = vmatpush1.bf16.msra.mxu1 %v9231_v48  ;;  %v456_v47 = vld [vmem:[#allocation8 + $0x8e8] sm:$0xff]  ;;  %v9285_v48 = vcombine.low %v443_v35, %v447_v36 }
 0x113   :  { %2584 = vmatprep.subr.bf16.mxu0 %v9238_v49  ;;  %2713 = vmatprep.subr.bf16.mxu1 %v9240_v50  ;;  %v9287_v49 = vcombine.low %v444_v38, %v448_v39  ;;  %v9294_v50 = vcombine.high %v451_v44, %v455_v45  ;;  %v9296_v51 = vcombine.high %v452_v46, %v456_v47  ;;  %v504_v35 = vld [vmem:[#allocation8 + $0xa68] sm:$0xff] }
 0x114   :  { %v9335_v38 = vcombine.low %v492_v24, %v496_v26 }
 0x116   :  { %2585 = vmatpush1.bf16.msra.mxu0 %v9237_v55  ;;  %2714 = vmatpush1.bf16.msra.mxu1 %v9239_v56  ;;  %v464_v55 = vld [vmem:[#allocation8 + $0x928] sm:$0xff]  ;;  %v9293_v56 = vcombine.low %v451_v44, %v455_v45 }
 0x117   :  { %2586 = vmatprep.subr.bf16.mxu0 %v9246_v57  ;;  %2715 = vmatprep.subr.bf16.mxu1 %v9248_v59  ;;  %v9295_v57 = vcombine.low %v452_v46, %v456_v47  ;;  %v9302_v59 = vcombine.high %v459_v52, %v463_v53  ;;  %v9304_v60 = vcombine.high %v460_v54, %v464_v55  ;;  %v512_v44 = vld [vmem:[#allocation8 + $0xaa8] sm:$0xff] }
 0x11a   :  { %2587 = vmatpush1.bf16.msra.mxu0 %v9245_v0  ;;  %2716 = vmatpush1.bf16.msra.mxu1 %v9247_v1  ;;  %v472_v0 = vld [vmem:[#allocation8 + $0x968] sm:$0xff]  ;;  %v9301_v1 = vcombine.low %v459_v52, %v463_v53 }
 0x11b   :  { %2588 = vmatprep.subr.bf16.mxu0 %v9254_v2  ;;  %2717 = vmatprep.subr.bf16.mxu1 %v9256_v3  ;;  %v9303_v2 = vcombine.low %v460_v54, %v464_v55  ;;  %v9310_v3 = vcombine.high %v467_v61, %v471_v62  ;;  %v9312_v4 = vcombine.high %v468_v63, %v472_v0  ;;  %v520_v52 = vld [vmem:[#allocation8 + $0xae8] sm:$0xff] }
 0x11e   :  { %2589 = vmatpush1.bf16.msra.mxu0 %v9253_v8  ;;  %2718 = vmatpush1.bf16.msra.mxu1 %v9255_v9  ;;  %v480_v8 = vld [vmem:[#allocation8 + $0x9a8] sm:$0xff]  ;;  %v9309_v9 = vcombine.low %v467_v61, %v471_v62 }
 0x11f   :  { %2590 = vmatprep.subr.bf16.mxu0 %v9262_v10  ;;  %2719 = vmatprep.subr.bf16.mxu1 %v9264_v11  ;;  %v9311_v10 = vcombine.low %v468_v63, %v472_v0  ;;  %v9318_v11 = vcombine.high %v475_v5, %v479_v6  ;;  %v9320_v12 = vcombine.high %v476_v7, %v480_v8  ;;  %v528_v61 = vld [vmem:[#allocation8 + $0xb28] sm:$0xff] }
 0x120   :  { %v9319_v19 = vcombine.low %v476_v7, %v480_v8  ;;  %v536_v5 = vld [vmem:[#allocation8 + $0xb68] sm:$0xff] }
 0x122   :  { %2591 = vmatpush1.bf16.msra.mxu0 %v9261_v17  ;;  %2720 = vmatpush1.bf16.msra.mxu1 %v9263_v20  ;;  %v488_v17 = vld [vmem:[#allocation8 + $0x9e8] sm:$0xff]  ;;  %v9326_v20 = vcombine.high %v483_v13, %v487_v14 }
 0x123   :  { %2603 = vmatprep.subr.bf16.mxu0 %v9270_v21  ;;  %2732 = vmatprep.subr.bf16.mxu1 %v9272_v22  ;;  %v9328_v21 = vcombine.high %v484_v16, %v488_v17  ;;  %v491_v22 = vld [vmem:[#allocation8 + $0xa00] sm:$0xff]  ;;  %v9327_v29 = vcombine.low %v484_v16, %v488_v17  ;;  %v544_v13 = vld [vmem:[#allocation8 + $0xba8] sm:$0xff] }
 0x124   :  { %v9334_v30 = vcombine.high %v491_v22, %v495_v23  ;;  %v9333_v36 = vcombine.low %v491_v22, %v495_v23  ;;  %v552_v22 = vld [vmem:[#allocation8 + $0xbe8] sm:$0xff] }
 0x125   :  { %2593 = vmatmul.mubr.bf16.vlgmr.msra.gmra.mrb[0].mxu0 %v10881_v27  ;;  %2722 = vmatmul.mubr.bf16.vlgmr.msra.gmra.mrb[0].mxu1 %v10881_v27 }
 0x126   :  { %2604 = vmatpush1.bf16.msra.mxu0 %v9269_v31  ;;  %2733 = vmatpush1.bf16.msra.mxu1 %v9271_v32  ;;  %v9336_v31 = vcombine.high %v492_v24, %v496_v26  ;;  %v499_v32 = vld [vmem:[#allocation8 + $0xa40] sm:$0xff] }
 0x127   :  { %2605 = vmatprep.subr.bf16.mxu0 %v9278_v33  ;;  %2734 = vmatprep.subr.bf16.mxu1 %v9280_v34  ;;  %v503_v33 = vld [vmem:[#allocation8 + $0xa60] sm:$0xff]  ;;  %v500_v34 = vld [vmem:[#allocation8 + $0xa48] sm:$0xff] }
 0x128   :  { %2635 = vmatprep.mubr.bf16.mxu0 %v10883_v37  ;;  %2764 = vmatprep.mubr.bf16.mxu1 %v10883_v37  ;;  %v9342_v39 = vcombine.high %v499_v32, %v503_v33  ;;  %v9341_v45 = vcombine.low %v499_v32, %v503_v33  ;;  %v9343_v46 = vcombine.low %v500_v34, %v504_v35  ;;  %v178_v32 = vld [vmem:[#allocation8 + $0x38] sm:$0xff] }
 0x12a   :  { %2606 = vmatpush1.bf16.msra.mxu0 %v9277_v40  ;;  %2735 = vmatpush1.bf16.msra.mxu1 %v9279_v41  ;;  %v9344_v40 = vcombine.high %v500_v34, %v504_v35  ;;  %v507_v41 = vld [vmem:[#allocation8 + $0xa80] sm:$0xff]  ;;  %v163_v35 = vld [vmem:[#allocation2 + $0x50] sm:$0xff] }
 0x12b   :  { %2607 = vmatprep.subr.bf16.mxu0 %v9286_v42  ;;  %2736 = vmatprep.subr.bf16.mxu1 %v9288_v43  ;;  %v511_v42 = vld [vmem:[#allocation8 + $0xaa0] sm:$0xff]  ;;  %v508_v43 = vld [vmem:[#allocation8 + $0xa88] sm:$0xff] }
 0x12c   :  { %v9350_v47 = vcombine.high %v507_v41, %v511_v42  ;;  %v9349_v53 = vcombine.low %v507_v41, %v511_v42  ;;  %v9351_v54 = vcombine.low %v508_v43, %v512_v44  ;;  %v157_v34 = vld [vmem:[#allocation2 + $0x20] sm:$0xff]  ;;  %v185_v41 = vld [vmem:[#allocation8 + $0x70] sm:$0xff] }
 0x12d   :  { %v10889_v42 = vpack.c.bf16 %v163_v35, %v157_v34 }
 0x12e   :  { %2608 = vmatpush1.bf16.msra.mxu0 %v9285_v48  ;;  %2737 = vmatpush1.bf16.msra.mxu1 %v9287_v49  ;;  %v9352_v48 = vcombine.high %v508_v43, %v512_v44  ;;  %v515_v49 = vld [vmem:[#allocation8 + $0xac0] sm:$0xff]  ;;  %v182_v43 = vld [vmem:[#allocation8 + $0x58] sm:$0xff] }
 0x12f   :  { %2609 = vmatprep.subr.bf16.mxu0 %v9294_v50  ;;  %2738 = vmatprep.subr.bf16.mxu1 %v9296_v51  ;;  %v519_v50 = vld [vmem:[#allocation8 + $0xae0] sm:$0xff]  ;;  %v516_v51 = vld [vmem:[#allocation8 + $0xac8] sm:$0xff]  ;;  %v186_v44 = vld [vmem:[#allocation8 + $0x78] sm:$0xff] }
 0x130   :  { %v9358_v55 = vcombine.high %v515_v49, %v519_v50  ;;  %v9357_v62 = vcombine.low %v515_v49, %v519_v50  ;;  %v9359_v63 = vcombine.low %v516_v51, %v520_v52  ;;  %v189_v49 = vld [vmem:[#allocation8 + $0x90] sm:$0xff] }
 0x131   :  { %v193_v50 = vld [vmem:[#allocation8 + $0xb0] sm:$0xff] }
 0x132   :  { %2610 = vmatpush1.bf16.msra.mxu0 %v9293_v56  ;;  %2739 = vmatpush1.bf16.msra.mxu1 %v9295_v57  ;;  %v9360_v56 = vcombine.high %v516_v51, %v520_v52  ;;  %v523_v57 = vld [vmem:[#allocation8 + $0xb00] sm:$0xff]  ;;  %v190_v51 = vld [vmem:[#allocation8 + $0x98] sm:$0xff] }
 0x133   :  { %2611 = vmatprep.subr.bf16.mxu0 %v9302_v59  ;;  %2740 = vmatprep.subr.bf16.mxu1 %v9304_v60  ;;  %v527_v59 = vld [vmem:[#allocation8 + $0xb20] sm:$0xff]  ;;  %v524_v60 = vld [vmem:[#allocation8 + $0xb08] sm:$0xff]  ;;  %v194_v52 = vld [vmem:[#allocation8 + $0xb8] sm:$0xff] }
 0x134   :  { %v9366_v0 = vcombine.high %v523_v57, %v527_v59  ;;  %v9365_v6 = vcombine.low %v523_v57, %v527_v59  ;;  %v9367_v7 = vcombine.low %v524_v60, %v528_v61  ;;  %v197_v57 = vld [vmem:[#allocation8 + $0xd0] sm:$0xff] }
 0x135   :  { %v201_v59 = vld [vmem:[#allocation8 + $0xf0] sm:$0xff] }
 0x136   :  { %2612 = vmatpush1.bf16.msra.mxu0 %v9301_v1  ;;  %2741 = vmatpush1.bf16.msra.mxu1 %v9303_v2  ;;  %v9368_v1 = vcombine.high %v524_v60, %v528_v61  ;;  %v531_v2 = vld [vmem:[#allocation8 + $0xb40] sm:$0xff]  ;;  %v198_v60 = vld [vmem:[#allocation8 + $0xd8] sm:$0xff] }
 0x137   :  { %2613 = vmatprep.subr.bf16.mxu0 %v9310_v3  ;;  %2742 = vmatprep.subr.bf16.mxu1 %v9312_v4  ;;  %v535_v3 = vld [vmem:[#allocation8 + $0xb60] sm:$0xff]  ;;  %v532_v4 = vld [vmem:[#allocation8 + $0xb48] sm:$0xff]  ;;  %v202_v61 = vld [vmem:[#allocation8 + $0xf8] sm:$0xff] }
 0x138   :  { %v9374_v8 = vcombine.high %v531_v2, %v535_v3  ;;  %v9373_v14 = vcombine.low %v531_v2, %v535_v3  ;;  %v9375_v16 = vcombine.low %v532_v4, %v536_v5  ;;  %v205_v2 = vld [vmem:[#allocation8 + $0x110] sm:$0xff] }
 0x139   :  { %v209_v3 = vld [vmem:[#allocation8 + $0x130] sm:$0xff] }
 0x13a   :  { %2614 = vmatpush1.bf16.msra.mxu0 %v9309_v9  ;;  %2743 = vmatpush1.bf16.msra.mxu1 %v9311_v10  ;;  %v9376_v9 = vcombine.high %v532_v4, %v536_v5  ;;  %v539_v10 = vld [vmem:[#allocation8 + $0xb80] sm:$0xff]  ;;  %v206_v4 = vld [vmem:[#allocation8 + $0x118] sm:$0xff] }
 0x13b   :  { %2615 = vmatprep.subr.bf16.mxu0 %v9318_v11  ;;  %2744 = vmatprep.subr.bf16.mxu1 %v9320_v12  ;;  %v543_v11 = vld [vmem:[#allocation8 + $0xba0] sm:$0xff]  ;;  %v540_v12 = vld [vmem:[#allocation8 + $0xb88] sm:$0xff]  ;;  %v210_v5 = vld [vmem:[#allocation8 + $0x138] sm:$0xff] }
 0x13c   :  { %v9382_v17 = vcombine.high %v539_v10, %v543_v11  ;;  %v9381_v23 = vcombine.low %v539_v10, %v543_v11  ;;  %v9383_v24 = vcombine.low %v540_v12, %v544_v13  ;;  %v217_v10 = vld [vmem:[#allocation8 + $0x170] sm:$0xff]  ;;  %v214_v11 = vld [vmem:[#allocation8 + $0x158] sm:$0xff] }
 0x13e   :  { %2616 = vmatpush1.bf16.msra.mxu0 %v9317_v18  ;;  %2745 = vmatpush1.bf16.msra.mxu1 %v9319_v19  ;;  %v9384_v18 = vcombine.high %v540_v12, %v544_v13  ;;  %v547_v19 = vld [vmem:[#allocation8 + $0xbc0] sm:$0xff]  ;;  %v218_v12 = vld [vmem:[#allocation8 + $0x178] sm:$0xff]  ;;  %v9049_v13 = vcombine.low %v205_v2, %v209_v3 }
 0x13f   :  { %2617 = vmatprep.subr.bf16.mxu0 %v9326_v20  ;;  %2746 = vmatprep.subr.bf16.mxu1 %v9328_v21  ;;  %v551_v20 = vld [vmem:[#allocation8 + $0xbe0] sm:$0xff]  ;;  %v548_v21 = vld [vmem:[#allocation8 + $0xbc8] sm:$0xff] }
 0x140   :  { %v9390_v26 = vcombine.high %v547_v19, %v551_v20  ;;  %v9389_v33 = vcombine.low %v547_v19, %v551_v20  ;;  %v225_v19 = vld [vmem:[#allocation8 + $0x1b0] sm:$0xff]  ;;  %v222_v20 = vld [vmem:[#allocation8 + $0x198] sm:$0xff] }
 0x142   :  { %2618 = vmatpush1.bf16.msra.mxu0 %v9325_v28  ;;  %2747 = vmatpush1.bf16.msra.mxu1 %v9327_v29  ;;  %v9392_v28 = vcombine.high %v548_v21, %v552_v22  ;;  %v173_v29 = vld [vmem:[#allocation8 + $0x10] sm:$0xff] }
 0x143   :  { %2619 = vmatprep.subr.bf16.mxu0 %v9334_v30  ;;  %2748 = vmatprep.subr.bf16.mxu1 %v9336_v31  ;;  %v177_v30 = vld [vmem:[#allocation8 + $0x30] sm:$0xff]  ;;  %v174_v31 = vld [vmem:[#allocation8 + $0x18] sm:$0xff] }
 0x146   :  { %2620 = vmatpush1.bf16.msra.mxu0 %v9333_v36  ;;  %2749 = vmatpush1.bf16.msra.mxu1 %v9335_v38  ;;  %v9391_v36 = vcombine.low %v548_v21, %v552_v22  ;;  %v9018_v38 = vcombine.high %v173_v29, %v177_v30  ;;  %v226_v21 = vld [vmem:[#allocation8 + $0x1b8] sm:$0xff] }
 0x147   :  { %2621 = vmatprep.subr.bf16.mxu0 %v9342_v39  ;;  %2750 = vmatprep.subr.bf16.mxu1 %v9344_v40  ;;  %v9020_v39 = vcombine.high %v174_v31, %v178_v32  ;;  %v181_v40 = vld [vmem:[#allocation8 + $0x50] sm:$0xff] }
 0x14a   :  { %2622 = vmatpush1.bf16.msra.mxu0 %v9341_v45  ;;  %2751 = vmatpush1.bf16.msra.mxu1 %v9343_v46  ;;  %v9017_v45 = vcombine.low %v173_v29, %v177_v30  ;;  %v9019_v46 = vcombine.low %v174_v31, %v178_v32  ;;  %v233_v29 = vld [vmem:[#allocation8 + $0x1f0] sm:$0xff]  ;;  %v230_v30 = vld [vmem:[#allocation8 + $0x1d8] sm:$0xff] }
 0x14b   :  { %2623 = vmatprep.subr.bf16.mxu0 %v9350_v47  ;;  %2752 = vmatprep.subr.bf16.mxu1 %v9352_v48  ;;  %v9026_v47 = vcombine.high %v181_v40, %v185_v41  ;;  %v9028_v48 = vcombine.high %v182_v43, %v186_v44  ;;  %v234_v31 = vld [vmem:[#allocation8 + $0x1f8] sm:$0xff] }
 0x14c   :  { %v9076_v35 = vcombine.high %v230_v30, %v234_v31 }
 0x14e   :  { %2624 = vmatpush1.bf16.msra.mxu0 %v9349_v53  ;;  %2753 = vmatpush1.bf16.msra.mxu1 %v9351_v54  ;;  %v9025_v53 = vcombine.low %v181_v40, %v185_v41  ;;  %v9027_v54 = vcombine.low %v182_v43, %v186_v44  ;;  %v242_v40 = vld [vmem:[#allocation8 + $0x238] sm:$0xff]  ;;  %v9075_v43 = vcombine.low %v230_v30, %v234_v31 }
 0x14f   :  { %2625 = vmatprep.subr.bf16.mxu0 %v9358_v55  ;;  %2754 = vmatprep.subr.bf16.mxu1 %v9360_v56  ;;  %v9034_v55 = vcombine.high %v189_v49, %v193_v50  ;;  %v9036_v56 = vcombine.high %v190_v51, %v194_v52 }
 0x152   :  { %2626 = vmatpush1.bf16.msra.mxu0 %v9357_v62  ;;  %2755 = vmatpush1.bf16.msra.mxu1 %v9359_v63  ;;  %v9033_v62 = vcombine.low %v189_v49, %v193_v50  ;;  %v9035_v63 = vcombine.low %v190_v51, %v194_v52  ;;  %v250_v49 = vld [vmem:[#allocation8 + $0x278] sm:$0xff] }
 0x153   :  { %2627 = vmatprep.subr.bf16.mxu0 %v9366_v0  ;;  %2756 = vmatprep.subr.bf16.mxu1 %v9368_v1  ;;  %v9042_v0 = vcombine.high %v197_v57, %v201_v59  ;;  %v9044_v1 = vcombine.high %v198_v60, %v202_v61 }
 0x156   :  { %2628 = vmatpush1.bf16.msra.mxu0 %v9365_v6  ;;  %2757 = vmatpush1.bf16.msra.mxu1 %v9367_v7  ;;  %v9041_v6 = vcombine.low %v197_v57, %v201_v59  ;;  %v9043_v7 = vcombine.low %v198_v60, %v202_v61  ;;  %v258_v57 = vld [vmem:[#allocation8 + $0x2b8] sm:$0xff] }
 0x157   :  { %2629 = vmatprep.subr.bf16.mxu0 %v9374_v8  ;;  %2758 = vmatprep.subr.bf16.mxu1 %v9376_v9  ;;  %v9050_v8 = vcombine.high %v205_v2, %v209_v3  ;;  %v213_v9 = vld [vmem:[#allocation8 + $0x150] sm:$0xff]  ;;  %v266_v2 = vld [vmem:[#allocation8 + $0x2f8] sm:$0xff] }
 0x158   :  { %v9057_v22 = vcombine.low %v213_v9, %v217_v10 }
 0x15a   :  { %2630 = vmatpush1.bf16.msra.mxu0 %v9373_v14  ;;  %2759 = vmatpush1.bf16.msra.mxu1 %v9375_v16  ;;  %v9051_v14 = vcombine.low %v206_v4, %v210_v5  ;;  %v9058_v16 = vcombine.high %v213_v9, %v217_v10  ;;  %v274_v9 = vld [vmem:[#allocation8 + $0x338] sm:$0xff] }
 0x15b   :  { %2631 = vmatprep.subr.bf16.mxu0 %v9382_v17  ;;  %2760 = vmatprep.subr.bf16.mxu1 %v9384_v18  ;;  %v9060_v17 = vcombine.high %v214_v11, %v218_v12  ;;  %v221_v18 = vld [vmem:[#allocation8 + $0x190] sm:$0xff] }
 0x15c   :  { %v9065_v32 = vcombine.low %v221_v18, %v225_v19 }
 0x15e   :  { %2632 = vmatpush1.bf16.msra.mxu0 %v9381_v23  ;;  %2761 = vmatpush1.bf16.msra.mxu1 %v9383_v24  ;;  %v9059_v23 = vcombine.low %v214_v11, %v218_v12  ;;  %v9066_v24 = vcombine.high %v221_v18, %v225_v19  ;;  %v282_v18 = vld [vmem:[#allocation8 + $0x378] sm:$0xff] }
 0x15f   :  { %2633 = vmatprep.subr.bf16.mxu0 %v9390_v26  ;;  %2762 = vmatprep.subr.bf16.mxu1 %v9392_v28  ;;  %v9068_v26 = vcombine.high %v222_v20, %v226_v21  ;;  %v229_v28 = vld [vmem:[#allocation8 + $0x1d0] sm:$0xff] }
 0x160   :  { %v9074_v34 = vcombine.high %v229_v28, %v233_v29  ;;  %v9073_v41 = vcombine.low %v229_v28, %v233_v29  ;;  %v290_v28 = vld [vmem:[#allocation8 + $0x3b8] sm:$0xff] }
 0x162   :  { %2634 = vmatpush1.bf16.msra.mxu0 %v9389_v33  ;;  %2763 = vmatpush1.bf16.msra.mxu1 %v9391_v36  ;;  %v9067_v33 = vcombine.low %v222_v20, %v226_v21  ;;  %v237_v36 = vld [vmem:[#allocation8 + $0x210] sm:$0xff] }
 0x163   :  { %2775 = vmatprep.subr.bf16.mxu0 %v9018_v38  ;;  %2904 = vmatprep.subr.bf16.mxu1 %v9020_v39  ;;  %v241_v38 = vld [vmem:[#allocation8 + $0x230] sm:$0xff]  ;;  %v238_v39 = vld [vmem:[#allocation8 + $0x218] sm:$0xff] }
 0x164   :  { %v9082_v44 = vcombine.high %v237_v36, %v241_v38  ;;  %v9081_v50 = vcombine.low %v237_v36, %v241_v38  ;;  %v9083_v51 = vcombine.low %v238_v39, %v242_v40  ;;  %v298_v36 = vld [vmem:[#allocation8 + $0x3f8] sm:$0xff] }
 0x165   :  { %2636 = vmatmul.mubr.bf16.vlgmr.msra.gmra.mrb[0].mxu0 %v10889_v42  ;;  %2765 = vmatmul.mubr.bf16.vlgmr.msra.gmra.mrb[0].mxu1 %v10889_v42 }
 0x166   :  { %2776 = vmatpush1.bf16.msra.mxu0 %v9017_v45  ;;  %2905 = vmatpush1.bf16.msra.mxu1 %v9019_v46  ;;  %v9084_v45 = vcombine.high %v238_v39, %v242_v40  ;;  %v245_v46 = vld [vmem:[#allocation8 + $0x250] sm:$0xff] }
 0x167   :  { %2777 = vmatprep.subr.bf16.mxu0 %v9026_v47  ;;  %2906 = vmatprep.subr.bf16.mxu1 %v9028_v48  ;;  %v249_v47 = vld [vmem:[#allocation8 + $0x270] sm:$0xff]  ;;  %v246_v48 = vld [vmem:[#allocation8 + $0x258] sm:$0xff] }
 0x168   :  { %2807 = vmatprep.mubr.bf16.mxu0 %v10869_v58  ;;  %2936 = vmatprep.mubr.bf16.mxu1 %v10869_v58  ;;  %v9052_v58 = vcombine.high %v206_v4, %v210_v5  ;;  %v9090_v52 = vcombine.high %v245_v46, %v249_v47  ;;  %v9089_v59 = vcombine.low %v245_v46, %v249_v47  ;;  %v306_v46 = vld [vmem:[#allocation8 + $0x438] sm:$0xff] }
 0x169   :  { %v9091_v60 = vcombine.low %v246_v48, %v250_v49 }
 0x16a   :  { %2778 = vmatpush1.bf16.msra.mxu0 %v9025_v53  ;;  %2907 = vmatpush1.bf16.msra.mxu1 %v9027_v54  ;;  %v9092_v53 = vcombine.high %v246_v48, %v250_v49  ;;  %v253_v54 = vld [vmem:[#allocation8 + $0x290] sm:$0xff] }
 0x16b   :  { %2779 = vmatprep.subr.bf16.mxu0 %v9034_v55  ;;  %2908 = vmatprep.subr.bf16.mxu1 %v9036_v56  ;;  %v257_v55 = vld [vmem:[#allocation8 + $0x2b0] sm:$0xff]  ;;  %v254_v56 = vld [vmem:[#allocation8 + $0x298] sm:$0xff] }
 0x16c   :  { %v9098_v61 = vcombine.high %v253_v54, %v257_v55  ;;  %v9097_v3 = vcombine.low %v253_v54, %v257_v55  ;;  %v9099_v4 = vcombine.low %v254_v56, %v258_v57  ;;  %v314_v54 = vld [vmem:[#allocation8 + $0x478] sm:$0xff] }
 0x16e   :  { %2780 = vmatpush1.bf16.msra.mxu0 %v9033_v62  ;;  %2909 = vmatpush1.bf16.msra.mxu1 %v9035_v63  ;;  %v9100_v62 = vcombine.high %v254_v56, %v258_v57  ;;  %v261_v63 = vld [vmem:[#allocation8 + $0x2d0] sm:$0xff] }
 0x16f   :  { %2781 = vmatprep.subr.bf16.mxu0 %v9042_v0  ;;  %2910 = vmatprep.subr.bf16.mxu1 %v9044_v1  ;;  %v265_v0 = vld [vmem:[#allocation8 + $0x2f0] sm:$0xff]  ;;  %v262_v1 = vld [vmem:[#allocation8 + $0x2d8] sm:$0xff] }
 0x170   :  { %v9106_v5 = vcombine.high %v261_v63, %v265_v0  ;;  %v9105_v10 = vcombine.low %v261_v63, %v265_v0  ;;  %v9107_v11 = vcombine.low %v262_v1, %v266_v2  ;;  %v322_v63 = vld [vmem:[#allocation8 + $0x4b8] sm:$0xff] }
 0x172   :  { %2782 = vmatpush1.bf16.msra.mxu0 %v9041_v6  ;;  %2911 = vmatpush1.bf16.msra.mxu1 %v9043_v7  ;;  %v9108_v6 = vcombine.high %v262_v1, %v266_v2  ;;  %v269_v7 = vld [vmem:[#allocation8 + $0x310] sm:$0xff] }
 0x173   :  { %2783 = vmatprep.subr.bf16.mxu0 %v9050_v8  ;;  %2912 = vmatprep.subr.bf16.mxu1 %v9052_v58  ;;  %v273_v8 = vld [vmem:[#allocation8 + $0x330] sm:$0xff]  ;;  %v270_v58 = vld [vmem:[#allocation8 + $0x318] sm:$0xff] }
 0x174   :  { %v9114_v12 = vcombine.high %v269_v7, %v273_v8  ;;  %v9113_v19 = vcombine.low %v269_v7, %v273_v8  ;;  %v9115_v20 = vcombine.low %v270_v58, %v274_v9  ;;  %v330_v7 = vld [vmem:[#allocation8 + $0x4f8] sm:$0xff] }
 0x176   :  { %2784 = vmatpush1.bf16.msra.mxu0 %v9049_v13  ;;  %2913 = vmatpush1.bf16.msra.mxu1 %v9051_v14  ;;  %v9116_v13 = vcombine.high %v270_v58, %v274_v9  ;;  %v277_v14 = vld [vmem:[#allocation8 + $0x350] sm:$0xff] }
 0x177   :  { %2785 = vmatprep.subr.bf16.mxu0 %v9058_v16  ;;  %2914 = vmatprep.subr.bf16.mxu1 %v9060_v17  ;;  %v281_v16 = vld [vmem:[#allocation8 + $0x370] sm:$0xff]  ;;  %v278_v17 = vld [vmem:[#allocation8 + $0x358] sm:$0xff] }
 0x178   :  { %v9122_v21 = vcombine.high %v277_v14, %v281_v16  ;;  %v9121_v29 = vcombine.low %v277_v14, %v281_v16  ;;  %v9123_v30 = vcombine.low %v278_v17, %v282_v18 }
 0x17a   :  { %2786 = vmatpush1.bf16.msra.mxu0 %v9057_v22  ;;  %2915 = vmatpush1.bf16.msra.mxu1 %v9059_v23  ;;  %v9124_v22 = vcombine.high %v278_v17, %v282_v18  ;;  %v285_v23 = vld [vmem:[#allocation8 + $0x390] sm:$0xff] }
 0x17b   :  { %2787 = vmatprep.subr.bf16.mxu0 %v9066_v24  ;;  %2916 = vmatprep.subr.bf16.mxu1 %v9068_v26  ;;  %v289_v24 = vld [vmem:[#allocation8 + $0x3b0] sm:$0xff]  ;;  %v286_v26 = vld [vmem:[#allocation8 + $0x398] sm:$0xff] }
 0x17c   :  { %v9130_v31 = vcombine.high %v285_v23, %v289_v24  ;;  %v9129_v38 = vcombine.low %v285_v23, %v289_v24  ;;  %v9131_v39 = vcombine.low %v286_v26, %v290_v28  ;;  %v341_v18 = vld [vmem:[#allocation8 + $0x550] sm:$0xff] }
 0x17e   :  { %2788 = vmatpush1.bf16.msra.mxu0 %v9065_v32  ;;  %2917 = vmatpush1.bf16.msra.mxu1 %v9067_v33  ;;  %v9132_v32 = vcombine.high %v286_v26, %v290_v28  ;;  %v293_v33 = vld [vmem:[#allocation8 + $0x3d0] sm:$0xff] }
 0x17f   :  { %2789 = vmatprep.subr.bf16.mxu0 %v9074_v34  ;;  %2918 = vmatprep.subr.bf16.mxu1 %v9076_v35  ;;  %v297_v34 = vld [vmem:[#allocation8 + $0x3f0] sm:$0xff]  ;;  %v294_v35 = vld [vmem:[#allocation8 + $0x3d8] sm:$0xff] }
 0x180   :  { %v9138_v40 = vcombine.high %v293_v33, %v297_v34  ;;  %v9137_v47 = vcombine.low %v293_v33, %v297_v34  ;;  %v9139_v48 = vcombine.low %v294_v35, %v298_v36  ;;  %v349_v28 = vld [vmem:[#allocation8 + $0x590] sm:$0xff] }
 0x182   :  { %2790 = vmatpush1.bf16.msra.mxu0 %v9073_v41  ;;  %2919 = vmatpush1.bf16.msra.mxu1 %v9075_v43  ;;  %v9140_v41 = vcombine.high %v294_v35, %v298_v36  ;;  %v301_v43 = vld [vmem:[#allocation8 + $0x410] sm:$0xff] }
 0x183   :  { %2791 = vmatprep.subr.bf16.mxu0 %v9082_v44  ;;  %2920 = vmatprep.subr.bf16.mxu1 %v9084_v45  ;;  %v305_v44 = vld [vmem:[#allocation8 + $0x430] sm:$0xff]  ;;  %v302_v45 = vld [vmem:[#allocation8 + $0x418] sm:$0xff] }
 0x184   :  { %v9146_v49 = vcombine.high %v301_v43, %v305_v44  ;;  %v9145_v55 = vcombine.low %v301_v43, %v305_v44  ;;  %v9147_v56 = vcombine.low %v302_v45, %v306_v46  ;;  %v357_v36 = vld [vmem:[#allocation8 + $0x5d0] sm:$0xff] }
 0x186   :  { %2792 = vmatpush1.bf16.msra.mxu0 %v9081_v50  ;;  %2921 = vmatpush1.bf16.msra.mxu1 %v9083_v51  ;;  %v9148_v50 = vcombine.high %v302_v45, %v306_v46  ;;  %v309_v51 = vld [vmem:[#allocation8 + $0x450] sm:$0xff] }
 0x187   :  { %2793 = vmatprep.subr.bf16.mxu0 %v9090_v52  ;;  %2922 = vmatprep.subr.bf16.mxu1 %v9092_v53  ;;  %v313_v52 = vld [vmem:[#allocation8 + $0x470] sm:$0xff]  ;;  %v310_v53 = vld [vmem:[#allocation8 + $0x458] sm:$0xff] }
 0x188   :  { %v9154_v57 = vcombine.high %v309_v51, %v313_v52  ;;  %v9153_v0 = vcombine.low %v309_v51, %v313_v52  ;;  %v9155_v1 = vcombine.low %v310_v53, %v314_v54  ;;  %v365_v46 = vld [vmem:[#allocation8 + $0x610] sm:$0xff] }
 0x18a   :  { %2794 = vmatpush1.bf16.msra.mxu0 %v9089_v59  ;;  %2923 = vmatpush1.bf16.msra.mxu1 %v9091_v60  ;;  %v9156_v59 = vcombine.high %v310_v53, %v314_v54  ;;  %v317_v60 = vld [vmem:[#allocation8 + $0x490] sm:$0xff] }
 0x18b   :  { %2795 = vmatprep.subr.bf16.mxu0 %v9098_v61  ;;  %2924 = vmatprep.subr.bf16.mxu1 %v9100_v62  ;;  %v321_v61 = vld [vmem:[#allocation8 + $0x4b0] sm:$0xff]  ;;  %v318_v62 = vld [vmem:[#allocation8 + $0x498] sm:$0xff] }
 0x18c   :  { %v9162_v2 = vcombine.high %v317_v60, %v321_v61  ;;  %v9161_v8 = vcombine.low %v317_v60, %v321_v61  ;;  %v373_v54 = vld [vmem:[#allocation8 + $0x650] sm:$0xff] }
 0x18e   :  { %2796 = vmatpush1.bf16.msra.mxu0 %v9097_v3  ;;  %2925 = vmatpush1.bf16.msra.mxu1 %v9099_v4  ;;  %v9164_v3 = vcombine.high %v318_v62, %v322_v63  ;;  %v325_v4 = vld [vmem:[#allocation8 + $0x4d0] sm:$0xff] }
 0x18f   :  { %2797 = vmatprep.subr.bf16.mxu0 %v9106_v5  ;;  %2926 = vmatprep.subr.bf16.mxu1 %v9108_v6  ;;  %v329_v5 = vld [vmem:[#allocation8 + $0x4f0] sm:$0xff]  ;;  %v326_v6 = vld [vmem:[#allocation8 + $0x4d8] sm:$0xff] }
 0x190   :  { %v9170_v58 = vcombine.high %v325_v4, %v329_v5  ;;  %v9172_v9 = vcombine.high %v326_v6, %v330_v7  ;;  %v9169_v14 = vcombine.low %v325_v4, %v329_v5  ;;  %v9171_v16 = vcombine.low %v326_v6, %v330_v7  ;;  %v389_v7 = vld [vmem:[#allocation8 + $0x6d0] sm:$0xff] }
 0x192   :  { %2798 = vmatpush1.bf16.msra.mxu0 %v9105_v10  ;;  %2927 = vmatpush1.bf16.msra.mxu1 %v9107_v11  ;;  %v333_v10 = vld [vmem:[#allocation8 + $0x510] sm:$0xff] }
 0x193   :  { %2799 = vmatprep.subr.bf16.mxu0 %v9114_v12  ;;  %2928 = vmatprep.subr.bf16.mxu1 %v9116_v13  ;;  %v337_v11 = vld [vmem:[#allocation8 + $0x530] sm:$0xff]  ;;  %v334_v12 = vld [vmem:[#allocation8 + $0x518] sm:$0xff] }
 0x194   :  { %v338_v13 = vld [vmem:[#allocation8 + $0x538] sm:$0xff]  ;;  %v9178_v17 = vcombine.high %v333_v10, %v337_v11 }
 0x195   :  { %v9179_v23 = vcombine.low %v334_v12, %v338_v13 }
 0x196   :  { %2800 = vmatpush1.bf16.msra.mxu0 %v9113_v19  ;;  %2929 = vmatpush1.bf16.msra.mxu1 %v9115_v20  ;;  %v345_v19 = vld [vmem:[#allocation8 + $0x570] sm:$0xff]  ;;  %v342_v20 = vld [vmem:[#allocation8 + $0x558] sm:$0xff] }
 0x197   :  { %2801 = vmatprep.subr.bf16.mxu0 %v9122_v21  ;;  %2930 = vmatprep.subr.bf16.mxu1 %v9124_v22  ;;  %v346_v21 = vld [vmem:[#allocation8 + $0x578] sm:$0xff]  ;;  %v9177_v22 = vcombine.low %v333_v10, %v337_v11  ;;  %v9186_v24 = vcombine.high %v341_v18, %v345_v19 }
 0x198   :  { %v9188_v26 = vcombine.high %v342_v20, %v346_v21  ;;  %v9187_v33 = vcombine.low %v342_v20, %v346_v21  ;;  %v405_v21 = vld [vmem:[#allocation8 + $0x750] sm:$0xff] }
 0x19a   :  { %2802 = vmatpush1.bf16.msra.mxu0 %v9121_v29  ;;  %2931 = vmatpush1.bf16.msra.mxu1 %v9123_v30  ;;  %v353_v29 = vld [vmem:[#allocation8 + $0x5b0] sm:$0xff]  ;;  %v350_v30 = vld [vmem:[#allocation8 + $0x598] sm:$0xff] }
 0x19b   :  { %2803 = vmatprep.subr.bf16.mxu0 %v9130_v31  ;;  %2932 = vmatprep.subr.bf16.mxu1 %v9132_v32  ;;  %v354_v31 = vld [vmem:[#allocation8 + $0x5b8] sm:$0xff]  ;;  %v9185_v32 = vcombine.low %v341_v18, %v345_v19  ;;  %v9194_v34 = vcombine.high %v349_v28, %v353_v29 }
 0x19c   :  { %v9196_v35 = vcombine.high %v350_v30, %v354_v31  ;;  %v9195_v43 = vcombine.low %v350_v30, %v354_v31  ;;  %v413_v31 = vld [vmem:[#allocation8 + $0x790] sm:$0xff] }
 0x19e   :  { %2804 = vmatpush1.bf16.msra.mxu0 %v9129_v38  ;;  %2933 = vmatpush1.bf16.msra.mxu1 %v9131_v39  ;;  %v361_v38 = vld [vmem:[#allocation8 + $0x5f0] sm:$0xff]  ;;  %v358_v39 = vld [vmem:[#allocation8 + $0x5d8] sm:$0xff] }
 0x19f   :  { %2805 = vmatprep.subr.bf16.mxu0 %v9138_v40  ;;  %2934 = vmatprep.subr.bf16.mxu1 %v9140_v41  ;;  %v362_v40 = vld [vmem:[#allocation8 + $0x5f8] sm:$0xff]  ;;  %v9193_v41 = vcombine.low %v349_v28, %v353_v29  ;;  %v9202_v44 = vcombine.high %v357_v36, %v361_v38 }
 0x1a0   :  { %v9204_v45 = vcombine.high %v358_v39, %v362_v40  ;;  %v9203_v51 = vcombine.low %v358_v39, %v362_v40  ;;  %v421_v40 = vld [vmem:[#allocation8 + $0x7d0] sm:$0xff] }
 0x1a2   :  { %2806 = vmatpush1.bf16.msra.mxu0 %v9137_v47  ;;  %2935 = vmatpush1.bf16.msra.mxu1 %v9139_v48  ;;  %v369_v47 = vld [vmem:[#allocation8 + $0x630] sm:$0xff]  ;;  %v366_v48 = vld [vmem:[#allocation8 + $0x618] sm:$0xff] }
 0x1a3   :  { %2818 = vmatprep.subr.bf16.mxu0 %v9146_v49  ;;  %2947 = vmatprep.subr.bf16.mxu1 %v9148_v50  ;;  %v370_v49 = vld [vmem:[#allocation8 + $0x638] sm:$0xff]  ;;  %v9201_v50 = vcombine.low %v357_v36, %v361_v38  ;;  %v9210_v52 = vcombine.high %v365_v46, %v369_v47 }
 0x1a4   :  { %v9212_v53 = vcombine.high %v366_v48, %v370_v49  ;;  %v9211_v60 = vcombine.low %v366_v48, %v370_v49  ;;  %v429_v49 = vld [vmem:[#allocation8 + $0x810] sm:$0xff] }
 0x1a5   :  { %2808 = vmatmul.mubr.bf16.vlgmr.msra.gmra.mrb[4].mxu0 %v10873_v15  ;;  %2937 = vmatmul.mubr.bf16.vlgmr.msra.gmra.mrb[4].mxu1 %v10873_v15  ;;  %v9163_v15 = vcombine.low %v318_v62, %v322_v63  ;;  %v381_v63 = vld [vmem:[#allocation8 + $0x690] sm:$0xff] }
 0x1a6   :  { %2819 = vmatpush1.bf16.msra.mxu0 %v9145_v55  ;;  %2948 = vmatpush1.bf16.msra.mxu1 %v9147_v56  ;;  %v377_v55 = vld [vmem:[#allocation8 + $0x670] sm:$0xff]  ;;  %v374_v56 = vld [vmem:[#allocation8 + $0x658] sm:$0xff] }
 0x1a7   :  { %2820 = vmatprep.subr.bf16.mxu0 %v9154_v57  ;;  %2949 = vmatprep.subr.bf16.mxu1 %v9156_v59  ;;  %v378_v57 = vld [vmem:[#allocation8 + $0x678] sm:$0xff]  ;;  %v9209_v59 = vcombine.low %v365_v46, %v369_v47  ;;  %v9218_v61 = vcombine.high %v373_v54, %v377_v55 }
 0x1a8   :  { %2850 = vmatprep.mubr.bf16.mxu0 %v10875_v25  ;;  %2979 = vmatprep.mubr.bf16.mxu1 %v10875_v25  ;;  %v9180_v25 = vcombine.high %v334_v12, %v338_v13  ;;  %v9220_v62 = vcombine.high %v374_v56, %v378_v57  ;;  %v9219_v4 = vcombine.low %v374_v56, %v378_v57  ;;  %v397_v13 = vld [vmem:[#allocation8 + $0x710] sm:$0xff] }
 0x1a9   :  { %v437_v57 = vld [vmem:[#allocation8 + $0x850] sm:$0xff] }
 0x1aa   :  { %2821 = vmatpush1.bf16.msra.mxu0 %v9153_v0  ;;  %2950 = vmatpush1.bf16.msra.mxu1 %v9155_v1  ;;  %v385_v0 = vld [vmem:[#allocation8 + $0x6b0] sm:$0xff]  ;;  %v382_v1 = vld [vmem:[#allocation8 + $0x698] sm:$0xff] }
 0x1ab   :  { %2822 = vmatprep.subr.bf16.mxu0 %v9162_v2  ;;  %2951 = vmatprep.subr.bf16.mxu1 %v9164_v3  ;;  %v386_v2 = vld [vmem:[#allocation8 + $0x6b8] sm:$0xff]  ;;  %v9217_v3 = vcombine.low %v373_v54, %v377_v55  ;;  %v9226_v5 = vcombine.high %v381_v63, %v385_v0 }
 0x1ac   :  { %v9228_v6 = vcombine.high %v382_v1, %v386_v2  ;;  %v9227_v10 = vcombine.low %v382_v1, %v386_v2  ;;  %v445_v2 = vld [vmem:[#allocation8 + $0x890] sm:$0xff] }
 0x1ae   :  { %2823 = vmatpush1.bf16.msra.mxu0 %v9161_v8  ;;  %2952 = vmatpush1.bf16.msra.mxu1 %v9163_v15  ;;  %v393_v8 = vld [vmem:[#allocation8 + $0x6f0] sm:$0xff]  ;;  %v390_v15 = vld [vmem:[#allocation8 + $0x6d8] sm:$0xff] }
 0x1af   :  { %2824 = vmatprep.subr.bf16.mxu0 %v9170_v58  ;;  %2953 = vmatprep.subr.bf16.mxu1 %v9172_v9  ;;  %v394_v58 = vld [vmem:[#allocation8 + $0x6f8] sm:$0xff]  ;;  %v9225_v9 = vcombine.low %v381_v63, %v385_v0  ;;  %v9234_v11 = vcombine.high %v389_v7, %v393_v8 }
 0x1b0   :  { %v9236_v12 = vcombine.high %v390_v15, %v394_v58  ;;  %v9235_v18 = vcombine.low %v390_v15, %v394_v58  ;;  %v453_v58 = vld [vmem:[#allocation8 + $0x8d0] sm:$0xff] }
 0x1b2   :  { %2825 = vmatpush1.bf16.msra.mxu0 %v9169_v14  ;;  %2954 = vmatpush1.bf16.msra.mxu1 %v9171_v16  ;;  %v401_v14 = vld [vmem:[#allocation8 + $0x730] sm:$0xff]  ;;  %v398_v16 = vld [vmem:[#allocation8 + $0x718] sm:$0xff] }
 0x1b3   :  { %2826 = vmatprep.subr.bf16.mxu0 %v9178_v17  ;;  %2955 = vmatprep.subr.bf16.mxu1 %v9180_v25  ;;  %v402_v17 = vld [vmem:[#allocation8 + $0x738] sm:$0xff]  ;;  %v9233_v25 = vcombine.low %v389_v7, %v393_v8  ;;  %v9242_v19 = vcombine.high %v397_v13, %v401_v14 }
 0x1b4   :  { %v9244_v20 = vcombine.high %v398_v16, %v402_v17  ;;  %v9243_v28 = vcombine.low %v398_v16, %v402_v17  ;;  %v461_v16 = vld [vmem:[#allocation8 + $0x910] sm:$0xff] }
 0x1b5   :  { %v465_v17 = vld [vmem:[#allocation8 + $0x930] sm:$0xff] }
 0x1b6   :  { %2827 = vmatpush1.bf16.msra.mxu0 %v9177_v22  ;;  %2956 = vmatpush1.bf16.msra.mxu1 %v9179_v23  ;;  %v409_v22 = vld [vmem:[#allocation8 + $0x770] sm:$0xff]  ;;  %v406_v23 = vld [vmem:[#allocation8 + $0x758] sm:$0xff] }
 0x1b7   :  { %2828 = vmatprep.subr.bf16.mxu0 %v9186_v24  ;;  %2957 = vmatprep.subr.bf16.mxu1 %v9188_v26  ;;  %v410_v24 = vld [vmem:[#allocation8 + $0x778] sm:$0xff]  ;;  %v9241_v26 = vcombine.low %v397_v13, %v401_v14  ;;  %v9250_v29 = vcombine.high %v405_v21, %v409_v22 }
 0x1b8   :  { %v9252_v30 = vcombine.high %v406_v23, %v410_v24  ;;  %v9251_v36 = vcombine.low %v406_v23, %v410_v24  ;;  %v473_v23 = vld [vmem:[#allocation8 + $0x970] sm:$0xff]  ;;  %v470_v24 = vld [vmem:[#allocation8 + $0x958] sm:$0xff] }
 0x1ba   :  { %2829 = vmatpush1.bf16.msra.mxu0 %v9185_v32  ;;  %2958 = vmatpush1.bf16.msra.mxu1 %v9187_v33  ;;  %v417_v32 = vld [vmem:[#allocation8 + $0x7b0] sm:$0xff]  ;;  %v414_v33 = vld [vmem:[#allocation8 + $0x798] sm:$0xff] }
 0x1bb   :  { %2830 = vmatprep.subr.bf16.mxu0 %v9194_v34  ;;  %2959 = vmatprep.subr.bf16.mxu1 %v9196_v35  ;;  %v418_v34 = vld [vmem:[#allocation8 + $0x7b8] sm:$0xff]  ;;  %v9249_v35 = vcombine.low %v405_v21, %v409_v22  ;;  %v9258_v38 = vcombine.high %v413_v31, %v417_v32  ;;  %v9306_v21 = vcombine.high %v461_v16, %v465_v17  ;;  %v469_v22 = vld [vmem:[#allocation8 + $0x950] sm:$0xff] }
 0x1bc   :  { %v9260_v39 = vcombine.high %v414_v33, %v418_v34  ;;  %v9259_v46 = vcombine.low %v414_v33, %v418_v34  ;;  %v481_v33 = vld [vmem:[#allocation8 + $0x9b0] sm:$0xff]  ;;  %v478_v34 = vld [vmem:[#allocation8 + $0x998] sm:$0xff] }
 0x1be   :  { %2831 = vmatpush1.bf16.msra.mxu0 %v9193_v41  ;;  %2960 = vmatpush1.bf16.msra.mxu1 %v9195_v43  ;;  %v425_v41 = vld [vmem:[#allocation8 + $0x7f0] sm:$0xff]  ;;  %v422_v43 = vld [vmem:[#allocation8 + $0x7d8] sm:$0xff] }
 0x1bf   :  { %2832 = vmatprep.subr.bf16.mxu0 %v9202_v44  ;;  %2961 = vmatprep.subr.bf16.mxu1 %v9204_v45  ;;  %v426_v44 = vld [vmem:[#allocation8 + $0x7f8] sm:$0xff]  ;;  %v9257_v45 = vcombine.low %v413_v31, %v417_v32  ;;  %v9266_v47 = vcombine.high %v421_v40, %v425_v41  ;;  %v477_v32 = vld [vmem:[#allocation8 + $0x990] sm:$0xff] }
 0x1c0   :  { %v9268_v48 = vcombine.high %v422_v43, %v426_v44  ;;  %v9267_v54 = vcombine.low %v422_v43, %v426_v44  ;;  %v489_v43 = vld [vmem:[#allocation8 + $0x9f0] sm:$0xff]  ;;  %v486_v44 = vld [vmem:[#allocation8 + $0x9d8] sm:$0xff] }
 0x1c2   :  { %2833 = vmatpush1.bf16.msra.mxu0 %v9201_v50  ;;  %2962 = vmatpush1.bf16.msra.mxu1 %v9203_v51  ;;  %v433_v50 = vld [vmem:[#allocation8 + $0x830] sm:$0xff]  ;;  %v430_v51 = vld [vmem:[#allocation8 + $0x818] sm:$0xff] }
 0x1c3   :  { %2834 = vmatprep.subr.bf16.mxu0 %v9210_v52  ;;  %2963 = vmatprep.subr.bf16.mxu1 %v9212_v53  ;;  %v434_v52 = vld [vmem:[#allocation8 + $0x838] sm:$0xff]  ;;  %v9265_v53 = vcombine.low %v421_v40, %v425_v41  ;;  %v9274_v55 = vcombine.high %v429_v49, %v433_v50  ;;  %v485_v41 = vld [vmem:[#allocation8 + $0x9d0] sm:$0xff] }
 0x1c4   :  { %v9276_v56 = vcombine.high %v430_v51, %v434_v52  ;;  %v9275_v63 = vcombine.low %v430_v51, %v434_v52  ;;  %v497_v51 = vld [vmem:[#allocation8 + $0xa30] sm:$0xff]  ;;  %v494_v52 = vld [vmem:[#allocation8 + $0xa18] sm:$0xff] }
 0x1c6   :  { %2835 = vmatpush1.bf16.msra.mxu0 %v9209_v59  ;;  %2964 = vmatpush1.bf16.msra.mxu1 %v9211_v60  ;;  %v441_v59 = vld [vmem:[#allocation8 + $0x870] sm:$0xff]  ;;  %v438_v60 = vld [vmem:[#allocation8 + $0x858] sm:$0xff] }
 0x1c7   :  { %2836 = vmatprep.subr.bf16.mxu0 %v9218_v61  ;;  %2965 = vmatprep.subr.bf16.mxu1 %v9220_v62  ;;  %v442_v61 = vld [vmem:[#allocation8 + $0x878] sm:$0xff]  ;;  %v9273_v62 = vcombine.low %v429_v49, %v433_v50  ;;  %v9282_v0 = vcombine.high %v437_v57, %v441_v59  ;;  %v493_v50 = vld [vmem:[#allocation8 + $0xa10] sm:$0xff] }
 0x1c8   :  { %v9284_v1 = vcombine.high %v438_v60, %v442_v61  ;;  %v9283_v7 = vcombine.low %v438_v60, %v442_v61  ;;  %v505_v60 = vld [vmem:[#allocation8 + $0xa70] sm:$0xff]  ;;  %v502_v61 = vld [vmem:[#allocation8 + $0xa58] sm:$0xff] }
 0x1ca   :  { %2837 = vmatpush1.bf16.msra.mxu0 %v9217_v3  ;;  %2966 = vmatpush1.bf16.msra.mxu1 %v9219_v4  ;;  %v449_v3 = vld [vmem:[#allocation8 + $0x8b0] sm:$0xff]  ;;  %v446_v4 = vld [vmem:[#allocation8 + $0x898] sm:$0xff] }
 0x1cb   :  { %2838 = vmatprep.subr.bf16.mxu0 %v9226_v5  ;;  %2967 = vmatprep.subr.bf16.mxu1 %v9228_v6  ;;  %v450_v5 = vld [vmem:[#allocation8 + $0x8b8] sm:$0xff]  ;;  %v9281_v6 = vcombine.low %v437_v57, %v441_v59  ;;  %v9290_v8 = vcombine.high %v445_v2, %v449_v3  ;;  %v501_v59 = vld [vmem:[#allocation8 + $0xa50] sm:$0xff] }
 0x1cc   :  { %v9292_v15 = vcombine.high %v446_v4, %v450_v5 }
 0x1ce   :  { %2839 = vmatpush1.bf16.msra.mxu0 %v9225_v9  ;;  %2968 = vmatpush1.bf16.msra.mxu1 %v9227_v10  ;;  %v457_v9 = vld [vmem:[#allocation8 + $0x8f0] sm:$0xff]  ;;  %v454_v10 = vld [vmem:[#allocation8 + $0x8d8] sm:$0xff] }
 0x1cf   :  { %2840 = vmatprep.subr.bf16.mxu0 %v9234_v11  ;;  %2969 = vmatprep.subr.bf16.mxu1 %v9236_v12  ;;  %v458_v11 = vld [vmem:[#allocation8 + $0x8f8] sm:$0xff]  ;;  %v9289_v12 = vcombine.low %v445_v2, %v449_v3  ;;  %v9298_v13 = vcombine.high %v453_v58, %v457_v9  ;;  %v509_v3 = vld [vmem:[#allocation8 + $0xa90] sm:$0xff] }
 0x1d0   :  { %v9300_v14 = vcombine.high %v454_v10, %v458_v11 }
 0x1d2   :  { %2841 = vmatpush1.bf16.msra.mxu0 %v9233_v25  ;;  %2970 = vmatpush1.bf16.msra.mxu1 %v9235_v18  ;;  %v462_v25 = vld [vmem:[#allocation8 + $0x918] sm:$0xff] }
 0x1d3   :  { %2842 = vmatprep.subr.bf16.mxu0 %v9242_v19  ;;  %2971 = vmatprep.subr.bf16.mxu1 %v9244_v20  ;;  %v466_v18 = vld [vmem:[#allocation8 + $0x938] sm:$0xff]  ;;  %v9297_v19 = vcombine.low %v453_v58, %v457_v9  ;;  %v9299_v20 = vcombine.low %v454_v10, %v458_v11  ;;  %v517_v9 = vld [vmem:[#allocation8 + $0xad0] sm:$0xff] }
 0x1d4   :  { %v521_v10 = vld [vmem:[#allocation8 + $0xaf0] sm:$0xff]  ;;  %v518_v11 = vld [vmem:[#allocation8 + $0xad8] sm:$0xff] }
 0x1d6   :  { %2843 = vmatpush1.bf16.msra.mxu0 %v9241_v26  ;;  %2972 = vmatpush1.bf16.msra.mxu1 %v9243_v28  ;;  %v474_v26 = vld [vmem:[#allocation8 + $0x978] sm:$0xff]  ;;  %v9305_v28 = vcombine.low %v461_v16, %v465_v17  ;;  %v525_v17 = vld [vmem:[#allocation8 + $0xb10] sm:$0xff] }
 0x1d7   :  { %2844 = vmatprep.subr.bf16.mxu0 %v9250_v29  ;;  %2973 = vmatprep.subr.bf16.mxu1 %v9252_v30  ;;  %v9307_v29 = vcombine.low %v462_v25, %v466_v18  ;;  %v9314_v30 = vcombine.high %v469_v22, %v473_v23  ;;  %v9316_v31 = vcombine.high %v470_v24, %v474_v26 }
 0x1da   :  { %2845 = vmatpush1.bf16.msra.mxu0 %v9249_v35  ;;  %2974 = vmatpush1.bf16.msra.mxu1 %v9251_v36  ;;  %v482_v35 = vld [vmem:[#allocation8 + $0x9b8] sm:$0xff]  ;;  %v9313_v36 = vcombine.low %v469_v22, %v473_v23  ;;  %v533_v23 = vld [vmem:[#allocation8 + $0xb50] sm:$0xff] }
 0x1db   :  { %2846 = vmatprep.subr.bf16.mxu0 %v9258_v38  ;;  %2975 = vmatprep.subr.bf16.mxu1 %v9260_v39  ;;  %v9315_v38 = vcombine.low %v470_v24, %v474_v26  ;;  %v9322_v39 = vcombine.high %v477_v32, %v481_v33  ;;  %v9324_v40 = vcombine.high %v478_v34, %v482_v35  ;;  %v537_v24 = vld [vmem:[#allocation8 + $0xb70] sm:$0xff]  ;;  %v534_v26 = vld [vmem:[#allocation8 + $0xb58] sm:$0xff] }
 0x1de   :  { %2847 = vmatpush1.bf16.msra.mxu0 %v9257_v45  ;;  %2976 = vmatpush1.bf16.msra.mxu1 %v9259_v46  ;;  %v490_v45 = vld [vmem:[#allocation8 + $0x9f8] sm:$0xff]  ;;  %v9321_v46 = vcombine.low %v477_v32, %v481_v33  ;;  %v541_v33 = vld [vmem:[#allocation8 + $0xb90] sm:$0xff] }
 0x1df   :  { %2848 = vmatprep.subr.bf16.mxu0 %v9266_v47  ;;  %2977 = vmatprep.subr.bf16.mxu1 %v9268_v48  ;;  %v9323_v47 = vcombine.low %v478_v34, %v482_v35  ;;  %v9330_v48 = vcombine.high %v485_v41, %v489_v43  ;;  %v9332_v49 = vcombine.high %v486_v44, %v490_v45  ;;  %v545_v34 = vld [vmem:[#allocation8 + $0xbb0] sm:$0xff]  ;;  %v542_v35 = vld [vmem:[#allocation8 + $0xb98] sm:$0xff] }
 0x1e2   :  { %2849 = vmatpush1.bf16.msra.mxu0 %v9265_v53  ;;  %2978 = vmatpush1.bf16.msra.mxu1 %v9267_v54  ;;  %v498_v53 = vld [vmem:[#allocation8 + $0xa38] sm:$0xff]  ;;  %v9329_v54 = vcombine.low %v485_v41, %v489_v43  ;;  %v549_v43 = vld [vmem:[#allocation8 + $0xbd0] sm:$0xff] }
 0x1e3   :  { %2861 = vmatprep.subr.bf16.mxu0 %v9274_v55  ;;  %2990 = vmatprep.subr.bf16.mxu1 %v9276_v56  ;;  %v9331_v55 = vcombine.low %v486_v44, %v490_v45  ;;  %v9338_v56 = vcombine.high %v493_v50, %v497_v51  ;;  %v9340_v57 = vcombine.high %v494_v52, %v498_v53  ;;  %v553_v44 = vld [vmem:[#allocation8 + $0xbf0] sm:$0xff]  ;;  %v550_v45 = vld [vmem:[#allocation8 + $0xbd8] sm:$0xff] }
 0x1e5   :  { %2851 = vmatmul.mubr.bf16.vlgmr.msra.gmra.mrb[4].mxu0 %v10881_v27  ;;  %2980 = vmatmul.mubr.bf16.vlgmr.msra.gmra.mrb[4].mxu1 %v10881_v27  ;;  %v9291_v27 = vcombine.low %v446_v4, %v450_v5  ;;  %v513_v4 = vld [vmem:[#allocation8 + $0xab0] sm:$0xff]  ;;  %v510_v5 = vld [vmem:[#allocation8 + $0xa98] sm:$0xff] }
 0x1e6   :  { %2862 = vmatpush1.bf16.msra.mxu0 %v9273_v62  ;;  %2991 = vmatpush1.bf16.msra.mxu1 %v9275_v63  ;;  %v506_v62 = vld [vmem:[#allocation8 + $0xa78] sm:$0xff]  ;;  %v9337_v63 = vcombine.low %v493_v50, %v497_v51  ;;  %v3107_v51 = vld [vmem:[#allocation10] sm:$0xff] }
 0x1e7   :  { %2863 = vmatprep.subr.bf16.mxu0 %v9282_v0  ;;  %2992 = vmatprep.subr.bf16.mxu1 %v9284_v1  ;;  %v9339_v0 = vcombine.low %v494_v52, %v498_v53  ;;  %v9346_v1 = vcombine.high %v501_v59, %v505_v60  ;;  %v9348_v2 = vcombine.high %v502_v61, %v506_v62  ;;  %v3111_v52 = vld [vmem:[#allocation10 + $0x20] sm:$0xff]  ;;  %v3108_v53 = vld [vmem:[#allocation10 + $0x8] sm:$0xff] }
 0x1e8   :  { %2893 = vmatprep.mubr.bf16.mxu0 %v10883_v37  ;;  %3022 = vmatprep.mubr.bf16.mxu1 %v10883_v37  ;;  %v9308_v37 = vcombine.high %v462_v25, %v466_v18  ;;  %v529_v25 = vld [vmem:[#allocation8 + $0xb30] sm:$0xff]  ;;  %v526_v18 = vld [vmem:[#allocation8 + $0xb18] sm:$0xff] }
 0x1ea   :  { %2864 = vmatpush1.bf16.msra.mxu0 %v9281_v6  ;;  %2993 = vmatpush1.bf16.msra.mxu1 %v9283_v7  ;;  %v514_v6 = vld [vmem:[#allocation8 + $0xab8] sm:$0xff]  ;;  %v9345_v7 = vcombine.low %v501_v59, %v505_v60  ;;  %v3115_v60 = vld [vmem:[#allocation10 + $0x40] sm:$0xff] }
 0x1eb   :  { %2865 = vmatprep.subr.bf16.mxu0 %v9290_v8  ;;  %2994 = vmatprep.subr.bf16.mxu1 %v9292_v15  ;;  %v9347_v8 = vcombine.low %v502_v61, %v506_v62  ;;  %v9354_v15 = vcombine.high %v509_v3, %v513_v4  ;;  %v9356_v58 = vcombine.high %v510_v5, %v514_v6  ;;  %v3119_v61 = vld [vmem:[#allocation10 + $0x60] sm:$0xff]  ;;  %v3116_v62 = vld [vmem:[#allocation10 + $0x48] sm:$0xff] }
 0x1ee   :  { %2866 = vmatpush1.bf16.msra.mxu0 %v9289_v12  ;;  %2995 = vmatpush1.bf16.msra.mxu1 %v9291_v27  ;;  %v522_v12 = vld [vmem:[#allocation8 + $0xaf8] sm:$0xff]  ;;  %v9353_v27 = vcombine.low %v509_v3, %v513_v4  ;;  %v9414_v4 = vcombine.high %v3115_v60, %v3119_v61 }
 0x1ef   :  { %2867 = vmatprep.subr.bf16.mxu0 %v9298_v13  ;;  %2996 = vmatprep.subr.bf16.mxu1 %v9300_v14  ;;  %v9355_v13 = vcombine.low %v510_v5, %v514_v6  ;;  %v9362_v14 = vcombine.high %v517_v9, %v521_v10  ;;  %v9364_v16 = vcombine.high %v518_v11, %v522_v12  ;;  %v3123_v6 = vld [vmem:[#allocation10 + $0x80] sm:$0xff] }
 0x1f2   :  { %2868 = vmatpush1.bf16.msra.mxu0 %v9297_v19  ;;  %2997 = vmatpush1.bf16.msra.mxu1 %v9299_v20  ;;  %v530_v19 = vld [vmem:[#allocation8 + $0xb38] sm:$0xff]  ;;  %v9361_v20 = vcombine.low %v517_v9, %v521_v10  ;;  %v9413_v9 = vcombine.low %v3115_v60, %v3119_v61  ;;  %v3167_v60 = vld [vmem:[#allocation10 + $0x1e0] sm:$0xff] }
 0x1f3   :  { %2869 = vmatprep.subr.bf16.mxu0 %v9306_v21  ;;  %2998 = vmatprep.subr.bf16.mxu1 %v9308_v37  ;;  %v9363_v21 = vcombine.low %v518_v11, %v522_v12  ;;  %v9370_v37 = vcombine.high %v525_v17, %v529_v25  ;;  %v9372_v22 = vcombine.high %v526_v18, %v530_v19 }
 0x1f6   :  { %2870 = vmatpush1.bf16.msra.mxu0 %v9305_v28  ;;  %2999 = vmatpush1.bf16.msra.mxu1 %v9307_v29  ;;  %v538_v28 = vld [vmem:[#allocation8 + $0xb78] sm:$0xff]  ;;  %v9369_v29 = vcombine.low %v525_v17, %v529_v25  ;;  %v557_v17 = vlaneseq }
 0x1f7   :  { %2871 = vmatprep.subr.bf16.mxu0 %v9314_v30  ;;  %3000 = vmatprep.subr.bf16.mxu1 %v9316_v31  ;;  %v9371_v30 = vcombine.low %v526_v18, %v530_v19  ;;  %v9378_v31 = vcombine.high %v533_v23, %v537_v24  ;;  %v9380_v32 = vcombine.high %v534_v26, %v538_v28 }
 0x1fa   :  { %2872 = vmatpush1.bf16.msra.mxu0 %v9313_v36  ;;  %3001 = vmatpush1.bf16.msra.mxu1 %v9315_v38  ;;  %v546_v36 = vld [vmem:[#allocation8 + $0xbb8] sm:$0xff]  ;;  %v9377_v38 = vcombine.low %v533_v23, %v537_v24  ;;  %v10909_v23 = vshrl.u32 %v557_v17, 7  ;;  %v3171_v17 = vld [vmem:[#allocation10 + $0x200] sm:$0xff] }
 0x1fb   :  { %2873 = vmatprep.subr.bf16.mxu0 %v9322_v39  ;;  %3002 = vmatprep.subr.bf16.mxu1 %v9324_v40  ;;  %v9379_v39 = vcombine.low %v534_v26, %v538_v28  ;;  %v9386_v40 = vcombine.high %v541_v33, %v545_v34  ;;  %v9388_v41 = vcombine.high %v542_v35, %v546_v36 }
 0x1fe   :  { %2874 = vmatpush1.bf16.msra.mxu0 %v9321_v46  ;;  %3003 = vmatpush1.bf16.msra.mxu1 %v9323_v47  ;;  %v554_v46 = vld [vmem:[#allocation8 + $0xbf8] sm:$0xff]  ;;  %v9385_v47 = vcombine.low %v541_v33, %v545_v34  ;;  %v3148_v33 = vld [vmem:[#allocation10 + $0x148] sm:$0xff] }
 0x1ff   :  { %2875 = vmatprep.subr.bf16.mxu0 %v9330_v48  ;;  %3004 = vmatprep.subr.bf16.mxu1 %v9332_v49  ;;  %v9387_v48 = vcombine.low %v542_v35, %v546_v36  ;;  %v9394_v49 = vcombine.high %v549_v43, %v553_v44  ;;  %v9396_v50 = vcombine.high %v550_v45, %v554_v46  ;;  %v3152_v34 = vld [vmem:[#allocation10 + $0x168] sm:$0xff]  ;;  %v555_v36 = vld [vmem:[#allocation13] sm:$0xff] }
 0x202   :  { %2876 = vmatpush1.bf16.msra.mxu0 %v9329_v54  ;;  %3005 = vmatpush1.bf16.msra.mxu1 %v9331_v55  ;;  %v3112_v54 = vld [vmem:[#allocation10 + $0x28] sm:$0xff]  ;;  %v9393_v55 = vcombine.low %v549_v43, %v553_v44  ;;  %v9448_v44 = vcombine.high %v3148_v33, %v3152_v34 }
 0x203   :  { %2877 = vmatprep.subr.bf16.mxu0 %v9338_v56  ;;  %3006 = vmatprep.subr.bf16.mxu1 %v9340_v57  ;;  %v9395_v56 = vcombine.low %v550_v45, %v554_v46  ;;  %v9406_v57 = vcombine.high %v3107_v51, %v3111_v52  ;;  %v9408_v59 = vcombine.high %v3108_v53, %v3112_v54  ;;  %v3155_v45 = vld [vmem:[#allocation10 + $0x180] sm:$0xff] }
 0x204   :  { %v9407_v3 = vcombine.low %v3108_v53, %v3112_v54  ;;  %v3159_v46 = vld [vmem:[#allocation10 + $0x1a0] sm:$0xff]  ;;  %v9447_v54 = vcombine.low %v3148_v33, %v3152_v34  ;;  %v3184_v33 = vld [vmem:[#allocation10 + $0x268] sm:$0xff] }
 0x206   :  { %2878 = vmatpush1.bf16.msra.mxu0 %v9337_v63  ;;  %3007 = vmatpush1.bf16.msra.mxu1 %v9339_v0  ;;  %v3120_v63 = vld [vmem:[#allocation10 + $0x68] sm:$0xff] }
 0x207   :  { %2879 = vmatprep.subr.bf16.mxu0 %v9346_v1  ;;  %3008 = vmatprep.subr.bf16.mxu1 %v9348_v2  ;;  %v3090_v0 = vld [vmem:[#allocation5 + $0x8] sm:$0xff]  ;;  %v3096_v1 = vld [vmem:[#allocation5 + $0x38] sm:$0xff]  ;;  %v9405_v2 = vcombine.low %v3107_v51, %v3111_v52  ;;  %v9416_v5 = vcombine.high %v3116_v62, %v3120_v63  ;;  %v9415_v10 = vcombine.low %v3116_v62, %v3120_v63 }
 0x20a   :  { %2880 = vmatpush1.bf16.msra.mxu0 %v9345_v7  ;;  %3009 = vmatpush1.bf16.msra.mxu1 %v9347_v8  ;;  %v3127_v7 = vld [vmem:[#allocation10 + $0xa0] sm:$0xff]  ;;  %v10903_v8 = vpack.c.bf16 %v3096_v1, %v3090_v0  ;;  %v3164_v0 = vld [vmem:[#allocation10 + $0x1c8] sm:$0xff] }
 0x20b   :  { %2881 = vmatprep.subr.bf16.mxu0 %v9354_v15  ;;  %3010 = vmatprep.subr.bf16.mxu1 %v9356_v58  ;;  %v3124_v15 = vld [vmem:[#allocation10 + $0x88] sm:$0xff]  ;;  %v9422_v11 = vcombine.high %v3123_v6, %v3127_v7  ;;  %v9421_v25 = vcombine.low %v3123_v6, %v3127_v7  ;;  %v9453_v6 = vcombine.low %v3155_v45, %v3159_v46 }
 0x20c   :  { %v3128_v58 = vld [vmem:[#allocation10 + $0xa8] sm:$0xff] }
 0x20d   :  { %v9424_v12 = vcombine.high %v3124_v15, %v3128_v58  ;;  %v3168_v1 = vld [vmem:[#allocation10 + $0x1e8] sm:$0xff] }
 0x20e   :  { %2882 = vmatpush1.bf16.msra.mxu0 %v9353_v27  ;;  %3011 = vmatpush1.bf16.msra.mxu1 %v9355_v13  ;;  %v3131_v27 = vld [vmem:[#allocation10 + $0xc0] sm:$0xff] }
 0x20f   :  { %2883 = vmatprep.subr.bf16.mxu0 %v9362_v14  ;;  %3012 = vmatprep.subr.bf16.mxu1 %v9364_v16  ;;  %v3135_v13 = vld [vmem:[#allocation10 + $0xe0] sm:$0xff]  ;;  %v3132_v14 = vld [vmem:[#allocation10 + $0xc8] sm:$0xff] }
 0x210   :  { %v3136_v16 = vld [vmem:[#allocation10 + $0xe8] sm:$0xff]  ;;  %v9430_v18 = vcombine.high %v3131_v27, %v3135_v13  ;;  %v9429_v24 = vcombine.low %v3131_v27, %v3135_v13 }
 0x211   :  { %v9432_v19 = vcombine.high %v3132_v14, %v3136_v16  ;;  %v9431_v26 = vcombine.low %v3132_v14, %v3136_v16  ;;  %v9464_v16 = vcombine.high %v3164_v0, %v3168_v1 }
 0x212   :  { %2884 = vmatpush1.bf16.msra.mxu0 %v9361_v20  ;;  %3013 = vmatpush1.bf16.msra.mxu1 %v9363_v21  ;;  %v3139_v20 = vld [vmem:[#allocation10 + $0x100] sm:$0xff] }
 0x213   :  { %2885 = vmatprep.subr.bf16.mxu0 %v9370_v37  ;;  %3014 = vmatprep.subr.bf16.mxu1 %v9372_v22  ;;  %v3143_v21 = vld [vmem:[#allocation10 + $0x120] sm:$0xff]  ;;  %v3140_v37 = vld [vmem:[#allocation10 + $0x108] sm:$0xff] }
 0x214   :  { %v3144_v22 = vld [vmem:[#allocation10 + $0x128] sm:$0xff]  ;;  %v9438_v28 = vcombine.high %v3139_v20, %v3143_v21  ;;  %v9437_v35 = vcombine.low %v3139_v20, %v3143_v21 }
 0x215   :  { %v3176_v20 = vld [vmem:[#allocation10 + $0x228] sm:$0xff] }
 0x216   :  { %2886 = vmatpush1.bf16.msra.mxu0 %v9369_v29  ;;  %3015 = vmatpush1.bf16.msra.mxu1 %v9371_v30  ;;  %v9440_v29 = vcombine.high %v3140_v37, %v3144_v22  ;;  %v3147_v30 = vld [vmem:[#allocation10 + $0x140] sm:$0xff] }
 0x217   :  { %2887 = vmatprep.subr.bf16.mxu0 %v9378_v31  ;;  %3016 = vmatprep.subr.bf16.mxu1 %v9380_v32  ;;  %v3151_v31 = vld [vmem:[#allocation10 + $0x160] sm:$0xff]  ;;  %v10912_v32 = vsub.s32 0, %v10909_v23 }
 0x218   :  { %v9446_v43 = vcombine.high %v3147_v30, %v3151_v31  ;;  %v9445_v52 = vcombine.low %v3147_v30, %v3151_v31  ;;  %v3183_v30 = vld [vmem:[#allocation10 + $0x260] sm:$0xff]  ;;  %v3180_v31 = vld [vmem:[#allocation10 + $0x248] sm:$0xff] }
 0x21a   :  { %2888 = vmatpush1.bf16.msra.mxu0 %v9377_v38  ;;  %3017 = vmatpush1.bf16.msra.mxu1 %v9379_v39  ;;  %v10915_v38 = vsub.s32 2, %v10909_v23  ;;  %v10918_v39 = vsub.s32 1, %v10909_v23 }
 0x21b   :  { %2889 = vmatprep.subr.bf16.mxu0 %v9386_v40  ;;  %3018 = vmatprep.subr.bf16.mxu1 %v9388_v41  ;;  %v9439_v40 = vcombine.low %v3140_v37, %v3144_v22  ;;  %v10921_v41 = vsub.s32 3, %v10909_v23 }
 0x21c   :  { %v564_v51 = vrot.slane %v555_v36, %v10918_v39 }
 0x21d   :  { %v572_v53 = vrot.slane %v555_v36, %v10921_v41 }
 0x21e   :  { %2890 = vmatpush1.bf16.msra.mxu0 %v9385_v47  ;;  %3019 = vmatpush1.bf16.msra.mxu1 %v9387_v48  ;;  %v560_v47 = vrot.slane %v555_v36, %v10912_v32  ;;  %v3156_v48 = vld [vmem:[#allocation10 + $0x188] sm:$0xff] }
 0x21f   :  { %2891 = vmatprep.subr.bf16.mxu0 %v9394_v49  ;;  %3020 = vmatprep.subr.bf16.mxu1 %v9396_v50  ;;  %v3160_v49 = vld [vmem:[#allocation10 + $0x1a8] sm:$0xff]  ;;  %v568_v50 = vrot.slane %v555_v36, %v10915_v38 }
 0x220   :  { %v9455_v7 = vcombine.low %v3156_v48, %v3160_v49 }
 0x222   :  { %2892 = vmatpush1.bf16.msra.mxu0 %v9393_v55  ;;  %3021 = vmatpush1.bf16.msra.mxu1 %v9395_v56  ;;  %v9454_v55 = vcombine.high %v3155_v45, %v3159_v46  ;;  %v3188_v45 = vld [vmem:[#allocation10 + $0x288] sm:$0xff] }
 0x223   :  { %5453 = vmatprep.subr.bf16.mxu0 %v9406_v57  ;;  %5582 = vmatprep.subr.bf16.mxu1 %v9408_v59  ;;  %v9456_v57 = vcombine.high %v3156_v48, %v3160_v49  ;;  %v3163_v59 = vld [vmem:[#allocation10 + $0x1c0] sm:$0xff]  ;;  %v3192_v46 = vld [vmem:[#allocation10 + $0x2a8] sm:$0xff]  ;;  %v9479_v48 = vcombine.low %v3180_v31, %v3184_v33 }
 0x224   :  { %v9461_v37 = vcombine.low %v3163_v59, %v3167_v60 }
 0x225   :  { %2894 = vmatmul.mubr.bf16.vlgmr.msra.gmra.mrb[4].mxu0 %v10889_v42  ;;  %3023 = vmatmul.mubr.bf16.vlgmr.msra.gmra.mrb[4].mxu1 %v10889_v42  ;;  %v9423_v42 = vcombine.low %v3124_v15, %v3128_v58 }
 0x226   :  { %5454 = vmatpush1.bf16.msra.mxu0 %v9405_v2  ;;  %5583 = vmatpush1.bf16.msra.mxu1 %v9407_v3 }
 0x227   :  { %5455 = vmatprep.subr.bf16.mxu0 %v9414_v4  ;;  %5584 = vmatprep.subr.bf16.mxu1 %v9416_v5 }
 0x228   :  { %5485 = vmatprep.mubr.bf16.mxu0 %v10903_v8  ;;  %5614 = vmatprep.mubr.bf16.mxu1 %v10903_v8 }
 0x22a   :  { %5456 = vmatpush1.bf16.msra.mxu0 %v9413_v9  ;;  %5585 = vmatpush1.bf16.msra.mxu1 %v9415_v10 }
 0x22b   :  { %5457 = vmatprep.subr.bf16.mxu0 %v9422_v11  ;;  %5586 = vmatprep.subr.bf16.mxu1 %v9424_v12  ;;  %v9462_v11 = vcombine.high %v3163_v59, %v3167_v60  ;;  %v3203_v60 = vld [vmem:[#allocation10 + $0x300] sm:$0xff] }
 0x22e   :  { %5458 = vmatpush1.bf16.msra.mxu0 %v9421_v25  ;;  %5587 = vmatpush1.bf16.msra.mxu1 %v9423_v42  ;;  %v3175_v25 = vld [vmem:[#allocation10 + $0x220] sm:$0xff] }
 0x22f   :  { %5459 = vmatprep.subr.bf16.mxu0 %v9430_v18  ;;  %5588 = vmatprep.subr.bf16.mxu1 %v9432_v19  ;;  %v3172_v19 = vld [vmem:[#allocation10 + $0x208] sm:$0xff]  ;;  %v9469_v34 = vcombine.low %v3171_v17, %v3175_v25 }
 0x232   :  { %5460 = vmatpush1.bf16.msra.mxu0 %v9429_v24  ;;  %5589 = vmatpush1.bf16.msra.mxu1 %v9431_v26  ;;  %v9463_v24 = vcombine.low %v3164_v0, %v3168_v1  ;;  %v9470_v26 = vcombine.high %v3171_v17, %v3175_v25 }
 0x233   :  { %5461 = vmatprep.subr.bf16.mxu0 %v9438_v28  ;;  %5590 = vmatprep.subr.bf16.mxu1 %v9440_v29  ;;  %v9472_v28 = vcombine.high %v3172_v19, %v3176_v20  ;;  %v3179_v29 = vld [vmem:[#allocation10 + $0x240] sm:$0xff] }
 0x234   :  { %v9478_v36 = vcombine.high %v3179_v29, %v3183_v30 }
 0x236   :  { %5462 = vmatpush1.bf16.msra.mxu0 %v9437_v35  ;;  %5591 = vmatpush1.bf16.msra.mxu1 %v9439_v40  ;;  %v9471_v35 = vcombine.low %v3172_v19, %v3176_v20  ;;  %v9480_v40 = vcombine.high %v3180_v31, %v3184_v33  ;;  %v3228_v19 = vld [vmem:[#allocation10 + $0x3c8] sm:$0xff]  ;;  %v3089_v33 = vld [vmem:[#allocation5] sm:$0xff] }
 0x237   :  { %5463 = vmatprep.subr.bf16.mxu0 %v9446_v43  ;;  %5592 = vmatprep.subr.bf16.mxu1 %v9448_v44  ;;  %v3187_v43 = vld [vmem:[#allocation10 + $0x280] sm:$0xff]  ;;  %v3232_v20 = vld [vmem:[#allocation10 + $0x3e8] sm:$0xff] }
 0x238   :  { %v2637_v56 = vpop.f32.mrb[0].mxu0  ;;  %v2766_v62 = vpop.f32.mrb[0].mxu1  ;;  %v3191_v44 = vld [vmem:[#allocation10 + $0x2a0] sm:$0xff] }
 0x239   :  { %v10213_v61 = vadd.f32 %v2637_v56, %v560_v47  ;;  %v2639_v63 = vpop.f32.mrb[1].mxu0  ;;  %v10217_v2 = vadd.f32 %v2766_v62, %v568_v50  ;;  %v2768_v4 = vpop.f32.mrb[1].mxu1  ;;  %v9486_v49 = vcombine.high %v3187_v43, %v3191_v44  ;;  %v9487_v56 = vcombine.low %v3188_v45, %v3192_v46  ;;  %v3204_v62 = vld [vmem:[#allocation10 + $0x308] sm:$0xff] }
 0x23a   :  { %v10214_v3 = vadd.f32 %v2639_v63, %v564_v51  ;;  %v2641_v5 = vpop.f32.mrb[2].mxu0  ;;  %5464 = vmatpush1.bf16.msra.mxu0 %v9445_v52  ;;  %v10218_v15 = vadd.f32 %v2768_v4, %v572_v53  ;;  %v2770_v9 = vpop.f32.mrb[2].mxu1  ;;  %5593 = vmatpush1.bf16.msra.mxu1 %v9447_v54  ;;  %v3199_v52 = vld [vmem:[#allocation10 + $0x2e0] sm:$0xff]  ;;  %v3200_v54 = vld [vmem:[#allocation10 + $0x2e8] sm:$0xff] }
 0x23b   :  { %v10215_v58 = vadd.f32 %v2641_v5, %v560_v47  ;;  %v2643_v10 = vpop.f32.mrb[3].mxu0  ;;  %5465 = vmatprep.subr.bf16.mxu0 %v9454_v55  ;;  %v10219_v27 = vadd.f32 %v2770_v9, %v568_v50  ;;  %v2772_v14 = vpop.f32.mrb[3].mxu1  ;;  %5594 = vmatprep.subr.bf16.mxu1 %v9456_v57  ;;  %v9477_v47 = vcombine.low %v3179_v29, %v3183_v30  ;;  %v3208_v63 = vld [vmem:[#allocation10 + $0x328] sm:$0xff]  ;;  %v3211_v4 = vld [vmem:[#allocation10 + $0x340] sm:$0xff] }
 0x23c   :  { %v10189_v12 = vpack.c.bf16 %v10214_v3, %v10213_v61  ;;  %v10216_v13 = vadd.f32 %v2643_v10, %v564_v51  ;;  %v10190_v42 = vpack.c.bf16 %v10218_v15, %v10217_v2  ;;  %v10220_v18 = vadd.f32 %v2772_v14, %v572_v53  ;;  %v3195_v51 = vld [vmem:[#allocation10 + $0x2c0] sm:$0xff]  ;;  %v3196_v53 = vld [vmem:[#allocation10 + $0x2c8] sm:$0xff] }
 0x23d   :  { %v9488_v50 = vcombine.high %v3188_v45, %v3192_v46  ;;  %v9485_v55 = vcombine.low %v3187_v43, %v3191_v44  ;;  %v9494_v57 = vcombine.high %v3195_v51, %v3199_v52  ;;  %v9496_v59 = vcombine.high %v3196_v53, %v3200_v54  ;;  %v3207_v61 = vld [vmem:[#allocation10 + $0x320] sm:$0xff]  ;;  %v3236_v29 = vld [vmem:[#allocation10 + $0x408] sm:$0xff] }
 0x23e   :  { %3081 = vst [vmem:[#allocation17] sm:$0xff] %v10189_v12  ;;  %v10193_v21 = vpack.c.bf16 %v10216_v13, %v10215_v58  ;;  %5466 = vmatpush1.bf16.msra.mxu0 %v9453_v6  ;;  %3082 = vst [vmem:[#allocation17 + $0x8] sm:$0xff] %v10190_v42  ;;  %v10194_v22 = vpack.c.bf16 %v10220_v18, %v10219_v27  ;;  %5595 = vmatpush1.bf16.msra.mxu1 %v9455_v7  ;;  %v3215_v5 = vld [vmem:[#allocation10 + $0x360] sm:$0xff]  ;;  %v3212_v6 = vld [vmem:[#allocation10 + $0x348] sm:$0xff] }
 0x23f   :  { %5467 = vmatprep.subr.bf16.mxu0 %v9462_v11  ;;  %5596 = vmatprep.subr.bf16.mxu1 %v9464_v16  ;;  %v9493_v0 = vcombine.low %v3195_v51, %v3199_v52  ;;  %v9495_v1 = vcombine.low %v3196_v53, %v3200_v54  ;;  %v9502_v2 = vcombine.high %v3203_v60, %v3207_v61  ;;  %v3216_v7 = vld [vmem:[#allocation10 + $0x368] sm:$0xff]  ;;  %v3219_v11 = vld [vmem:[#allocation10 + $0x380] sm:$0xff] }
 0x240   :  { %3085 = vst [vmem:[#allocation17 + $0x20] sm:$0xff] %v10193_v21  ;;  %3086 = vst [vmem:[#allocation17 + $0x28] sm:$0xff] %v10194_v22  ;;  %v9504_v3 = vcombine.high %v3204_v62, %v3208_v63  ;;  %v9501_v15 = vcombine.low %v3203_v60, %v3207_v61  ;;  %v9503_v58 = vcombine.low %v3204_v62, %v3208_v63  ;;  %v3223_v12 = vld [vmem:[#allocation10 + $0x3a0] sm:$0xff]  ;;  %v3220_v27 = vld [vmem:[#allocation10 + $0x388] sm:$0xff] }
 0x241   :  { %v9510_v9 = vcombine.high %v3211_v4, %v3215_v5  ;;  %v9512_v10 = vcombine.high %v3212_v6, %v3216_v7  ;;  %v3224_v13 = vld [vmem:[#allocation10 + $0x3a8] sm:$0xff]  ;;  %v9509_v14 = vcombine.low %v3211_v4, %v3215_v5  ;;  %v9511_v16 = vcombine.low %v3212_v6, %v3216_v7  ;;  %v3227_v42 = vld [vmem:[#allocation10 + $0x3c0] sm:$0xff] }
 0x242   :  { %5468 = vmatpush1.bf16.msra.mxu0 %v9461_v37  ;;  %5597 = vmatpush1.bf16.msra.mxu1 %v9463_v24  ;;  %v9518_v17 = vcombine.high %v3219_v11, %v3223_v12  ;;  %v9520_v25 = vcombine.high %v3220_v27, %v3224_v13  ;;  %v3231_v18 = vld [vmem:[#allocation10 + $0x3e0] sm:$0xff]  ;;  %v9517_v21 = vcombine.low %v3219_v11, %v3223_v12  ;;  %v3240_v30 = vld [vmem:[#allocation10 + $0x428] sm:$0xff] }
 0x243   :  { %5469 = vmatprep.subr.bf16.mxu0 %v9470_v26  ;;  %5598 = vmatprep.subr.bf16.mxu1 %v9472_v28  ;;  %v9519_v37 = vcombine.low %v3220_v27, %v3224_v13  ;;  %v9526_v22 = vcombine.high %v3227_v42, %v3231_v18  ;;  %v9528_v24 = vcombine.high %v3228_v19, %v3232_v20  ;;  %v3235_v26 = vld [vmem:[#allocation10 + $0x400] sm:$0xff]  ;;  %v3244_v45 = vld [vmem:[#allocation10 + $0x448] sm:$0xff] }
 0x244   :  { %v3239_v28 = vld [vmem:[#allocation10 + $0x420] sm:$0xff]  ;;  %v9525_v31 = vcombine.low %v3227_v42, %v3231_v18  ;;  %v9535_v51 = vcombine.low %v3236_v29, %v3240_v30 }
 0x245   :  { %v3243_v43 = vld [vmem:[#allocation10 + $0x440] sm:$0xff] }
 0x246   :  { %5470 = vmatpush1.bf16.msra.mxu0 %v9469_v34  ;;  %5599 = vmatpush1.bf16.msra.mxu1 %v9471_v35  ;;  %v3095_v34 = vld [vmem:[#allocation5 + $0x30] sm:$0xff]  ;;  %v9527_v35 = vcombine.low %v3228_v19, %v3232_v20  ;;  %v3247_v44 = vld [vmem:[#allocation10 + $0x460] sm:$0xff] }
 0x247   :  { %5471 = vmatprep.subr.bf16.mxu0 %v9478_v36  ;;  %5600 = vmatprep.subr.bf16.mxu1 %v9480_v40  ;;  %v9534_v36 = vcombine.high %v3235_v26, %v3239_v28  ;;  %v9536_v40 = vcombine.high %v3236_v29, %v3240_v30  ;;  %v10927_v46 = vpack.c.bf16 %v3095_v34, %v3089_v33  ;;  %v3251_v54 = vld [vmem:[#allocation10 + $0x480] sm:$0xff]  ;;  %v3292_v34 = vld [vmem:[#allocation10 + $0x5c8] sm:$0xff] }
 0x248   :  { %v9542_v52 = vcombine.high %v3243_v43, %v3247_v44  ;;  %v9541_v60 = vcombine.low %v3243_v43, %v3247_v44  ;;  %v3295_v33 = vld [vmem:[#allocation10 + $0x5e0] sm:$0xff] }
 0x24a   :  { %5472 = vmatpush1.bf16.msra.mxu0 %v9477_v47  ;;  %5601 = vmatpush1.bf16.msra.mxu1 %v9479_v48  ;;  %v3248_v47 = vld [vmem:[#allocation10 + $0x468] sm:$0xff]  ;;  %v3092_v48 = vld [vmem:[#allocation5 + $0x18] sm:$0xff] }
 0x24b   :  { %5473 = vmatprep.subr.bf16.mxu0 %v9486_v49  ;;  %5602 = vmatprep.subr.bf16.mxu1 %v9488_v50  ;;  %v3098_v49 = vld [vmem:[#allocation5 + $0x48] sm:$0xff]  ;;  %v9533_v50 = vcombine.low %v3235_v26, %v3239_v28  ;;  %v9544_v53 = vcombine.high %v3244_v45, %v3248_v47  ;;  %v9543_v61 = vcombine.low %v3244_v45, %v3248_v47  ;;  %v3299_v45 = vld [vmem:[#allocation10 + $0x600] sm:$0xff] }
 0x24c   :  { %v3303_v47 = vld [vmem:[#allocation10 + $0x620] sm:$0xff] }
 0x24e   :  { %5474 = vmatpush1.bf16.msra.mxu0 %v9485_v55  ;;  %5603 = vmatpush1.bf16.msra.mxu1 %v9487_v56  ;;  %v3255_v55 = vld [vmem:[#allocation10 + $0x4a0] sm:$0xff]  ;;  %v10929_v56 = vpack.c.bf16 %v3098_v49, %v3092_v48  ;;  %v3300_v48 = vld [vmem:[#allocation10 + $0x608] sm:$0xff] }
 0x24f   :  { %5475 = vmatprep.subr.bf16.mxu0 %v9494_v57  ;;  %5604 = vmatprep.subr.bf16.mxu1 %v9496_v59  ;;  %v3252_v57 = vld [vmem:[#allocation10 + $0x488] sm:$0xff]  ;;  %v9550_v62 = vcombine.high %v3251_v54, %v3255_v55  ;;  %v9549_v4 = vcombine.low %v3251_v54, %v3255_v55  ;;  %v3307_v54 = vld [vmem:[#allocation10 + $0x640] sm:$0xff] }
 0x250   :  { %v3256_v59 = vld [vmem:[#allocation10 + $0x4a8] sm:$0xff]  ;;  %v3311_v55 = vld [vmem:[#allocation10 + $0x660] sm:$0xff] }
 0x251   :  { %v9552_v63 = vcombine.high %v3252_v57, %v3256_v59  ;;  %v9551_v5 = vcombine.low %v3252_v57, %v3256_v59  ;;  %v3304_v49 = vld [vmem:[#allocation10 + $0x628] sm:$0xff] }
 0x252   :  { %5476 = vmatpush1.bf16.msra.mxu0 %v9493_v0  ;;  %5605 = vmatpush1.bf16.msra.mxu1 %v9495_v1  ;;  %v3259_v0 = vld [vmem:[#allocation10 + $0x4c0] sm:$0xff]  ;;  %v3308_v57 = vld [vmem:[#allocation10 + $0x648] sm:$0xff] }
 0x253   :  { %5477 = vmatprep.subr.bf16.mxu0 %v9502_v2  ;;  %5606 = vmatprep.subr.bf16.mxu1 %v9504_v3  ;;  %v3263_v1 = vld [vmem:[#allocation10 + $0x4e0] sm:$0xff]  ;;  %v3260_v2 = vld [vmem:[#allocation10 + $0x4c8] sm:$0xff] }
 0x254   :  { %v3264_v3 = vld [vmem:[#allocation10 + $0x4e8] sm:$0xff]  ;;  %v9558_v6 = vcombine.high %v3259_v0, %v3263_v1  ;;  %v9557_v11 = vcombine.low %v3259_v0, %v3263_v1  ;;  %v3315_v0 = vld [vmem:[#allocation10 + $0x680] sm:$0xff] }
 0x255   :  { %v9560_v7 = vcombine.high %v3260_v2, %v3264_v3  ;;  %v9559_v12 = vcombine.low %v3260_v2, %v3264_v3  ;;  %v3312_v59 = vld [vmem:[#allocation10 + $0x668] sm:$0xff]  ;;  %v3319_v1 = vld [vmem:[#allocation10 + $0x6a0] sm:$0xff] }
 0x256   :  { %5478 = vmatpush1.bf16.msra.mxu0 %v9501_v15  ;;  %5607 = vmatpush1.bf16.msra.mxu1 %v9503_v58  ;;  %v3267_v15 = vld [vmem:[#allocation10 + $0x500] sm:$0xff]  ;;  %v3316_v2 = vld [vmem:[#allocation10 + $0x688] sm:$0xff] }
 0x257   :  { %5479 = vmatprep.subr.bf16.mxu0 %v9510_v9  ;;  %5608 = vmatprep.subr.bf16.mxu1 %v9512_v10  ;;  %v3271_v58 = vld [vmem:[#allocation10 + $0x520] sm:$0xff]  ;;  %v3268_v9 = vld [vmem:[#allocation10 + $0x508] sm:$0xff] }
 0x258   :  { %v3272_v10 = vld [vmem:[#allocation10 + $0x528] sm:$0xff]  ;;  %v9566_v27 = vcombine.high %v3267_v15, %v3271_v58  ;;  %v9565_v42 = vcombine.low %v3267_v15, %v3271_v58  ;;  %v3323_v15 = vld [vmem:[#allocation10 + $0x6c0] sm:$0xff] }
 0x259   :  { %v9568_v13 = vcombine.high %v3268_v9, %v3272_v10  ;;  %v9567_v18 = vcombine.low %v3268_v9, %v3272_v10  ;;  %v3320_v3 = vld [vmem:[#allocation10 + $0x6a8] sm:$0xff]  ;;  %v3327_v58 = vld [vmem:[#allocation10 + $0x6e0] sm:$0xff] }
 0x25a   :  { %5480 = vmatpush1.bf16.msra.mxu0 %v9509_v14  ;;  %5609 = vmatpush1.bf16.msra.mxu1 %v9511_v16  ;;  %v3275_v14 = vld [vmem:[#allocation10 + $0x540] sm:$0xff]  ;;  %v3324_v9 = vld [vmem:[#allocation10 + $0x6c8] sm:$0xff] }
 0x25b   :  { %5481 = vmatprep.subr.bf16.mxu0 %v9518_v17  ;;  %5610 = vmatprep.subr.bf16.mxu1 %v9520_v25  ;;  %v3279_v16 = vld [vmem:[#allocation10 + $0x560] sm:$0xff]  ;;  %v3276_v17 = vld [vmem:[#allocation10 + $0x548] sm:$0xff] }
 0x25c   :  { %v3280_v25 = vld [vmem:[#allocation10 + $0x568] sm:$0xff]  ;;  %v9574_v19 = vcombine.high %v3275_v14, %v3279_v16  ;;  %v9573_v26 = vcombine.low %v3275_v14, %v3279_v16  ;;  %v3331_v14 = vld [vmem:[#allocation10 + $0x700] sm:$0xff] }
 0x25d   :  { %v9576_v20 = vcombine.high %v3276_v17, %v3280_v25  ;;  %v9575_v28 = vcombine.low %v3276_v17, %v3280_v25  ;;  %v3328_v10 = vld [vmem:[#allocation10 + $0x6e8] sm:$0xff]  ;;  %v3335_v16 = vld [vmem:[#allocation10 + $0x720] sm:$0xff] }
 0x25e   :  { %5482 = vmatpush1.bf16.msra.mxu0 %v9517_v21  ;;  %5611 = vmatpush1.bf16.msra.mxu1 %v9519_v37  ;;  %v3283_v21 = vld [vmem:[#allocation10 + $0x580] sm:$0xff]  ;;  %v3332_v17 = vld [vmem:[#allocation10 + $0x708] sm:$0xff] }
 0x25f   :  { %5483 = vmatprep.subr.bf16.mxu0 %v9526_v22  ;;  %5612 = vmatprep.subr.bf16.mxu1 %v9528_v24  ;;  %v3287_v37 = vld [vmem:[#allocation10 + $0x5a0] sm:$0xff]  ;;  %v3284_v22 = vld [vmem:[#allocation10 + $0x588] sm:$0xff] }
 0x260   :  { %v3288_v24 = vld [vmem:[#allocation10 + $0x5a8] sm:$0xff]  ;;  %v9582_v29 = vcombine.high %v3283_v21, %v3287_v37 }
 0x261   :  { %v9584_v30 = vcombine.high %v3284_v22, %v3288_v24  ;;  %v3336_v25 = vld [vmem:[#allocation10 + $0x728] sm:$0xff] }
 0x262   :  { %5484 = vmatpush1.bf16.msra.mxu0 %v9525_v31  ;;  %5613 = vmatpush1.bf16.msra.mxu1 %v9527_v35  ;;  %v3291_v31 = vld [vmem:[#allocation10 + $0x5c0] sm:$0xff]  ;;  %v3296_v35 = vld [vmem:[#allocation10 + $0x5e8] sm:$0xff] }
 0x263   :  { %5496 = vmatprep.subr.bf16.mxu0 %v9534_v36  ;;  %5625 = vmatprep.subr.bf16.mxu1 %v9536_v40  ;;  %v9581_v36 = vcombine.low %v3283_v21, %v3287_v37  ;;  %v9583_v40 = vcombine.low %v3284_v22, %v3288_v24  ;;  %v9590_v43 = vcombine.high %v3291_v31, %v3295_v33  ;;  %v3339_v21 = vld [vmem:[#allocation10 + $0x740] sm:$0xff]  ;;  %v3340_v22 = vld [vmem:[#allocation10 + $0x748] sm:$0xff] }
 0x264   :  { %v9592_v44 = vcombine.high %v3292_v34, %v3296_v35  ;;  %v3343_v37 = vld [vmem:[#allocation10 + $0x760] sm:$0xff]  ;;  %v3344_v24 = vld [vmem:[#allocation10 + $0x768] sm:$0xff] }
 0x265   :  { %5486 = vmatmul.mubr.bf16.vlgmr.msra.gmra.mrb[8].mxu0 %v10927_v46  ;;  %5615 = vmatmul.mubr.bf16.vlgmr.msra.gmra.mrb[8].mxu1 %v10927_v46 }
 0x266   :  { %5497 = vmatpush1.bf16.msra.mxu0 %v9533_v50  ;;  %5626 = vmatpush1.bf16.msra.mxu1 %v9535_v51  ;;  %v9589_v50 = vcombine.low %v3291_v31, %v3295_v33  ;;  %v9591_v51 = vcombine.low %v3292_v34, %v3296_v35  ;;  %v3347_v31 = vld [vmem:[#allocation10 + $0x780] sm:$0xff]  ;;  %v3348_v34 = vld [vmem:[#allocation10 + $0x788] sm:$0xff] }
 0x267   :  { %5498 = vmatprep.subr.bf16.mxu0 %v9542_v52  ;;  %5627 = vmatprep.subr.bf16.mxu1 %v9544_v53  ;;  %v9598_v52 = vcombine.high %v3299_v45, %v3303_v47  ;;  %v9600_v53 = vcombine.high %v3300_v48, %v3304_v49  ;;  %v3351_v33 = vld [vmem:[#allocation10 + $0x7a0] sm:$0xff]  ;;  %v3352_v35 = vld [vmem:[#allocation10 + $0x7a8] sm:$0xff] }
 0x268   :  { %5528 = vmatprep.mubr.bf16.mxu0 %v10929_v56  ;;  %5657 = vmatprep.mubr.bf16.mxu1 %v10929_v56 }
 0x26a   :  { %5499 = vmatpush1.bf16.msra.mxu0 %v9541_v60  ;;  %5628 = vmatpush1.bf16.msra.mxu1 %v9543_v61  ;;  %v9597_v60 = vcombine.low %v3299_v45, %v3303_v47  ;;  %v9599_v61 = vcombine.low %v3300_v48, %v3304_v49  ;;  %v3355_v45 = vld [vmem:[#allocation10 + $0x7c0] sm:$0xff]  ;;  %v3356_v48 = vld [vmem:[#allocation10 + $0x7c8] sm:$0xff] }
 0x26b   :  { %5500 = vmatprep.subr.bf16.mxu0 %v9550_v62  ;;  %5629 = vmatprep.subr.bf16.mxu1 %v9552_v63  ;;  %v9606_v62 = vcombine.high %v3307_v54, %v3311_v55  ;;  %v9608_v63 = vcombine.high %v3308_v57, %v3312_v59  ;;  %v3359_v47 = vld [vmem:[#allocation10 + $0x7e0] sm:$0xff]  ;;  %v3360_v49 = vld [vmem:[#allocation10 + $0x7e8] sm:$0xff] }
 0x26e   :  { %5501 = vmatpush1.bf16.msra.mxu0 %v9549_v4  ;;  %5630 = vmatpush1.bf16.msra.mxu1 %v9551_v5  ;;  %v9605_v4 = vcombine.low %v3307_v54, %v3311_v55  ;;  %v9607_v5 = vcombine.low %v3308_v57, %v3312_v59  ;;  %v3363_v54 = vld [vmem:[#allocation10 + $0x800] sm:$0xff]  ;;  %v3364_v57 = vld [vmem:[#allocation10 + $0x808] sm:$0xff] }
 0x26f   :  { %5502 = vmatprep.subr.bf16.mxu0 %v9558_v6  ;;  %5631 = vmatprep.subr.bf16.mxu1 %v9560_v7  ;;  %v9614_v6 = vcombine.high %v3315_v0, %v3319_v1  ;;  %v9616_v7 = vcombine.high %v3316_v2, %v3320_v3  ;;  %v3367_v55 = vld [vmem:[#allocation10 + $0x820] sm:$0xff]  ;;  %v3368_v59 = vld [vmem:[#allocation10 + $0x828] sm:$0xff] }
 0x272   :  { %5503 = vmatpush1.bf16.msra.mxu0 %v9557_v11  ;;  %5632 = vmatpush1.bf16.msra.mxu1 %v9559_v12  ;;  %v9613_v11 = vcombine.low %v3315_v0, %v3319_v1  ;;  %v9615_v12 = vcombine.low %v3316_v2, %v3320_v3  ;;  %v9662_v0 = vcombine.high %v3363_v54, %v3367_v55  ;;  %v3371_v2 = vld [vmem:[#allocation10 + $0x840] sm:$0xff] }
 0x273   :  { %5504 = vmatprep.subr.bf16.mxu0 %v9566_v27  ;;  %5633 = vmatprep.subr.bf16.mxu1 %v9568_v13  ;;  %v9622_v27 = vcombine.high %v3323_v15, %v3327_v58  ;;  %v9624_v13 = vcombine.high %v3324_v9, %v3328_v10  ;;  %v9664_v1 = vcombine.high %v3364_v57, %v3368_v59  ;;  %v3375_v3 = vld [vmem:[#allocation10 + $0x860] sm:$0xff] }
 0x276   :  { %5505 = vmatpush1.bf16.msra.mxu0 %v9565_v42  ;;  %5634 = vmatpush1.bf16.msra.mxu1 %v9567_v18  ;;  %v9621_v42 = vcombine.low %v3323_v15, %v3327_v58  ;;  %v9623_v18 = vcombine.low %v3324_v9, %v3328_v10  ;;  %v3100_v15 = vld [vmem:[#allocation5 + $0x58] sm:$0xff]  ;;  %v9661_v58 = vcombine.low %v3363_v54, %v3367_v55  ;;  %v3412_v54 = vld [vmem:[#allocation10 + $0x988] sm:$0xff] }
 0x277   :  { %5506 = vmatprep.subr.bf16.mxu0 %v9574_v19  ;;  %5635 = vmatprep.subr.bf16.mxu1 %v9576_v20  ;;  %v9630_v19 = vcombine.high %v3331_v14, %v3335_v16  ;;  %v9632_v20 = vcombine.high %v3332_v17, %v3336_v25  ;;  %v9663_v9 = vcombine.low %v3364_v57, %v3368_v59  ;;  %v3416_v55 = vld [vmem:[#allocation10 + $0x9a8] sm:$0xff] }
 0x278   :  { %v9670_v10 = vcombine.high %v3371_v2, %v3375_v3 }
 0x27a   :  { %5507 = vmatpush1.bf16.msra.mxu0 %v9573_v26  ;;  %5636 = vmatpush1.bf16.msra.mxu1 %v9575_v28  ;;  %v9629_v26 = vcombine.low %v3331_v14, %v3335_v16  ;;  %v9631_v28 = vcombine.low %v3332_v17, %v3336_v25  ;;  %v3380_v14 = vld [vmem:[#allocation10 + $0x888] sm:$0xff]  ;;  %v9669_v17 = vcombine.low %v3371_v2, %v3375_v3 }
 0x27b   :  { %5508 = vmatprep.subr.bf16.mxu0 %v9582_v29  ;;  %5637 = vmatprep.subr.bf16.mxu1 %v9584_v30  ;;  %v9638_v29 = vcombine.high %v3339_v21, %v3343_v37  ;;  %v9640_v30 = vcombine.high %v3340_v22, %v3344_v24  ;;  %v3384_v16 = vld [vmem:[#allocation10 + $0x8a8] sm:$0xff]  ;;  %v9711_v3 = vcombine.low %v3412_v54, %v3416_v55 }
 0x27e   :  { %5509 = vmatpush1.bf16.msra.mxu0 %v9581_v36  ;;  %5638 = vmatpush1.bf16.msra.mxu1 %v9583_v40  ;;  %v9637_v36 = vcombine.low %v3339_v21, %v3343_v37  ;;  %v9639_v40 = vcombine.low %v3340_v22, %v3344_v24  ;;  %v3388_v21 = vld [vmem:[#allocation10 + $0x8c8] sm:$0xff]  ;;  %v9679_v24 = vcombine.low %v3380_v14, %v3384_v16 }
 0x27f   :  { %5510 = vmatprep.subr.bf16.mxu0 %v9590_v43  ;;  %5639 = vmatprep.subr.bf16.mxu1 %v9592_v44  ;;  %v9646_v43 = vcombine.high %v3347_v31, %v3351_v33  ;;  %v9648_v44 = vcombine.high %v3348_v34, %v3352_v35  ;;  %v3392_v37 = vld [vmem:[#allocation10 + $0x8e8] sm:$0xff] }
 0x282   :  { %5511 = vmatpush1.bf16.msra.mxu0 %v9589_v50  ;;  %5640 = vmatpush1.bf16.msra.mxu1 %v9591_v51  ;;  %v9645_v50 = vcombine.low %v3347_v31, %v3351_v33  ;;  %v9647_v51 = vcombine.low %v3348_v34, %v3352_v35  ;;  %v3396_v31 = vld [vmem:[#allocation10 + $0x908] sm:$0xff]  ;;  %v9687_v35 = vcombine.low %v3388_v21, %v3392_v37 }
 0x283   :  { %5512 = vmatprep.subr.bf16.mxu0 %v9598_v52  ;;  %5641 = vmatprep.subr.bf16.mxu1 %v9600_v53  ;;  %v9654_v52 = vcombine.high %v3355_v45, %v3359_v47  ;;  %v9656_v53 = vcombine.high %v3356_v48, %v3360_v49  ;;  %v3400_v33 = vld [vmem:[#allocation10 + $0x928] sm:$0xff] }
 0x286   :  { %5513 = vmatpush1.bf16.msra.mxu0 %v9597_v60  ;;  %5642 = vmatpush1.bf16.msra.mxu1 %v9599_v61  ;;  %v9653_v60 = vcombine.low %v3355_v45, %v3359_v47  ;;  %v3091_v61 = vld [vmem:[#allocation5 + $0x10] sm:$0xff]  ;;  %v3404_v45 = vld [vmem:[#allocation10 + $0x948] sm:$0xff] }
 0x287   :  { %5514 = vmatprep.subr.bf16.mxu0 %v9606_v62  ;;  %5643 = vmatprep.subr.bf16.mxu1 %v9608_v63  ;;  %v3097_v62 = vld [vmem:[#allocation5 + $0x40] sm:$0xff]  ;;  %v9655_v63 = vcombine.low %v3356_v48, %v3360_v49  ;;  %v3408_v47 = vld [vmem:[#allocation10 + $0x968] sm:$0xff]  ;;  %v9695_v49 = vcombine.low %v3396_v31, %v3400_v33 }
 0x288   :  { %v9703_v59 = vcombine.low %v3404_v45, %v3408_v47 }
 0x28a   :  { %5515 = vmatpush1.bf16.msra.mxu0 %v9605_v4  ;;  %5644 = vmatpush1.bf16.msra.mxu1 %v9607_v5  ;;  %v3372_v4 = vld [vmem:[#allocation10 + $0x848] sm:$0xff]  ;;  %v10935_v5 = vpack.c.bf16 %v3097_v62, %v3091_v61  ;;  %v9712_v61 = vcombine.high %v3412_v54, %v3416_v55  ;;  %v3419_v62 = vld [vmem:[#allocation10 + $0x9c0] sm:$0xff] }
 0x28b   :  { %5516 = vmatprep.subr.bf16.mxu0 %v9614_v6  ;;  %5645 = vmatprep.subr.bf16.mxu1 %v9616_v7  ;;  %v3376_v6 = vld [vmem:[#allocation10 + $0x868] sm:$0xff]  ;;  %v3467_v54 = vld [vmem:[#allocation10 + $0xb40] sm:$0xff] }
 0x28c   :  { %v3094_v7 = vld [vmem:[#allocation5 + $0x28] sm:$0xff]  ;;  %v9671_v25 = vcombine.low %v3372_v4, %v3376_v6  ;;  %v3471_v55 = vld [vmem:[#allocation10 + $0xb60] sm:$0xff] }
 0x28e   :  { %5517 = vmatpush1.bf16.msra.mxu0 %v9613_v11  ;;  %5646 = vmatpush1.bf16.msra.mxu1 %v9615_v12  ;;  %v9672_v11 = vcombine.high %v3372_v4, %v3376_v6  ;;  %v3379_v12 = vld [vmem:[#allocation10 + $0x880] sm:$0xff] }
 0x28f   :  { %5518 = vmatprep.subr.bf16.mxu0 %v9622_v27  ;;  %5647 = vmatprep.subr.bf16.mxu1 %v9624_v13  ;;  %v3383_v27 = vld [vmem:[#allocation10 + $0x8a0] sm:$0xff]  ;;  %v10937_v13 = vpack.c.bf16 %v3100_v15, %v3094_v7 }
 0x290   :  { %v9677_v22 = vcombine.low %v3379_v12, %v3383_v27  ;;  %v3427_v7 = vld [vmem:[#allocation10 + $0xa00] sm:$0xff] }
 0x291   :  { %v3431_v15 = vld [vmem:[#allocation10 + $0xa20] sm:$0xff] }
 0x292   :  { %5519 = vmatpush1.bf16.msra.mxu0 %v9621_v42  ;;  %5648 = vmatpush1.bf16.msra.mxu1 %v9623_v18  ;;  %v9678_v42 = vcombine.high %v3379_v12, %v3383_v27  ;;  %v9680_v18 = vcombine.high %v3380_v14, %v3384_v16  ;;  %v9726_v12 = vcombine.high %v3427_v7, %v3431_v15  ;;  %v3435_v14 = vld [vmem:[#allocation10 + $0xa40] sm:$0xff] }
 0x293   :  { %5520 = vmatprep.subr.bf16.mxu0 %v9630_v19  ;;  %5649 = vmatprep.subr.bf16.mxu1 %v9632_v20  ;;  %v3387_v19 = vld [vmem:[#allocation10 + $0x8c0] sm:$0xff] }
 0x294   :  { %v3391_v20 = vld [vmem:[#allocation10 + $0x8e0] sm:$0xff] }
 0x295   :  { %v9685_v34 = vcombine.low %v3387_v19, %v3391_v20  ;;  %v3439_v16 = vld [vmem:[#allocation10 + $0xa60] sm:$0xff] }
 0x296   :  { %5521 = vmatpush1.bf16.msra.mxu0 %v9629_v26  ;;  %5650 = vmatpush1.bf16.msra.mxu1 %v9631_v28  ;;  %v9686_v26 = vcombine.high %v3387_v19, %v3391_v20  ;;  %v9688_v28 = vcombine.high %v3388_v21, %v3392_v37  ;;  %v9734_v19 = vcombine.high %v3435_v14, %v3439_v16  ;;  %v3443_v21 = vld [vmem:[#allocation10 + $0xa80] sm:$0xff] }
 0x297   :  { %5522 = vmatprep.subr.bf16.mxu0 %v9638_v29  ;;  %5651 = vmatprep.subr.bf16.mxu1 %v9640_v30  ;;  %v3395_v29 = vld [vmem:[#allocation10 + $0x900] sm:$0xff] }
 0x298   :  { %v3399_v30 = vld [vmem:[#allocation10 + $0x920] sm:$0xff] }
 0x299   :  { %v9693_v48 = vcombine.low %v3395_v29, %v3399_v30  ;;  %v3447_v37 = vld [vmem:[#allocation10 + $0xaa0] sm:$0xff] }
 0x29a   :  { %5523 = vmatpush1.bf16.msra.mxu0 %v9637_v36  ;;  %5652 = vmatpush1.bf16.msra.mxu1 %v9639_v40  ;;  %v9694_v36 = vcombine.high %v3395_v29, %v3399_v30  ;;  %v9696_v40 = vcombine.high %v3396_v31, %v3400_v33  ;;  %v9742_v29 = vcombine.high %v3443_v21, %v3447_v37  ;;  %v3451_v31 = vld [vmem:[#allocation10 + $0xac0] sm:$0xff] }
 0x29b   :  { %5524 = vmatprep.subr.bf16.mxu0 %v9646_v43  ;;  %5653 = vmatprep.subr.bf16.mxu1 %v9648_v44  ;;  %v3403_v43 = vld [vmem:[#allocation10 + $0x940] sm:$0xff] }
 0x29c   :  { %v3407_v44 = vld [vmem:[#allocation10 + $0x960] sm:$0xff] }
 0x29d   :  { %v9701_v57 = vcombine.low %v3403_v43, %v3407_v44  ;;  %v3455_v33 = vld [vmem:[#allocation10 + $0xae0] sm:$0xff] }
 0x29e   :  { %5525 = vmatpush1.bf16.msra.mxu0 %v9645_v50  ;;  %5654 = vmatpush1.bf16.msra.mxu1 %v9647_v51  ;;  %v9702_v50 = vcombine.high %v3403_v43, %v3407_v44  ;;  %v9704_v51 = vcombine.high %v3404_v45, %v3408_v47  ;;  %v9750_v43 = vcombine.high %v3451_v31, %v3455_v33  ;;  %v3459_v45 = vld [vmem:[#allocation10 + $0xb00] sm:$0xff] }
 0x29f   :  { %5526 = vmatprep.subr.bf16.mxu0 %v9654_v52  ;;  %5655 = vmatprep.subr.bf16.mxu1 %v9656_v53  ;;  %v3411_v52 = vld [vmem:[#allocation10 + $0x980] sm:$0xff] }
 0x2a0   :  { %v3415_v53 = vld [vmem:[#allocation10 + $0x9a0] sm:$0xff] }
 0x2a1   :  { %v9709_v2 = vcombine.low %v3411_v52, %v3415_v53  ;;  %v3463_v47 = vld [vmem:[#allocation10 + $0xb20] sm:$0xff] }
 0x2a2   :  { %5527 = vmatpush1.bf16.msra.mxu0 %v9653_v60  ;;  %5656 = vmatpush1.bf16.msra.mxu1 %v9655_v63  ;;  %v9710_v60 = vcombine.high %v3411_v52, %v3415_v53  ;;  %v3423_v63 = vld [vmem:[#allocation10 + $0x9e0] sm:$0xff]  ;;  %v9758_v52 = vcombine.high %v3459_v45, %v3463_v47 }
 0x2a3   :  { %5539 = vmatprep.subr.bf16.mxu0 %v9662_v0  ;;  %5668 = vmatprep.subr.bf16.mxu1 %v9664_v1  ;;  %v3420_v0 = vld [vmem:[#allocation10 + $0x9c8] sm:$0xff]  ;;  %v9718_v4 = vcombine.high %v3419_v62, %v3423_v63 }
 0x2a4   :  { %v3424_v1 = vld [vmem:[#allocation10 + $0x9e8] sm:$0xff] }
 0x2a5   :  { %5529 = vmatmul.mubr.bf16.vlgmr.msra.gmra.mrb[8].mxu0 %v10935_v5  ;;  %5658 = vmatmul.mubr.bf16.vlgmr.msra.gmra.mrb[8].mxu1 %v10935_v5  ;;  %v9720_v6 = vcombine.high %v3420_v0, %v3424_v1 }
 0x2a6   :  { %5540 = vmatpush1.bf16.msra.mxu0 %v9661_v58  ;;  %5669 = vmatpush1.bf16.msra.mxu1 %v9663_v9  ;;  %v3428_v58 = vld [vmem:[#allocation10 + $0xa08] sm:$0xff] }
 0x2a7   :  { %5541 = vmatprep.subr.bf16.mxu0 %v9670_v10  ;;  %5670 = vmatprep.subr.bf16.mxu1 %v9672_v11  ;;  %v3432_v9 = vld [vmem:[#allocation10 + $0xa28] sm:$0xff]  ;;  %v9717_v10 = vcombine.low %v3419_v62, %v3423_v63  ;;  %v9719_v11 = vcombine.low %v3420_v0, %v3424_v1  ;;  %v9766_v62 = vcombine.high %v3467_v54, %v3471_v55  ;;  %v3475_v0 = vld [vmem:[#allocation10 + $0xb80] sm:$0xff] }
 0x2a8   :  { %5571 = vmatprep.mubr.bf16.mxu0 %v10937_v13  ;;  %5700 = vmatprep.mubr.bf16.mxu1 %v10937_v13  ;;  %v9728_v27 = vcombine.high %v3428_v58, %v3432_v9  ;;  %v3479_v1 = vld [vmem:[#allocation10 + $0xba0] sm:$0xff] }
 0x2aa   :  { %5542 = vmatpush1.bf16.msra.mxu0 %v9669_v17  ;;  %5671 = vmatpush1.bf16.msra.mxu1 %v9671_v25  ;;  %v3436_v17 = vld [vmem:[#allocation10 + $0xa48] sm:$0xff] }
 0x2ab   :  { %5543 = vmatprep.subr.bf16.mxu0 %v9678_v42  ;;  %5672 = vmatprep.subr.bf16.mxu1 %v9680_v18  ;;  %v3440_v25 = vld [vmem:[#allocation10 + $0xa68] sm:$0xff]  ;;  %v9725_v42 = vcombine.low %v3427_v7, %v3431_v15  ;;  %v9727_v18 = vcombine.low %v3428_v58, %v3432_v9  ;;  %v9774_v7 = vcombine.high %v3475_v0, %v3479_v1  ;;  %v3483_v58 = vld [vmem:[#allocation10 + $0xbc0] sm:$0xff] }
 0x2ac   :  { %v9736_v20 = vcombine.high %v3436_v17, %v3440_v25  ;;  %v3487_v9 = vld [vmem:[#allocation10 + $0xbe0] sm:$0xff] }
 0x2ae   :  { %5544 = vmatpush1.bf16.msra.mxu0 %v9677_v22  ;;  %5673 = vmatpush1.bf16.msra.mxu1 %v9679_v24  ;;  %v3444_v22 = vld [vmem:[#allocation10 + $0xa88] sm:$0xff] }
 0x2af   :  { %5545 = vmatprep.subr.bf16.mxu0 %v9686_v26  ;;  %5674 = vmatprep.subr.bf16.mxu1 %v9688_v28  ;;  %v3448_v24 = vld [vmem:[#allocation10 + $0xaa8] sm:$0xff]  ;;  %v9733_v26 = vcombine.low %v3435_v14, %v3439_v16  ;;  %v9735_v28 = vcombine.low %v3436_v17, %v3440_v25  ;;  %v9782_v14 = vcombine.high %v3483_v58, %v3487_v9  ;;  %v3109_v17 = vld [vmem:[#allocation10 + $0x10] sm:$0xff] }
 0x2b0   :  { %v9744_v30 = vcombine.high %v3444_v22, %v3448_v24  ;;  %v3113_v25 = vld [vmem:[#allocation10 + $0x30] sm:$0xff] }
 0x2b2   :  { %5546 = vmatpush1.bf16.msra.mxu0 %v9685_v34  ;;  %5675 = vmatpush1.bf16.msra.mxu1 %v9687_v35  ;;  %v3452_v34 = vld [vmem:[#allocation10 + $0xac8] sm:$0xff] }
 0x2b3   :  { %5547 = vmatprep.subr.bf16.mxu0 %v9694_v36  ;;  %5676 = vmatprep.subr.bf16.mxu1 %v9696_v40  ;;  %v3456_v35 = vld [vmem:[#allocation10 + $0xae8] sm:$0xff]  ;;  %v9741_v36 = vcombine.low %v3443_v21, %v3447_v37  ;;  %v9743_v40 = vcombine.low %v3444_v22, %v3448_v24  ;;  %v3099_v21 = vld [vmem:[#allocation5 + $0x50] sm:$0xff]  ;;  %v9410_v22 = vcombine.high %v3109_v17, %v3113_v25 }
 0x2b4   :  { %v9752_v44 = vcombine.high %v3452_v34, %v3456_v35 }
 0x2b6   :  { %5548 = vmatpush1.bf16.msra.mxu0 %v9693_v48  ;;  %5677 = vmatpush1.bf16.msra.mxu1 %v9695_v49  ;;  %v3460_v48 = vld [vmem:[#allocation10 + $0xb08] sm:$0xff] }
 0x2b7   :  { %5549 = vmatprep.subr.bf16.mxu0 %v9702_v50  ;;  %5678 = vmatprep.subr.bf16.mxu1 %v9704_v51  ;;  %v3464_v49 = vld [vmem:[#allocation10 + $0xb28] sm:$0xff]  ;;  %v9749_v50 = vcombine.low %v3451_v31, %v3455_v33  ;;  %v9751_v51 = vcombine.low %v3452_v34, %v3456_v35  ;;  %v3122_v31 = vld [vmem:[#allocation10 + $0x78] sm:$0xff]  ;;  %v9409_v33 = vcombine.low %v3109_v17, %v3113_v25  ;;  %v3157_v17 = vld [vmem:[#allocation10 + $0x190] sm:$0xff] }
 0x2b8   :  { %v9760_v53 = vcombine.high %v3460_v48, %v3464_v49  ;;  %v3161_v25 = vld [vmem:[#allocation10 + $0x1b0] sm:$0xff] }
 0x2ba   :  { %5550 = vmatpush1.bf16.msra.mxu0 %v9701_v57  ;;  %5679 = vmatpush1.bf16.msra.mxu1 %v9703_v59  ;;  %v3468_v57 = vld [vmem:[#allocation10 + $0xb48] sm:$0xff] }
 0x2bb   :  { %5551 = vmatprep.subr.bf16.mxu0 %v9710_v60  ;;  %5680 = vmatprep.subr.bf16.mxu1 %v9712_v61  ;;  %v3472_v59 = vld [vmem:[#allocation10 + $0xb68] sm:$0xff]  ;;  %v9757_v60 = vcombine.low %v3459_v45, %v3463_v47  ;;  %v9759_v61 = vcombine.low %v3460_v48, %v3464_v49  ;;  %v3130_v45 = vld [vmem:[#allocation10 + $0xb8] sm:$0xff] }
 0x2bc   :  { %v9768_v63 = vcombine.high %v3468_v57, %v3472_v59 }
 0x2be   :  { %5552 = vmatpush1.bf16.msra.mxu0 %v9709_v2  ;;  %5681 = vmatpush1.bf16.msra.mxu1 %v9711_v3  ;;  %v3476_v2 = vld [vmem:[#allocation10 + $0xb88] sm:$0xff] }
 0x2bf   :  { %5553 = vmatprep.subr.bf16.mxu0 %v9718_v4  ;;  %5682 = vmatprep.subr.bf16.mxu1 %v9720_v6  ;;  %v3480_v3 = vld [vmem:[#allocation10 + $0xba8] sm:$0xff]  ;;  %v9765_v4 = vcombine.low %v3467_v54, %v3471_v55  ;;  %v9767_v6 = vcombine.low %v3468_v57, %v3472_v59  ;;  %v3138_v54 = vld [vmem:[#allocation10 + $0xf8] sm:$0xff] }
 0x2c0   :  { %v9776_v15 = vcombine.high %v3476_v2, %v3480_v3 }
 0x2c2   :  { %5554 = vmatpush1.bf16.msra.mxu0 %v9717_v10  ;;  %5683 = vmatpush1.bf16.msra.mxu1 %v9719_v11  ;;  %v3484_v10 = vld [vmem:[#allocation10 + $0xbc8] sm:$0xff] }
 0x2c3   :  { %5555 = vmatprep.subr.bf16.mxu0 %v9726_v12  ;;  %5684 = vmatprep.subr.bf16.mxu1 %v9728_v27  ;;  %v3488_v11 = vld [vmem:[#allocation10 + $0xbe8] sm:$0xff]  ;;  %v9773_v12 = vcombine.low %v3475_v0, %v3479_v1  ;;  %v9775_v27 = vcombine.low %v3476_v2, %v3480_v3  ;;  %v3146_v0 = vld [vmem:[#allocation10 + $0x138] sm:$0xff] }
 0x2c4   :  { %v9784_v16 = vcombine.high %v3484_v10, %v3488_v11  ;;  %v9783_v37 = vcombine.low %v3484_v10, %v3488_v11  ;;  %v10953_v10 = vsub.s32 6, %v10909_v23  ;;  %v10956_v11 = vsub.s32 5, %v10909_v23 }
 0x2c6   :  { %5556 = vmatpush1.bf16.msra.mxu0 %v9725_v42  ;;  %5685 = vmatpush1.bf16.msra.mxu1 %v9727_v18  ;;  %v3110_v42 = vld [vmem:[#allocation10 + $0x18] sm:$0xff] }
 0x2c7   :  { %5557 = vmatprep.subr.bf16.mxu0 %v9734_v19  ;;  %5686 = vmatprep.subr.bf16.mxu1 %v9736_v20  ;;  %v3114_v18 = vld [vmem:[#allocation10 + $0x38] sm:$0xff]  ;;  %v9781_v19 = vcombine.low %v3483_v58, %v3487_v9  ;;  %v3093_v20 = vld [vmem:[#allocation5 + $0x20] sm:$0xff] }
 0x2c8   :  { %v9412_v24 = vcombine.high %v3110_v42, %v3114_v18  ;;  %v9411_v34 = vcombine.low %v3110_v42, %v3114_v18  ;;  %v3154_v58 = vld [vmem:[#allocation10 + $0x178] sm:$0xff]  ;;  %v10373_v42 = vld [vmem:[#allocation13] sm:$0xff] }
 0x2ca   :  { %5558 = vmatpush1.bf16.msra.mxu0 %v9733_v26  ;;  %5687 = vmatpush1.bf16.msra.mxu1 %v9735_v28  ;;  %v3117_v26 = vld [vmem:[#allocation10 + $0x50] sm:$0xff] }
 0x2cb   :  { %5559 = vmatprep.subr.bf16.mxu0 %v9742_v29  ;;  %5688 = vmatprep.subr.bf16.mxu1 %v9744_v30  ;;  %v3121_v28 = vld [vmem:[#allocation10 + $0x70] sm:$0xff]  ;;  %v10943_v29 = vpack.c.bf16 %v3099_v21, %v3093_v20  ;;  %v3118_v30 = vld [vmem:[#allocation10 + $0x58] sm:$0xff]  ;;  %v584_v21 = vrot.slane %v10373_v42, %v10953_v10 }
 0x2cc   :  { %v9418_v35 = vcombine.high %v3117_v26, %v3121_v28  ;;  %v9417_v47 = vcombine.low %v3117_v26, %v3121_v28  ;;  %v9419_v48 = vcombine.low %v3118_v30, %v3122_v31  ;;  %v3162_v20 = vld [vmem:[#allocation10 + $0x1b8] sm:$0xff]  ;;  %v9458_v26 = vcombine.high %v3157_v17, %v3161_v25 }
 0x2ce   :  { %5560 = vmatpush1.bf16.msra.mxu0 %v9741_v36  ;;  %5689 = vmatpush1.bf16.msra.mxu1 %v9743_v40  ;;  %v9420_v36 = vcombine.high %v3118_v30, %v3122_v31  ;;  %v3125_v40 = vld [vmem:[#allocation10 + $0x90] sm:$0xff] }
 0x2cf   :  { %5561 = vmatprep.subr.bf16.mxu0 %v9750_v43  ;;  %5690 = vmatprep.subr.bf16.mxu1 %v9752_v44  ;;  %v3129_v43 = vld [vmem:[#allocation10 + $0xb0] sm:$0xff]  ;;  %v3126_v44 = vld [vmem:[#allocation10 + $0x98] sm:$0xff] }
 0x2d0   :  { %v9426_v49 = vcombine.high %v3125_v40, %v3129_v43  ;;  %v9425_v55 = vcombine.low %v3125_v40, %v3129_v43  ;;  %v9427_v57 = vcombine.low %v3126_v44, %v3130_v45  ;;  %v3165_v31 = vld [vmem:[#allocation10 + $0x1d0] sm:$0xff]  ;;  %v3166_v40 = vld [vmem:[#allocation10 + $0x1d8] sm:$0xff] }
 0x2d1   :  { %v3170_v43 = vld [vmem:[#allocation10 + $0x1f8] sm:$0xff] }
 0x2d2   :  { %5562 = vmatpush1.bf16.msra.mxu0 %v9749_v50  ;;  %5691 = vmatpush1.bf16.msra.mxu1 %v9751_v51  ;;  %v9428_v50 = vcombine.high %v3126_v44, %v3130_v45  ;;  %v3133_v51 = vld [vmem:[#allocation10 + $0xd0] sm:$0xff] }
 0x2d3   :  { %5563 = vmatprep.subr.bf16.mxu0 %v9758_v52  ;;  %5692 = vmatprep.subr.bf16.mxu1 %v9760_v53  ;;  %v3137_v52 = vld [vmem:[#allocation10 + $0xf0] sm:$0xff]  ;;  %v3134_v53 = vld [vmem:[#allocation10 + $0xd8] sm:$0xff] }
 0x2d4   :  { %v9434_v59 = vcombine.high %v3133_v51, %v3137_v52  ;;  %v9433_v1 = vcombine.low %v3133_v51, %v3137_v52  ;;  %v9435_v2 = vcombine.low %v3134_v53, %v3138_v54 }
 0x2d6   :  { %5564 = vmatpush1.bf16.msra.mxu0 %v9757_v60  ;;  %5693 = vmatpush1.bf16.msra.mxu1 %v9759_v61  ;;  %v9436_v60 = vcombine.high %v3134_v53, %v3138_v54  ;;  %v3141_v61 = vld [vmem:[#allocation10 + $0x110] sm:$0xff] }
 0x2d7   :  { %5565 = vmatprep.subr.bf16.mxu0 %v9766_v62  ;;  %5694 = vmatprep.subr.bf16.mxu1 %v9768_v63  ;;  %v3145_v62 = vld [vmem:[#allocation10 + $0x130] sm:$0xff]  ;;  %v3142_v63 = vld [vmem:[#allocation10 + $0x118] sm:$0xff] }
 0x2d8   :  { %v9442_v3 = vcombine.high %v3141_v61, %v3145_v62  ;;  %v9441_v9 = vcombine.low %v3141_v61, %v3145_v62  ;;  %v9468_v62 = vcombine.high %v3166_v40, %v3170_v43 }
 0x2da   :  { %5566 = vmatpush1.bf16.msra.mxu0 %v9765_v4  ;;  %5695 = vmatpush1.bf16.msra.mxu1 %v9767_v6  ;;  %v3149_v4 = vld [vmem:[#allocation10 + $0x150] sm:$0xff] }
 0x2db   :  { %5567 = vmatprep.subr.bf16.mxu0 %v9774_v7  ;;  %5696 = vmatprep.subr.bf16.mxu1 %v9776_v15  ;;  %v3153_v6 = vld [vmem:[#allocation10 + $0x170] sm:$0xff]  ;;  %v10950_v7 = vsub.s32 4, %v10909_v23  ;;  %v3150_v15 = vld [vmem:[#allocation10 + $0x158] sm:$0xff] }
 0x2dd   :  { %v576_v18 = vrot.slane %v10373_v42, %v10950_v7 }
 0x2de   :  { %5568 = vmatpush1.bf16.msra.mxu0 %v9773_v12  ;;  %5697 = vmatpush1.bf16.msra.mxu1 %v9775_v27  ;;  %v9443_v12 = vcombine.low %v3142_v63, %v3146_v0  ;;  %v10959_v27 = vsub.s32 7, %v10909_v23 }
 0x2df   :  { %5569 = vmatprep.subr.bf16.mxu0 %v9782_v14  ;;  %5698 = vmatprep.subr.bf16.mxu1 %v9784_v16  ;;  %v9450_v14 = vcombine.high %v3149_v4, %v3153_v6  ;;  %v9452_v16 = vcombine.high %v3150_v15, %v3154_v58 }
 0x2e0   :  { %v588_v23 = vrot.slane %v10373_v42, %v10959_v27 }
 0x2e2   :  { %5570 = vmatpush1.bf16.msra.mxu0 %v9781_v19  ;;  %5699 = vmatpush1.bf16.msra.mxu1 %v9783_v37  ;;  %v3158_v19 = vld [vmem:[#allocation10 + $0x198] sm:$0xff]  ;;  %v580_v37 = vrot.slane %v10373_v42, %v10956_v11 }
 0x2e3   :  { %5711 = vmatprep.subr.bf16.mxu0 %v9410_v22  ;;  %5840 = vmatprep.subr.bf16.mxu1 %v9412_v24  ;;  %v9449_v22 = vcombine.low %v3149_v4, %v3153_v6  ;;  %v9451_v24 = vcombine.low %v3150_v15, %v3154_v58  ;;  %v9460_v30 = vcombine.high %v3158_v19, %v3162_v20 }
 0x2e4   :  { %v9467_v58 = vcombine.low %v3166_v40, %v3170_v43 }
 0x2e5   :  { %5572 = vmatmul.mubr.bf16.vlgmr.msra.gmra.mrb[8].mxu0 %v10943_v29  ;;  %5701 = vmatmul.mubr.bf16.vlgmr.msra.gmra.mrb[8].mxu1 %v10943_v29 }
 0x2e6   :  { %5712 = vmatpush1.bf16.msra.mxu0 %v9409_v33  ;;  %5841 = vmatpush1.bf16.msra.mxu1 %v9411_v34  ;;  %v3169_v33 = vld [vmem:[#allocation10 + $0x1f0] sm:$0xff] }
 0x2e7   :  { %5713 = vmatprep.subr.bf16.mxu0 %v9418_v35  ;;  %5842 = vmatprep.subr.bf16.mxu1 %v9420_v36  ;;  %v9465_v6 = vcombine.low %v3165_v31, %v3169_v33 }
 0x2e8   :  { %5743 = vmatprep.mubr.bf16.mxu0 %v10903_v8  ;;  %5872 = vmatprep.mubr.bf16.mxu1 %v10903_v8  ;;  %v9444_v8 = vcombine.high %v3142_v63, %v3146_v0  ;;  %v3173_v63 = vld [vmem:[#allocation10 + $0x210] sm:$0xff] }
 0x2e9   :  { %v3177_v0 = vld [vmem:[#allocation10 + $0x230] sm:$0xff] }
 0x2ea   :  { %5714 = vmatpush1.bf16.msra.mxu0 %v9417_v47  ;;  %5843 = vmatpush1.bf16.msra.mxu1 %v9419_v48  ;;  %v9473_v42 = vcombine.low %v3173_v63, %v3177_v0 }
 0x2eb   :  { %5715 = vmatprep.subr.bf16.mxu0 %v9426_v49  ;;  %5844 = vmatprep.subr.bf16.mxu1 %v9428_v50  ;;  %v9457_v49 = vcombine.low %v3157_v17, %v3161_v25  ;;  %v9459_v50 = vcombine.low %v3158_v19, %v3162_v20  ;;  %v3182_v17 = vld [vmem:[#allocation10 + $0x258] sm:$0xff] }
 0x2ec   :  { %v3186_v25 = vld [vmem:[#allocation10 + $0x278] sm:$0xff] }
 0x2ed   :  { %v9484_v20 = vcombine.high %v3182_v17, %v3186_v25 }
 0x2ee   :  { %5716 = vmatpush1.bf16.msra.mxu0 %v9425_v55  ;;  %5845 = vmatpush1.bf16.msra.mxu1 %v9427_v57  ;;  %v9466_v55 = vcombine.high %v3165_v31, %v3169_v33  ;;  %v3197_v31 = vld [vmem:[#allocation10 + $0x2d0] sm:$0xff] }
 0x2ef   :  { %5717 = vmatprep.subr.bf16.mxu0 %v9434_v59  ;;  %5846 = vmatprep.subr.bf16.mxu1 %v9436_v60  ;;  %v3201_v33 = vld [vmem:[#allocation10 + $0x2f0] sm:$0xff] }
 0x2f0   :  { %v9498_v43 = vcombine.high %v3197_v31, %v3201_v33 }
 0x2f2   :  { %5718 = vmatpush1.bf16.msra.mxu0 %v9433_v1  ;;  %5847 = vmatpush1.bf16.msra.mxu1 %v9435_v2 }
 0x2f3   :  { %5719 = vmatprep.subr.bf16.mxu0 %v9442_v3  ;;  %5848 = vmatprep.subr.bf16.mxu1 %v9444_v8  ;;  %v3174_v3 = vld [vmem:[#allocation10 + $0x218] sm:$0xff] }
 0x2f4   :  { %v3178_v8 = vld [vmem:[#allocation10 + $0x238] sm:$0xff] }
 0x2f6   :  { %5720 = vmatpush1.bf16.msra.mxu0 %v9441_v9  ;;  %5849 = vmatpush1.bf16.msra.mxu1 %v9443_v12  ;;  %v9474_v9 = vcombine.high %v3173_v63, %v3177_v0  ;;  %v9476_v12 = vcombine.high %v3174_v3, %v3178_v8  ;;  %v3221_v0 = vld [vmem:[#allocation10 + $0x390] sm:$0xff] }
 0x2f7   :  { %5721 = vmatprep.subr.bf16.mxu0 %v9450_v14  ;;  %5850 = vmatprep.subr.bf16.mxu1 %v9452_v16  ;;  %v3181_v14 = vld [vmem:[#allocation10 + $0x250] sm:$0xff] }
 0x2f8   :  { %v2895_v28 = vpop.f32.mrb[4].mxu0  ;;  %v3024_v35 = vpop.f32.mrb[4].mxu1  ;;  %v3185_v16 = vld [vmem:[#allocation10 + $0x270] sm:$0xff] }
 0x2f9   :  { %v10221_v34 = vadd.f32 %v2895_v28, %v576_v18  ;;  %v2897_v36 = vpop.f32.mrb[5].mxu0  ;;  %v10225_v44 = vadd.f32 %v3024_v35, %v584_v21  ;;  %v3026_v47 = vpop.f32.mrb[5].mxu1  ;;  %v9482_v19 = vcombine.high %v3181_v14, %v3185_v16  ;;  %v3202_v35 = vld [vmem:[#allocation10 + $0x2f8] sm:$0xff] }
 0x2fa   :  { %v10222_v45 = vadd.f32 %v2897_v36, %v580_v37  ;;  %v2899_v48 = vpop.f32.mrb[6].mxu0  ;;  %5722 = vmatpush1.bf16.msra.mxu0 %v9449_v22  ;;  %v10226_v51 = vadd.f32 %v3026_v47, %v588_v23  ;;  %v3028_v53 = vpop.f32.mrb[6].mxu1  ;;  %5851 = vmatpush1.bf16.msra.mxu1 %v9451_v24  ;;  %v3190_v22 = vld [vmem:[#allocation10 + $0x298] sm:$0xff]  ;;  %v9481_v24 = vcombine.low %v3181_v14, %v3185_v16  ;;  %v3209_v47 = vld [vmem:[#allocation10 + $0x330] sm:$0xff] }
 0x2fb   :  { %v10223_v52 = vadd.f32 %v2899_v48, %v576_v18  ;;  %v2901_v54 = vpop.f32.mrb[7].mxu0  ;;  %5723 = vmatprep.subr.bf16.mxu0 %v9458_v26  ;;  %v10227_v59 = vadd.f32 %v3028_v53, %v584_v21  ;;  %v3030_v61 = vpop.f32.mrb[7].mxu1  ;;  %5852 = vmatprep.subr.bf16.mxu1 %v9460_v30  ;;  %v9475_v18 = vcombine.low %v3174_v3, %v3178_v8  ;;  %v3189_v21 = vld [vmem:[#allocation10 + $0x290] sm:$0xff]  ;;  %v3206_v48 = vld [vmem:[#allocation10 + $0x318] sm:$0xff] }
 0x2fc   :  { %v10191_v57 = vpack.c.bf16 %v10222_v45, %v10221_v34  ;;  %v10224_v60 = vadd.f32 %v2901_v54, %v580_v37  ;;  %v10192_v1 = vpack.c.bf16 %v10226_v51, %v10225_v44  ;;  %v10228_v2 = vadd.f32 %v3030_v61, %v588_v23  ;;  %v3193_v37 = vld [vmem:[#allocation10 + $0x2b0] sm:$0xff]  ;;  %v3194_v23 = vld [vmem:[#allocation10 + $0x2b8] sm:$0xff] }
 0x2fd   :  { %v9483_v26 = vcombine.low %v3182_v17, %v3186_v25  ;;  %v9490_v28 = vcombine.high %v3189_v21, %v3193_v37  ;;  %v9492_v30 = vcombine.high %v3190_v22, %v3194_v23  ;;  %v3198_v34 = vld [vmem:[#allocation10 + $0x2d8] sm:$0xff]  ;;  %v9489_v36 = vcombine.low %v3189_v21, %v3193_v37  ;;  %v3205_v45 = vld [vmem:[#allocation10 + $0x310] sm:$0xff] }
 0x2fe   :  { %3083 = vst [vmem:[#allocation17 + $0x10] sm:$0xff] %v10191_v57  ;;  %v10195_v4 = vpack.c.bf16 %v10224_v60, %v10223_v52  ;;  %5724 = vmatpush1.bf16.msra.mxu0 %v9457_v49  ;;  %3084 = vst [vmem:[#allocation17 + $0x18] sm:$0xff] %v10192_v1  ;;  %v10196_v15 = vpack.c.bf16 %v10228_v2, %v10227_v59  ;;  %5853 = vmatpush1.bf16.msra.mxu1 %v9459_v50  ;;  %v3210_v49 = vld [vmem:[#allocation10 + $0x338] sm:$0xff]  ;;  %v3213_v54 = vld [vmem:[#allocation10 + $0x350] sm:$0xff] }
 0x2ff   :  { %5725 = vmatprep.subr.bf16.mxu0 %v9466_v55  ;;  %5854 = vmatprep.subr.bf16.mxu1 %v9468_v62  ;;  %v9491_v40 = vcombine.low %v3190_v22, %v3194_v23  ;;  %v9500_v44 = vcombine.high %v3198_v34, %v3202_v35  ;;  %v9497_v50 = vcombine.low %v3197_v31, %v3201_v33  ;;  %v3217_v55 = vld [vmem:[#allocation10 + $0x370] sm:$0xff]  ;;  %v3214_v57 = vld [vmem:[#allocation10 + $0x358] sm:$0xff] }
 0x300   :  { %3087 = vst [vmem:[#allocation17 + $0x30] sm:$0xff] %v10195_v4  ;;  %3088 = vst [vmem:[#allocation17 + $0x38] sm:$0xff] %v10196_v15  ;;  %v9499_v51 = vcombine.low %v3198_v34, %v3202_v35  ;;  %v9506_v52 = vcombine.high %v3205_v45, %v3209_v47  ;;  %v9508_v53 = vcombine.high %v3206_v48, %v3210_v49  ;;  %v3218_v59 = vld [vmem:[#allocation10 + $0x378] sm:$0xff]  ;;  %v3225_v1 = vld [vmem:[#allocation10 + $0x3b0] sm:$0xff] }
 0x301   :  { %v9505_v60 = vcombine.low %v3205_v45, %v3209_v47  ;;  %v9507_v61 = vcombine.low %v3206_v48, %v3210_v49  ;;  %v9514_v62 = vcombine.high %v3213_v54, %v3217_v55  ;;  %v9516_v63 = vcombine.high %v3214_v57, %v3218_v59  ;;  %v3222_v2 = vld [vmem:[#allocation10 + $0x398] sm:$0xff] }
 0x302   :  { %5726 = vmatpush1.bf16.msra.mxu0 %v9465_v6  ;;  %5855 = vmatpush1.bf16.msra.mxu1 %v9467_v58  ;;  %v3226_v3 = vld [vmem:[#allocation10 + $0x3b8] sm:$0xff]  ;;  %v9513_v8 = vcombine.low %v3213_v54, %v3217_v55  ;;  %v9515_v4 = vcombine.low %v3214_v57, %v3218_v59  ;;  %v9522_v6 = vcombine.high %v3221_v0, %v3225_v1  ;;  %v3229_v58 = vld [vmem:[#allocation10 + $0x3d0] sm:$0xff] }
 0x303   :  { %5727 = vmatprep.subr.bf16.mxu0 %v9474_v9  ;;  %5856 = vmatprep.subr.bf16.mxu1 %v9476_v12  ;;  %v9524_v15 = vcombine.high %v3222_v2, %v3226_v3  ;;  %v3233_v9 = vld [vmem:[#allocation10 + $0x3f0] sm:$0xff]  ;;  %v3230_v12 = vld [vmem:[#allocation10 + $0x3d8] sm:$0xff]  ;;  %v9521_v16 = vcombine.low %v3221_v0, %v3225_v1  ;;  %v9523_v17 = vcombine.low %v3222_v2, %v3226_v3 }
 0x304   :  { %v3234_v14 = vld [vmem:[#allocation10 + $0x3f8] sm:$0xff]  ;;  %v9530_v25 = vcombine.high %v3229_v58, %v3233_v9  ;;  %v9529_v37 = vcombine.low %v3229_v58, %v3233_v9  ;;  %v3277_v3 = vld [vmem:[#allocation10 + $0x550] sm:$0xff] }
 0x305   :  { %v3242_v21 = vld [vmem:[#allocation10 + $0x438] sm:$0xff]  ;;  %v9531_v22 = vcombine.low %v3230_v12, %v3234_v14 }
 0x306   :  { %5728 = vmatpush1.bf16.msra.mxu0 %v9473_v42  ;;  %5857 = vmatpush1.bf16.msra.mxu1 %v9475_v18  ;;  %v9532_v42 = vcombine.high %v3230_v12, %v3234_v14  ;;  %v3237_v18 = vld [vmem:[#allocation10 + $0x410] sm:$0xff]  ;;  %v3250_v31 = vld [vmem:[#allocation10 + $0x478] sm:$0xff] }
 0x307   :  { %5729 = vmatprep.subr.bf16.mxu0 %v9482_v19  ;;  %5858 = vmatprep.subr.bf16.mxu1 %v9484_v20  ;;  %v3241_v19 = vld [vmem:[#allocation10 + $0x430] sm:$0xff]  ;;  %v3238_v20 = vld [vmem:[#allocation10 + $0x418] sm:$0xff] }
 0x308   :  { %v9538_v23 = vcombine.high %v3237_v18, %v3241_v19  ;;  %v9537_v33 = vcombine.low %v3237_v18, %v3241_v19  ;;  %v9539_v34 = vcombine.low %v3238_v20, %v3242_v21  ;;  %v3258_v45 = vld [vmem:[#allocation10 + $0x4b8] sm:$0xff]  ;;  %v3285_v14 = vld [vmem:[#allocation10 + $0x590] sm:$0xff] }
 0x309   :  { %v3266_v54 = vld [vmem:[#allocation10 + $0x4f8] sm:$0xff] }
 0x30a   :  { %5730 = vmatpush1.bf16.msra.mxu0 %v9481_v24  ;;  %5859 = vmatpush1.bf16.msra.mxu1 %v9483_v26  ;;  %v9540_v24 = vcombine.high %v3238_v20, %v3242_v21  ;;  %v3245_v26 = vld [vmem:[#allocation10 + $0x450] sm:$0xff] }
 0x30b   :  { %5731 = vmatprep.subr.bf16.mxu0 %v9490_v28  ;;  %5860 = vmatprep.subr.bf16.mxu1 %v9492_v30  ;;  %v3249_v28 = vld [vmem:[#allocation10 + $0x470] sm:$0xff]  ;;  %v3246_v30 = vld [vmem:[#allocation10 + $0x458] sm:$0xff] }
 0x30c   :  { %v9546_v35 = vcombine.high %v3245_v26, %v3249_v28  ;;  %v9545_v47 = vcombine.low %v3245_v26, %v3249_v28  ;;  %v9547_v48 = vcombine.low %v3246_v30, %v3250_v31  ;;  %v3293_v21 = vld [vmem:[#allocation10 + $0x5d0] sm:$0xff] }
 0x30e   :  { %5732 = vmatpush1.bf16.msra.mxu0 %v9489_v36  ;;  %5861 = vmatpush1.bf16.msra.mxu1 %v9491_v40  ;;  %v9548_v36 = vcombine.high %v3246_v30, %v3250_v31  ;;  %v3253_v40 = vld [vmem:[#allocation10 + $0x490] sm:$0xff] }
 0x30f   :  { %5733 = vmatprep.subr.bf16.mxu0 %v9498_v43  ;;  %5862 = vmatprep.subr.bf16.mxu1 %v9500_v44  ;;  %v3257_v43 = vld [vmem:[#allocation10 + $0x4b0] sm:$0xff]  ;;  %v3254_v44 = vld [vmem:[#allocation10 + $0x498] sm:$0xff] }
 0x310   :  { %v9554_v49 = vcombine.high %v3253_v40, %v3257_v43  ;;  %v9553_v55 = vcombine.low %v3253_v40, %v3257_v43  ;;  %v3301_v31 = vld [vmem:[#allocation10 + $0x610] sm:$0xff] }
 0x312   :  { %5734 = vmatpush1.bf16.msra.mxu0 %v9497_v50  ;;  %5863 = vmatpush1.bf16.msra.mxu1 %v9499_v51  ;;  %v9556_v50 = vcombine.high %v3254_v44, %v3258_v45  ;;  %v3261_v51 = vld [vmem:[#allocation10 + $0x4d0] sm:$0xff] }
 0x313   :  { %5735 = vmatprep.subr.bf16.mxu0 %v9506_v52  ;;  %5864 = vmatprep.subr.bf16.mxu1 %v9508_v53  ;;  %v3265_v52 = vld [vmem:[#allocation10 + $0x4f0] sm:$0xff]  ;;  %v3262_v53 = vld [vmem:[#allocation10 + $0x4d8] sm:$0xff] }
 0x314   :  { %v9562_v57 = vcombine.high %v3261_v51, %v3265_v52  ;;  %v9564_v59 = vcombine.high %v3262_v53, %v3266_v54  ;;  %v9561_v0 = vcombine.low %v3261_v51, %v3265_v52  ;;  %v9563_v1 = vcombine.low %v3262_v53, %v3266_v54  ;;  %v3317_v54 = vld [vmem:[#allocation10 + $0x690] sm:$0xff] }
 0x316   :  { %5736 = vmatpush1.bf16.msra.mxu0 %v9505_v60  ;;  %5865 = vmatpush1.bf16.msra.mxu1 %v9507_v61  ;;  %v3269_v60 = vld [vmem:[#allocation10 + $0x510] sm:$0xff] }
 0x317   :  { %5737 = vmatprep.subr.bf16.mxu0 %v9514_v62  ;;  %5866 = vmatprep.subr.bf16.mxu1 %v9516_v63  ;;  %v3273_v61 = vld [vmem:[#allocation10 + $0x530] sm:$0xff]  ;;  %v3270_v62 = vld [vmem:[#allocation10 + $0x518] sm:$0xff] }
 0x318   :  { %v3274_v63 = vld [vmem:[#allocation10 + $0x538] sm:$0xff]  ;;  %v9570_v2 = vcombine.high %v3269_v60, %v3273_v61 }
 0x319   :  { %v9571_v58 = vcombine.low %v3270_v62, %v3274_v63 }
 0x31a   :  { %5738 = vmatpush1.bf16.msra.mxu0 %v9513_v8  ;;  %5867 = vmatpush1.bf16.msra.mxu1 %v9515_v4  ;;  %v3281_v8 = vld [vmem:[#allocation10 + $0x570] sm:$0xff]  ;;  %v3278_v4 = vld [vmem:[#allocation10 + $0x558] sm:$0xff] }
 0x31b   :  { %5739 = vmatprep.subr.bf16.mxu0 %v9522_v6  ;;  %5868 = vmatprep.subr.bf16.mxu1 %v9524_v15  ;;  %v3282_v6 = vld [vmem:[#allocation10 + $0x578] sm:$0xff]  ;;  %v9569_v15 = vcombine.low %v3269_v60, %v3273_v61  ;;  %v9578_v9 = vcombine.high %v3277_v3, %v3281_v8 }
 0x31c   :  { %v9580_v12 = vcombine.high %v3278_v4, %v3282_v6  ;;  %v9579_v18 = vcombine.low %v3278_v4, %v3282_v6  ;;  %v3333_v6 = vld [vmem:[#allocation10 + $0x710] sm:$0xff] }
 0x31e   :  { %5740 = vmatpush1.bf16.msra.mxu0 %v9521_v16  ;;  %5869 = vmatpush1.bf16.msra.mxu1 %v9523_v17  ;;  %v3289_v16 = vld [vmem:[#allocation10 + $0x5b0] sm:$0xff]  ;;  %v3286_v17 = vld [vmem:[#allocation10 + $0x598] sm:$0xff] }
 0x31f   :  { %5741 = vmatprep.subr.bf16.mxu0 %v9530_v25  ;;  %5870 = vmatprep.subr.bf16.mxu1 %v9532_v42  ;;  %v3290_v25 = vld [vmem:[#allocation10 + $0x5b8] sm:$0xff]  ;;  %v9577_v42 = vcombine.low %v3277_v3, %v3281_v8  ;;  %v9586_v19 = vcombine.high %v3285_v14, %v3289_v16 }
 0x320   :  { %v9588_v20 = vcombine.high %v3286_v17, %v3290_v25  ;;  %v9587_v26 = vcombine.low %v3286_v17, %v3290_v25  ;;  %v3341_v25 = vld [vmem:[#allocation10 + $0x750] sm:$0xff] }
 0x322   :  { %5742 = vmatpush1.bf16.msra.mxu0 %v9529_v37  ;;  %5871 = vmatpush1.bf16.msra.mxu1 %v9531_v22  ;;  %v3297_v37 = vld [vmem:[#allocation10 + $0x5f0] sm:$0xff]  ;;  %v3294_v22 = vld [vmem:[#allocation10 + $0x5d8] sm:$0xff] }
 0x323   :  { %5754 = vmatprep.subr.bf16.mxu0 %v9538_v23  ;;  %5883 = vmatprep.subr.bf16.mxu1 %v9540_v24  ;;  %v3298_v23 = vld [vmem:[#allocation10 + $0x5f8] sm:$0xff]  ;;  %v9585_v24 = vcombine.low %v3285_v14, %v3289_v16  ;;  %v9594_v28 = vcombine.high %v3293_v21, %v3297_v37 }
 0x324   :  { %v9596_v30 = vcombine.high %v3294_v22, %v3298_v23  ;;  %v9595_v40 = vcombine.low %v3294_v22, %v3298_v23  ;;  %v3349_v23 = vld [vmem:[#allocation10 + $0x790] sm:$0xff] }
 0x325   :  { %5744 = vmatmul.mubr.bf16.vlgmr.msra.gmra.mrb[12].mxu0 %v10927_v46  ;;  %5873 = vmatmul.mubr.bf16.vlgmr.msra.gmra.mrb[12].mxu1 %v10927_v46  ;;  %v9555_v46 = vcombine.low %v3254_v44, %v3258_v45  ;;  %v3309_v45 = vld [vmem:[#allocation10 + $0x650] sm:$0xff] }
 0x326   :  { %5755 = vmatpush1.bf16.msra.mxu0 %v9537_v33  ;;  %5884 = vmatpush1.bf16.msra.mxu1 %v9539_v34  ;;  %v3305_v33 = vld [vmem:[#allocation10 + $0x630] sm:$0xff]  ;;  %v3302_v34 = vld [vmem:[#allocation10 + $0x618] sm:$0xff] }
 0x327   :  { %5756 = vmatprep.subr.bf16.mxu0 %v9546_v35  ;;  %5885 = vmatprep.subr.bf16.mxu1 %v9548_v36  ;;  %v3306_v35 = vld [vmem:[#allocation10 + $0x638] sm:$0xff]  ;;  %v9593_v36 = vcombine.low %v3293_v21, %v3297_v37  ;;  %v9602_v43 = vcombine.high %v3301_v31, %v3305_v33 }
 0x328   :  { %5786 = vmatprep.mubr.bf16.mxu0 %v10929_v56  ;;  %5915 = vmatprep.mubr.bf16.mxu1 %v10929_v56  ;;  %v9572_v56 = vcombine.high %v3270_v62, %v3274_v63  ;;  %v9604_v44 = vcombine.high %v3302_v34, %v3306_v35  ;;  %v9603_v51 = vcombine.low %v3302_v34, %v3306_v35  ;;  %v3325_v63 = vld [vmem:[#allocation10 + $0x6d0] sm:$0xff] }
 0x329   :  { %v3357_v35 = vld [vmem:[#allocation10 + $0x7d0] sm:$0xff] }
 0x32a   :  { %5757 = vmatpush1.bf16.msra.mxu0 %v9545_v47  ;;  %5886 = vmatpush1.bf16.msra.mxu1 %v9547_v48  ;;  %v3313_v47 = vld [vmem:[#allocation10 + $0x670] sm:$0xff]  ;;  %v3310_v48 = vld [vmem:[#allocation10 + $0x658] sm:$0xff] }
 0x32b   :  { %5758 = vmatprep.subr.bf16.mxu0 %v9554_v49  ;;  %5887 = vmatprep.subr.bf16.mxu1 %v9556_v50  ;;  %v3314_v49 = vld [vmem:[#allocation10 + $0x678] sm:$0xff]  ;;  %v9601_v50 = vcombine.low %v3301_v31, %v3305_v33  ;;  %v9610_v52 = vcombine.high %v3309_v45, %v3313_v47 }
 0x32c   :  { %v9612_v53 = vcombine.high %v3310_v48, %v3314_v49  ;;  %v9611_v60 = vcombine.low %v3310_v48, %v3314_v49  ;;  %v3365_v49 = vld [vmem:[#allocation10 + $0x810] sm:$0xff] }
 0x32e   :  { %5759 = vmatpush1.bf16.msra.mxu0 %v9553_v55  ;;  %5888 = vmatpush1.bf16.msra.mxu1 %v9555_v46  ;;  %v3321_v55 = vld [vmem:[#allocation10 + $0x6b0] sm:$0xff]  ;;  %v3318_v46 = vld [vmem:[#allocation10 + $0x698] sm:$0xff] }
 0x32f   :  { %5760 = vmatprep.subr.bf16.mxu0 %v9562_v57  ;;  %5889 = vmatprep.subr.bf16.mxu1 %v9564_v59  ;;  %v3322_v57 = vld [vmem:[#allocation10 + $0x6b8] sm:$0xff]  ;;  %v9609_v59 = vcombine.low %v3309_v45, %v3313_v47  ;;  %v9618_v61 = vcombine.high %v3317_v54, %v3321_v55 }
 0x330   :  { %v9620_v62 = vcombine.high %v3318_v46, %v3322_v57  ;;  %v9619_v3 = vcombine.low %v3318_v46, %v3322_v57  ;;  %v3373_v57 = vld [vmem:[#allocation10 + $0x850] sm:$0xff] }
 0x332   :  { %5761 = vmatpush1.bf16.msra.mxu0 %v9561_v0  ;;  %5890 = vmatpush1.bf16.msra.mxu1 %v9563_v1  ;;  %v3329_v0 = vld [vmem:[#allocation10 + $0x6f0] sm:$0xff]  ;;  %v3326_v1 = vld [vmem:[#allocation10 + $0x6d8] sm:$0xff] }
 0x333   :  { %5762 = vmatprep.subr.bf16.mxu0 %v9570_v2  ;;  %5891 = vmatprep.subr.bf16.mxu1 %v9572_v56  ;;  %v3330_v2 = vld [vmem:[#allocation10 + $0x6f8] sm:$0xff]  ;;  %v9617_v56 = vcombine.low %v3317_v54, %v3321_v55  ;;  %v9626_v8 = vcombine.high %v3325_v63, %v3329_v0 }
 0x334   :  { %v9628_v4 = vcombine.high %v3326_v1, %v3330_v2  ;;  %v9627_v14 = vcombine.low %v3326_v1, %v3330_v2  ;;  %v3381_v2 = vld [vmem:[#allocation10 + $0x890] sm:$0xff] }
 0x336   :  { %5763 = vmatpush1.bf16.msra.mxu0 %v9569_v15  ;;  %5892 = vmatpush1.bf16.msra.mxu1 %v9571_v58  ;;  %v3337_v15 = vld [vmem:[#allocation10 + $0x730] sm:$0xff]  ;;  %v3334_v58 = vld [vmem:[#allocation10 + $0x718] sm:$0xff] }
 0x337   :  { %5764 = vmatprep.subr.bf16.mxu0 %v9578_v9  ;;  %5893 = vmatprep.subr.bf16.mxu1 %v9580_v12  ;;  %v3338_v9 = vld [vmem:[#allocation10 + $0x738] sm:$0xff]  ;;  %v9625_v12 = vcombine.low %v3325_v63, %v3329_v0  ;;  %v9634_v16 = vcombine.high %v3333_v6, %v3337_v15 }
 0x338   :  { %v9636_v17 = vcombine.high %v3334_v58, %v3338_v9  ;;  %v9635_v21 = vcombine.low %v3334_v58, %v3338_v9  ;;  %v3389_v9 = vld [vmem:[#allocation10 + $0x8d0] sm:$0xff] }
 0x33a   :  { %5765 = vmatpush1.bf16.msra.mxu0 %v9577_v42  ;;  %5894 = vmatpush1.bf16.msra.mxu1 %v9579_v18  ;;  %v3345_v42 = vld [vmem:[#allocation10 + $0x770] sm:$0xff]  ;;  %v3342_v18 = vld [vmem:[#allocation10 + $0x758] sm:$0xff] }
 0x33b   :  { %5766 = vmatprep.subr.bf16.mxu0 %v9586_v19  ;;  %5895 = vmatprep.subr.bf16.mxu1 %v9588_v20  ;;  %v3346_v19 = vld [vmem:[#allocation10 + $0x778] sm:$0xff]  ;;  %v9633_v20 = vcombine.low %v3333_v6, %v3337_v15  ;;  %v9642_v37 = vcombine.high %v3341_v25, %v3345_v42 }
 0x33c   :  { %v9644_v22 = vcombine.high %v3342_v18, %v3346_v19  ;;  %v9643_v31 = vcombine.low %v3342_v18, %v3346_v19  ;;  %v3397_v18 = vld [vmem:[#allocation10 + $0x910] sm:$0xff] }
 0x33d   :  { %v3401_v19 = vld [vmem:[#allocation10 + $0x930] sm:$0xff] }
 0x33e   :  { %5767 = vmatpush1.bf16.msra.mxu0 %v9585_v24  ;;  %5896 = vmatpush1.bf16.msra.mxu1 %v9587_v26  ;;  %v3353_v24 = vld [vmem:[#allocation10 + $0x7b0] sm:$0xff]  ;;  %v3350_v26 = vld [vmem:[#allocation10 + $0x798] sm:$0xff] }
 0x33f   :  { %5768 = vmatprep.subr.bf16.mxu0 %v9594_v28  ;;  %5897 = vmatprep.subr.bf16.mxu1 %v9596_v30  ;;  %v3354_v28 = vld [vmem:[#allocation10 + $0x7b8] sm:$0xff]  ;;  %v9641_v30 = vcombine.low %v3341_v25, %v3345_v42  ;;  %v9650_v33 = vcombine.high %v3349_v23, %v3353_v24 }
 0x340   :  { %v9652_v34 = vcombine.high %v3350_v26, %v3354_v28  ;;  %v9651_v45 = vcombine.low %v3350_v26, %v3354_v28  ;;  %v3409_v26 = vld [vmem:[#allocation10 + $0x970] sm:$0xff]  ;;  %v3406_v28 = vld [vmem:[#allocation10 + $0x958] sm:$0xff] }
 0x342   :  { %5769 = vmatpush1.bf16.msra.mxu0 %v9593_v36  ;;  %5898 = vmatpush1.bf16.msra.mxu1 %v9595_v40  ;;  %v3361_v36 = vld [vmem:[#allocation10 + $0x7f0] sm:$0xff]  ;;  %v3358_v40 = vld [vmem:[#allocation10 + $0x7d8] sm:$0xff] }
 0x343   :  { %5770 = vmatprep.subr.bf16.mxu0 %v9602_v43  ;;  %5899 = vmatprep.subr.bf16.mxu1 %v9604_v44  ;;  %v3362_v43 = vld [vmem:[#allocation10 + $0x7f8] sm:$0xff]  ;;  %v9649_v44 = vcombine.low %v3349_v23, %v3353_v24  ;;  %v9658_v47 = vcombine.high %v3357_v35, %v3361_v36  ;;  %v9698_v23 = vcombine.high %v3397_v18, %v3401_v19  ;;  %v3405_v24 = vld [vmem:[#allocation10 + $0x950] sm:$0xff] }
 0x344   :  { %v9660_v48 = vcombine.high %v3358_v40, %v3362_v43  ;;  %v9659_v54 = vcombine.low %v3358_v40, %v3362_v43  ;;  %v3417_v40 = vld [vmem:[#allocation10 + $0x9b0] sm:$0xff]  ;;  %v3414_v43 = vld [vmem:[#allocation10 + $0x998] sm:$0xff] }
 0x346   :  { %5771 = vmatpush1.bf16.msra.mxu0 %v9601_v50  ;;  %5900 = vmatpush1.bf16.msra.mxu1 %v9603_v51  ;;  %v3369_v50 = vld [vmem:[#allocation10 + $0x830] sm:$0xff]  ;;  %v3366_v51 = vld [vmem:[#allocation10 + $0x818] sm:$0xff] }
 0x347   :  { %5772 = vmatprep.subr.bf16.mxu0 %v9610_v52  ;;  %5901 = vmatprep.subr.bf16.mxu1 %v9612_v53  ;;  %v3370_v52 = vld [vmem:[#allocation10 + $0x838] sm:$0xff]  ;;  %v9657_v53 = vcombine.low %v3357_v35, %v3361_v36  ;;  %v9666_v55 = vcombine.high %v3365_v49, %v3369_v50  ;;  %v3413_v36 = vld [vmem:[#allocation10 + $0x990] sm:$0xff] }
 0x348   :  { %v9668_v46 = vcombine.high %v3366_v51, %v3370_v52  ;;  %v9667_v63 = vcombine.low %v3366_v51, %v3370_v52  ;;  %v3425_v51 = vld [vmem:[#allocation10 + $0x9f0] sm:$0xff]  ;;  %v3422_v52 = vld [vmem:[#allocation10 + $0x9d8] sm:$0xff] }
 0x34a   :  { %5773 = vmatpush1.bf16.msra.mxu0 %v9609_v59  ;;  %5902 = vmatpush1.bf16.msra.mxu1 %v9611_v60  ;;  %v3377_v59 = vld [vmem:[#allocation10 + $0x870] sm:$0xff]  ;;  %v3374_v60 = vld [vmem:[#allocation10 + $0x858] sm:$0xff] }
 0x34b   :  { %5774 = vmatprep.subr.bf16.mxu0 %v9618_v61  ;;  %5903 = vmatprep.subr.bf16.mxu1 %v9620_v62  ;;  %v3378_v61 = vld [vmem:[#allocation10 + $0x878] sm:$0xff]  ;;  %v9665_v62 = vcombine.low %v3365_v49, %v3369_v50  ;;  %v9674_v0 = vcombine.high %v3373_v57, %v3377_v59  ;;  %v3421_v50 = vld [vmem:[#allocation10 + $0x9d0] sm:$0xff] }
 0x34c   :  { %v9676_v1 = vcombine.high %v3374_v60, %v3378_v61  ;;  %v9675_v6 = vcombine.low %v3374_v60, %v3378_v61  ;;  %v3433_v60 = vld [vmem:[#allocation10 + $0xa30] sm:$0xff]  ;;  %v3430_v61 = vld [vmem:[#allocation10 + $0xa18] sm:$0xff] }
 0x34e   :  { %5775 = vmatpush1.bf16.msra.mxu0 %v9617_v56  ;;  %5904 = vmatpush1.bf16.msra.mxu1 %v9619_v3  ;;  %v3385_v56 = vld [vmem:[#allocation10 + $0x8b0] sm:$0xff]  ;;  %v3382_v3 = vld [vmem:[#allocation10 + $0x898] sm:$0xff] }
 0x34f   :  { %5776 = vmatprep.subr.bf16.mxu0 %v9626_v8  ;;  %5905 = vmatprep.subr.bf16.mxu1 %v9628_v4  ;;  %v3386_v8 = vld [vmem:[#allocation10 + $0x8b8] sm:$0xff]  ;;  %v9673_v4 = vcombine.low %v3373_v57, %v3377_v59  ;;  %v9682_v15 = vcombine.high %v3381_v2, %v3385_v56  ;;  %v3429_v59 = vld [vmem:[#allocation10 + $0xa10] sm:$0xff] }
 0x350   :  { %v9684_v58 = vcombine.high %v3382_v3, %v3386_v8 }
 0x352   :  { %5777 = vmatpush1.bf16.msra.mxu0 %v9625_v12  ;;  %5906 = vmatpush1.bf16.msra.mxu1 %v9627_v14  ;;  %v3393_v12 = vld [vmem:[#allocation10 + $0x8f0] sm:$0xff]  ;;  %v3390_v14 = vld [vmem:[#allocation10 + $0x8d8] sm:$0xff] }
 0x353   :  { %5778 = vmatprep.subr.bf16.mxu0 %v9634_v16  ;;  %5907 = vmatprep.subr.bf16.mxu1 %v9636_v17  ;;  %v3394_v16 = vld [vmem:[#allocation10 + $0x8f8] sm:$0xff]  ;;  %v9681_v17 = vcombine.low %v3381_v2, %v3385_v56  ;;  %v9690_v25 = vcombine.high %v3389_v9, %v3393_v12  ;;  %v3437_v56 = vld [vmem:[#allocation10 + $0xa50] sm:$0xff] }
 0x354   :  { %v9692_v42 = vcombine.high %v3390_v14, %v3394_v16 }
 0x356   :  { %5779 = vmatpush1.bf16.msra.mxu0 %v9633_v20  ;;  %5908 = vmatpush1.bf16.msra.mxu1 %v9635_v21  ;;  %v3398_v20 = vld [vmem:[#allocation10 + $0x918] sm:$0xff] }
 0x357   :  { %5780 = vmatprep.subr.bf16.mxu0 %v9642_v37  ;;  %5909 = vmatprep.subr.bf16.mxu1 %v9644_v22  ;;  %v3402_v21 = vld [vmem:[#allocation10 + $0x938] sm:$0xff]  ;;  %v9689_v37 = vcombine.low %v3389_v9, %v3393_v12  ;;  %v9691_v22 = vcombine.low %v3390_v14, %v3394_v16  ;;  %v3445_v12 = vld [vmem:[#allocation10 + $0xa90] sm:$0xff] }
 0x358   :  { %v3449_v14 = vld [vmem:[#allocation10 + $0xab0] sm:$0xff]  ;;  %v3446_v16 = vld [vmem:[#allocation10 + $0xa98] sm:$0xff] }
 0x35a   :  { %5781 = vmatpush1.bf16.msra.mxu0 %v9641_v30  ;;  %5910 = vmatpush1.bf16.msra.mxu1 %v9643_v31  ;;  %v3410_v30 = vld [vmem:[#allocation10 + $0x978] sm:$0xff]  ;;  %v9697_v31 = vcombine.low %v3397_v18, %v3401_v19  ;;  %v3453_v19 = vld [vmem:[#allocation10 + $0xad0] sm:$0xff] }
 0x35b   :  { %5782 = vmatprep.subr.bf16.mxu0 %v9650_v33  ;;  %5911 = vmatprep.subr.bf16.mxu1 %v9652_v34  ;;  %v9699_v33 = vcombine.low %v3398_v20, %v3402_v21  ;;  %v9706_v34 = vcombine.high %v3405_v24, %v3409_v26  ;;  %v9708_v35 = vcombine.high %v3406_v28, %v3410_v30 }
 0x35e   :  { %5783 = vmatpush1.bf16.msra.mxu0 %v9649_v44  ;;  %5912 = vmatpush1.bf16.msra.mxu1 %v9651_v45  ;;  %v3418_v44 = vld [vmem:[#allocation10 + $0x9b8] sm:$0xff]  ;;  %v9705_v45 = vcombine.low %v3405_v24, %v3409_v26  ;;  %v3461_v26 = vld [vmem:[#allocation10 + $0xb10] sm:$0xff] }
 0x35f   :  { %5784 = vmatprep.subr.bf16.mxu0 %v9658_v47  ;;  %5913 = vmatprep.subr.bf16.mxu1 %v9660_v48  ;;  %v9707_v47 = vcombine.low %v3406_v28, %v3410_v30  ;;  %v9714_v48 = vcombine.high %v3413_v36, %v3417_v40  ;;  %v9716_v49 = vcombine.high %v3414_v43, %v3418_v44  ;;  %v3465_v28 = vld [vmem:[#allocation10 + $0xb30] sm:$0xff]  ;;  %v3462_v30 = vld [vmem:[#allocation10 + $0xb18] sm:$0xff] }
 0x362   :  { %5785 = vmatpush1.bf16.msra.mxu0 %v9657_v53  ;;  %5914 = vmatpush1.bf16.msra.mxu1 %v9659_v54  ;;  %v3426_v53 = vld [vmem:[#allocation10 + $0x9f8] sm:$0xff]  ;;  %v9713_v54 = vcombine.low %v3413_v36, %v3417_v40  ;;  %v3469_v40 = vld [vmem:[#allocation10 + $0xb50] sm:$0xff] }
 0x363   :  { %5797 = vmatprep.subr.bf16.mxu0 %v9666_v55  ;;  %5926 = vmatprep.subr.bf16.mxu1 %v9668_v46  ;;  %v9715_v55 = vcombine.low %v3414_v43, %v3418_v44  ;;  %v9722_v46 = vcombine.high %v3421_v50, %v3425_v51  ;;  %v9724_v57 = vcombine.high %v3422_v52, %v3426_v53  ;;  %v3473_v43 = vld [vmem:[#allocation10 + $0xb70] sm:$0xff]  ;;  %v3470_v44 = vld [vmem:[#allocation10 + $0xb58] sm:$0xff] }
 0x365   :  { %5787 = vmatmul.mubr.bf16.vlgmr.msra.gmra.mrb[12].mxu0 %v10935_v5  ;;  %5916 = vmatmul.mubr.bf16.vlgmr.msra.gmra.mrb[12].mxu1 %v10935_v5  ;;  %v9683_v5 = vcombine.low %v3382_v3, %v3386_v8  ;;  %v3441_v3 = vld [vmem:[#allocation10 + $0xa70] sm:$0xff]  ;;  %v3438_v8 = vld [vmem:[#allocation10 + $0xa58] sm:$0xff] }
 0x366   :  { %5798 = vmatpush1.bf16.msra.mxu0 %v9665_v62  ;;  %5927 = vmatpush1.bf16.msra.mxu1 %v9667_v63  ;;  %v3434_v62 = vld [vmem:[#allocation10 + $0xa38] sm:$0xff]  ;;  %v9721_v63 = vcombine.low %v3421_v50, %v3425_v51  ;;  %v3477_v51 = vld [vmem:[#allocation10 + $0xb90] sm:$0xff] }
 0x367   :  { %5799 = vmatprep.subr.bf16.mxu0 %v9674_v0  ;;  %5928 = vmatprep.subr.bf16.mxu1 %v9676_v1  ;;  %v9723_v0 = vcombine.low %v3422_v52, %v3426_v53  ;;  %v9730_v1 = vcombine.high %v3429_v59, %v3433_v60  ;;  %v9732_v2 = vcombine.high %v3430_v61, %v3434_v62  ;;  %v3481_v52 = vld [vmem:[#allocation10 + $0xbb0] sm:$0xff]  ;;  %v3478_v53 = vld [vmem:[#allocation10 + $0xb98] sm:$0xff] }
 0x368   :  { %5829 = vmatprep.mubr.bf16.mxu0 %v10937_v13  ;;  %5958 = vmatprep.mubr.bf16.mxu1 %v10937_v13  ;;  %v9700_v13 = vcombine.high %v3398_v20, %v3402_v21  ;;  %v3457_v20 = vld [vmem:[#allocation10 + $0xaf0] sm:$0xff]  ;;  %v3454_v21 = vld [vmem:[#allocation10 + $0xad8] sm:$0xff] }
 0x36a   :  { %5800 = vmatpush1.bf16.msra.mxu0 %v9673_v4  ;;  %5929 = vmatpush1.bf16.msra.mxu1 %v9675_v6  ;;  %v3442_v4 = vld [vmem:[#allocation10 + $0xa78] sm:$0xff]  ;;  %v9729_v6 = vcombine.low %v3429_v59, %v3433_v60  ;;  %v3485_v60 = vld [vmem:[#allocation10 + $0xbd0] sm:$0xff] }
 0x36b   :  { %5801 = vmatprep.subr.bf16.mxu0 %v9682_v15  ;;  %5930 = vmatprep.subr.bf16.mxu1 %v9684_v58  ;;  %v9731_v15 = vcombine.low %v3430_v61, %v3434_v62  ;;  %v9738_v58 = vcombine.high %v3437_v56, %v3441_v3  ;;  %v9740_v9 = vcombine.high %v3438_v8, %v3442_v4  ;;  %v3489_v61 = vld [vmem:[#allocation10 + $0xbf0] sm:$0xff]  ;;  %v3486_v62 = vld [vmem:[#allocation10 + $0xbd8] sm:$0xff] }
 0x36e   :  { %5802 = vmatpush1.bf16.msra.mxu0 %v9681_v17  ;;  %5931 = vmatpush1.bf16.msra.mxu1 %v9683_v5  ;;  %v3450_v17 = vld [vmem:[#allocation10 + $0xab8] sm:$0xff]  ;;  %v9737_v5 = vcombine.low %v3437_v56, %v3441_v3  ;;  %v6043_v3 = vld [vmem:[#allocation11] sm:$0xff] }
 0x36f   :  { %5803 = vmatprep.subr.bf16.mxu0 %v9690_v25  ;;  %5932 = vmatprep.subr.bf16.mxu1 %v9692_v42  ;;  %v9739_v25 = vcombine.low %v3438_v8, %v3442_v4  ;;  %v9746_v42 = vcombine.high %v3445_v12, %v3449_v14  ;;  %v9748_v18 = vcombine.high %v3446_v16, %v3450_v17  ;;  %v6047_v8 = vld [vmem:[#allocation11 + $0x20] sm:$0xff]  ;;  %v6044_v4 = vld [vmem:[#allocation11 + $0x8] sm:$0xff] }
 0x372   :  { %5804 = vmatpush1.bf16.msra.mxu0 %v9689_v37  ;;  %5933 = vmatpush1.bf16.msra.mxu1 %v9691_v22  ;;  %v3458_v37 = vld [vmem:[#allocation10 + $0xaf8] sm:$0xff]  ;;  %v9745_v22 = vcombine.low %v3445_v12, %v3449_v14  ;;  %v6051_v14 = vld [vmem:[#allocation11 + $0x40] sm:$0xff] }
 0x373   :  { %5805 = vmatprep.subr.bf16.mxu0 %v9698_v23  ;;  %5934 = vmatprep.subr.bf16.mxu1 %v9700_v13  ;;  %v9747_v23 = vcombine.low %v3446_v16, %v3450_v17  ;;  %v9754_v13 = vcombine.high %v3453_v19, %v3457_v20  ;;  %v9756_v24 = vcombine.high %v3454_v21, %v3458_v37  ;;  %v6055_v16 = vld [vmem:[#allocation11 + $0x60] sm:$0xff]  ;;  %v6052_v17 = vld [vmem:[#allocation11 + $0x48] sm:$0xff] }
 0x376   :  { %5806 = vmatpush1.bf16.msra.mxu0 %v9697_v31  ;;  %5935 = vmatpush1.bf16.msra.mxu1 %v9699_v33  ;;  %v3466_v31 = vld [vmem:[#allocation10 + $0xb38] sm:$0xff]  ;;  %v9753_v33 = vcombine.low %v3453_v19, %v3457_v20  ;;  %v9806_v20 = vcombine.high %v6051_v14, %v6055_v16 }
 0x377   :  { %5807 = vmatprep.subr.bf16.mxu0 %v9706_v34  ;;  %5936 = vmatprep.subr.bf16.mxu1 %v9708_v35  ;;  %v9755_v34 = vcombine.low %v3454_v21, %v3458_v37  ;;  %v9762_v35 = vcombine.high %v3461_v26, %v3465_v28  ;;  %v9764_v36 = vcombine.high %v3462_v30, %v3466_v31  ;;  %v6059_v37 = vld [vmem:[#allocation11 + $0x80] sm:$0xff] }
 0x37a   :  { %5808 = vmatpush1.bf16.msra.mxu0 %v9705_v45  ;;  %5937 = vmatpush1.bf16.msra.mxu1 %v9707_v47  ;;  %v3474_v45 = vld [vmem:[#allocation10 + $0xb78] sm:$0xff]  ;;  %v9761_v47 = vcombine.low %v3461_v26, %v3465_v28  ;;  %v9805_v26 = vcombine.low %v6051_v14, %v6055_v16  ;;  %v6099_v16 = vld [vmem:[#allocation11 + $0x1c0] sm:$0xff] }
 0x37b   :  { %5809 = vmatprep.subr.bf16.mxu0 %v9714_v48  ;;  %5938 = vmatprep.subr.bf16.mxu1 %v9716_v49  ;;  %v9763_v48 = vcombine.low %v3462_v30, %v3466_v31  ;;  %v9770_v49 = vcombine.high %v3469_v40, %v3473_v43  ;;  %v9772_v50 = vcombine.high %v3470_v44, %v3474_v45 }
 0x37e   :  { %5810 = vmatpush1.bf16.msra.mxu0 %v9713_v54  ;;  %5939 = vmatpush1.bf16.msra.mxu1 %v9715_v55  ;;  %v3482_v54 = vld [vmem:[#allocation10 + $0xbb8] sm:$0xff]  ;;  %v9769_v55 = vcombine.low %v3469_v40, %v3473_v43 }
 0x37f   :  { %5811 = vmatprep.subr.bf16.mxu0 %v9722_v46  ;;  %5940 = vmatprep.subr.bf16.mxu1 %v9724_v57  ;;  %v9771_v46 = vcombine.low %v3470_v44, %v3474_v45  ;;  %v9778_v57 = vcombine.high %v3477_v51, %v3481_v52  ;;  %v9780_v59 = vcombine.high %v3478_v53, %v3482_v54  ;;  %v6075_v45 = vld [vmem:[#allocation11 + $0x100] sm:$0xff] }
 0x382   :  { %5812 = vmatpush1.bf16.msra.mxu0 %v9721_v63  ;;  %5941 = vmatpush1.bf16.msra.mxu1 %v9723_v0  ;;  %v3490_v63 = vld [vmem:[#allocation10 + $0xbf8] sm:$0xff]  ;;  %v9777_v0 = vcombine.low %v3477_v51, %v3481_v52 }
 0x383   :  { %5813 = vmatprep.subr.bf16.mxu0 %v9730_v1  ;;  %5942 = vmatprep.subr.bf16.mxu1 %v9732_v2  ;;  %v9779_v1 = vcombine.low %v3478_v53, %v3482_v54  ;;  %v9786_v2 = vcombine.high %v3485_v60, %v3489_v61  ;;  %v9788_v56 = vcombine.high %v3486_v62, %v3490_v63  ;;  %v6083_v54 = vld [vmem:[#allocation11 + $0x140] sm:$0xff] }
 0x386   :  { %5814 = vmatpush1.bf16.msra.mxu0 %v9729_v6  ;;  %5943 = vmatpush1.bf16.msra.mxu1 %v9731_v15  ;;  %v6048_v6 = vld [vmem:[#allocation11 + $0x28] sm:$0xff]  ;;  %v9785_v15 = vcombine.low %v3485_v60, %v3489_v61 }
 0x387   :  { %5815 = vmatprep.subr.bf16.mxu0 %v9738_v58  ;;  %5944 = vmatprep.subr.bf16.mxu1 %v9740_v9  ;;  %v9787_v58 = vcombine.low %v3486_v62, %v3490_v63  ;;  %v9798_v9 = vcombine.high %v6043_v3, %v6047_v8  ;;  %v9800_v12 = vcombine.high %v6044_v4, %v6048_v6  ;;  %v3491_v60 = vld [vmem:[#allocation14] sm:$0xff] }
 0x388   :  { %v9799_v19 = vcombine.low %v6044_v4, %v6048_v6  ;;  %v3500_v4 = vrot.slane %v3491_v60, %v10918_v39 }
 0x38a   :  { %5816 = vmatpush1.bf16.msra.mxu0 %v9737_v5  ;;  %5945 = vmatpush1.bf16.msra.mxu1 %v9739_v25  ;;  %v6056_v5 = vld [vmem:[#allocation11 + $0x68] sm:$0xff] }
 0x38b   :  { %5817 = vmatprep.subr.bf16.mxu0 %v9746_v42  ;;  %5946 = vmatprep.subr.bf16.mxu1 %v9748_v18  ;;  %v6026_v25 = vld [vmem:[#allocation7 + $0x8] sm:$0xff]  ;;  %v6032_v42 = vld [vmem:[#allocation7 + $0x38] sm:$0xff]  ;;  %v9797_v18 = vcombine.low %v6043_v3, %v6047_v8  ;;  %v9808_v21 = vcombine.high %v6052_v17, %v6056_v5  ;;  %v9807_v28 = vcombine.low %v6052_v17, %v6056_v5  ;;  %v6103_v17 = vld [vmem:[#allocation11 + $0x1e0] sm:$0xff] }
 0x38c   :  { %v6096_v3 = vld [vmem:[#allocation11 + $0x1a8] sm:$0xff]  ;;  %v3504_v8 = vrot.slane %v3491_v60, %v10915_v38 }
 0x38e   :  { %5818 = vmatpush1.bf16.msra.mxu0 %v9745_v22  ;;  %5947 = vmatpush1.bf16.msra.mxu1 %v9747_v23  ;;  %v6063_v22 = vld [vmem:[#allocation11 + $0xa0] sm:$0xff]  ;;  %v10973_v23 = vpack.c.bf16 %v6032_v42, %v6026_v25 }
 0x38f   :  { %5819 = vmatprep.subr.bf16.mxu0 %v9754_v13  ;;  %5948 = vmatprep.subr.bf16.mxu1 %v9756_v24  ;;  %v6060_v13 = vld [vmem:[#allocation11 + $0x88] sm:$0xff]  ;;  %v9814_v30 = vcombine.high %v6059_v37, %v6063_v22  ;;  %v9813_v40 = vcombine.low %v6059_v37, %v6063_v22 }
 0x390   :  { %v6064_v24 = vld [vmem:[#allocation11 + $0xa8] sm:$0xff] }
 0x391   :  { %v9816_v31 = vcombine.high %v6060_v13, %v6064_v24 }
 0x392   :  { %5820 = vmatpush1.bf16.msra.mxu0 %v9753_v33  ;;  %5949 = vmatpush1.bf16.msra.mxu1 %v9755_v34  ;;  %v6067_v33 = vld [vmem:[#allocation11 + $0xc0] sm:$0xff] }
 0x393   :  { %5821 = vmatprep.subr.bf16.mxu0 %v9762_v35  ;;  %5950 = vmatprep.subr.bf16.mxu1 %v9764_v36  ;;  %v6071_v34 = vld [vmem:[#allocation11 + $0xe0] sm:$0xff]  ;;  %v6068_v35 = vld [vmem:[#allocation11 + $0xc8] sm:$0xff] }
 0x394   :  { %v6072_v36 = vld [vmem:[#allocation11 + $0xe8] sm:$0xff]  ;;  %v9822_v43 = vcombine.high %v6067_v33, %v6071_v34 }
 0x395   :  { %v9824_v44 = vcombine.high %v6068_v35, %v6072_v36  ;;  %v9823_v51 = vcombine.low %v6068_v35, %v6072_v36 }
 0x396   :  { %5822 = vmatpush1.bf16.msra.mxu0 %v9761_v47  ;;  %5951 = vmatpush1.bf16.msra.mxu1 %v9763_v48  ;;  %v6079_v47 = vld [vmem:[#allocation11 + $0x120] sm:$0xff]  ;;  %v6076_v48 = vld [vmem:[#allocation11 + $0x108] sm:$0xff] }
 0x397   :  { %5823 = vmatprep.subr.bf16.mxu0 %v9770_v49  ;;  %5952 = vmatprep.subr.bf16.mxu1 %v9772_v50  ;;  %v6080_v49 = vld [vmem:[#allocation11 + $0x128] sm:$0xff]  ;;  %v9821_v50 = vcombine.low %v6067_v33, %v6071_v34  ;;  %v9830_v52 = vcombine.high %v6075_v45, %v6079_v47  ;;  %v9854_v33 = vcombine.high %v6099_v16, %v6103_v17 }
 0x398   :  { %v9832_v53 = vcombine.high %v6076_v48, %v6080_v49  ;;  %v9831_v61 = vcombine.low %v6076_v48, %v6080_v49  ;;  %v6108_v48 = vld [vmem:[#allocation11 + $0x208] sm:$0xff] }
 0x399   :  { %v6112_v49 = vld [vmem:[#allocation11 + $0x228] sm:$0xff] }
 0x39a   :  { %5824 = vmatpush1.bf16.msra.mxu0 %v9769_v55  ;;  %5953 = vmatpush1.bf16.msra.mxu1 %v9771_v46  ;;  %v6087_v55 = vld [vmem:[#allocation11 + $0x160] sm:$0xff]  ;;  %v6084_v46 = vld [vmem:[#allocation11 + $0x148] sm:$0xff] }
 0x39b   :  { %5825 = vmatprep.subr.bf16.mxu0 %v9778_v57  ;;  %5954 = vmatprep.subr.bf16.mxu1 %v9780_v59  ;;  %v6088_v57 = vld [vmem:[#allocation11 + $0x168] sm:$0xff]  ;;  %v9829_v59 = vcombine.low %v6075_v45, %v6079_v47  ;;  %v9838_v62 = vcombine.high %v6083_v54, %v6087_v55  ;;  %v9837_v6 = vcombine.low %v6083_v54, %v6087_v55 }
 0x39c   :  { %v9840_v63 = vcombine.high %v6084_v46, %v6088_v57  ;;  %v9864_v55 = vcombine.high %v6108_v48, %v6112_v49 }
 0x39e   :  { %5826 = vmatpush1.bf16.msra.mxu0 %v9777_v0  ;;  %5955 = vmatpush1.bf16.msra.mxu1 %v9779_v1  ;;  %v6091_v0 = vld [vmem:[#allocation11 + $0x180] sm:$0xff] }
 0x39f   :  { %5827 = vmatprep.subr.bf16.mxu0 %v9786_v2  ;;  %5956 = vmatprep.subr.bf16.mxu1 %v9788_v56  ;;  %v6095_v1 = vld [vmem:[#allocation11 + $0x1a0] sm:$0xff]  ;;  %v3496_v2 = vrot.slane %v3491_v60, %v10912_v32  ;;  %v6092_v56 = vld [vmem:[#allocation11 + $0x188] sm:$0xff] }
 0x3a0   :  { %v9848_v14 = vcombine.high %v6092_v56, %v6096_v3 }
 0x3a2   :  { %5828 = vmatpush1.bf16.msra.mxu0 %v9785_v15  ;;  %5957 = vmatpush1.bf16.msra.mxu1 %v9787_v58  ;;  %v3508_v15 = vrot.slane %v3491_v60, %v10921_v41  ;;  %v9839_v58 = vcombine.low %v6084_v46, %v6088_v57  ;;  %v6115_v46 = vld [vmem:[#allocation11 + $0x240] sm:$0xff]  ;;  %v6120_v60 = vld [vmem:[#allocation11 + $0x268] sm:$0xff] }
 0x3a3   :  { %8389 = vmatprep.subr.bf16.mxu0 %v9798_v9  ;;  %8518 = vmatprep.subr.bf16.mxu1 %v9800_v12  ;;  %v9846_v9 = vcombine.high %v6091_v0, %v6095_v1  ;;  %v6119_v57 = vld [vmem:[#allocation11 + $0x260] sm:$0xff] }
 0x3a5   :  { %5830 = vmatmul.mubr.bf16.vlgmr.msra.gmra.mrb[12].mxu0 %v10943_v29  ;;  %5959 = vmatmul.mubr.bf16.vlgmr.msra.gmra.mrb[12].mxu1 %v10943_v29  ;;  %v9815_v29 = vcombine.low %v6060_v13, %v6064_v24  ;;  %v9845_v13 = vcombine.low %v6091_v0, %v6095_v1  ;;  %v9847_v24 = vcombine.low %v6092_v56, %v6096_v3  ;;  %v6123_v1 = vld [vmem:[#allocation11 + $0x280] sm:$0xff]  ;;  %v6124_v56 = vld [vmem:[#allocation11 + $0x288] sm:$0xff] }
 0x3a6   :  { %8390 = vmatpush1.bf16.msra.mxu0 %v9797_v18  ;;  %8519 = vmatpush1.bf16.msra.mxu1 %v9799_v19  ;;  %v6100_v18 = vld [vmem:[#allocation11 + $0x1c8] sm:$0xff] }
 0x3a7   :  { %8391 = vmatprep.subr.bf16.mxu0 %v9806_v20  ;;  %8520 = vmatprep.subr.bf16.mxu1 %v9808_v21  ;;  %v6104_v19 = vld [vmem:[#allocation11 + $0x1e8] sm:$0xff] }
 0x3a8   :  { %8421 = vmatprep.mubr.bf16.mxu0 %v10973_v23  ;;  %8550 = vmatprep.mubr.bf16.mxu1 %v10973_v23  ;;  %v6128_v3 = vld [vmem:[#allocation11 + $0x2a8] sm:$0xff] }
 0x3aa   :  { %8392 = vmatpush1.bf16.msra.mxu0 %v9805_v26  ;;  %8521 = vmatpush1.bf16.msra.mxu1 %v9807_v28 }
 0x3ab   :  { %8393 = vmatprep.subr.bf16.mxu0 %v9814_v30  ;;  %8522 = vmatprep.subr.bf16.mxu1 %v9816_v31 }
 0x3ae   :  { %8394 = vmatpush1.bf16.msra.mxu0 %v9813_v40  ;;  %8523 = vmatpush1.bf16.msra.mxu1 %v9815_v29  ;;  %v9856_v29 = vcombine.high %v6100_v18, %v6104_v19 }
 0x3af   :  { %8395 = vmatprep.subr.bf16.mxu0 %v9822_v43  ;;  %8524 = vmatprep.subr.bf16.mxu1 %v9824_v44  ;;  %v6107_v43 = vld [vmem:[#allocation11 + $0x200] sm:$0xff] }
 0x3b0   :  { %v6111_v44 = vld [vmem:[#allocation11 + $0x220] sm:$0xff] }
 0x3b1   :  { %v9862_v54 = vcombine.high %v6107_v43, %v6111_v44 }
 0x3b2   :  { %8396 = vmatpush1.bf16.msra.mxu0 %v9821_v50  ;;  %8525 = vmatpush1.bf16.msra.mxu1 %v9823_v51  ;;  %v9853_v51 = vcombine.low %v6099_v16, %v6103_v17  ;;  %v9879_v17 = vcombine.low %v6124_v56, %v6128_v3 }
 0x3b3   :  { %8397 = vmatprep.subr.bf16.mxu0 %v9830_v52  ;;  %8526 = vmatprep.subr.bf16.mxu1 %v9832_v53  ;;  %v9855_v53 = vcombine.low %v6100_v18, %v6104_v19  ;;  %v6143_v18 = vld [vmem:[#allocation11 + $0x320] sm:$0xff]  ;;  %v6140_v19 = vld [vmem:[#allocation11 + $0x308] sm:$0xff] }
 0x3b6   :  { %8398 = vmatpush1.bf16.msra.mxu0 %v9829_v59  ;;  %8527 = vmatpush1.bf16.msra.mxu1 %v9831_v61  ;;  %v6116_v59 = vld [vmem:[#allocation11 + $0x248] sm:$0xff]  ;;  %v9861_v61 = vcombine.low %v6107_v43, %v6111_v44 }
 0x3b7   :  { %8399 = vmatprep.subr.bf16.mxu0 %v9838_v62  ;;  %8528 = vmatprep.subr.bf16.mxu1 %v9840_v63  ;;  %v9863_v62 = vcombine.low %v6108_v48, %v6112_v49  ;;  %v9870_v63 = vcombine.high %v6115_v46, %v6119_v57  ;;  %v9872_v0 = vcombine.high %v6116_v59, %v6120_v60  ;;  %v6160_v43 = vld [vmem:[#allocation11 + $0x3a8] sm:$0xff]  ;;  %v6163_v49 = vld [vmem:[#allocation11 + $0x3c0] sm:$0xff] }
 0x3b8   :  { %v5573_v12 = vpop.f32.mrb[8].mxu0  ;;  %v5702_v25 = vpop.f32.mrb[8].mxu1 }
 0x3b9   :  { %v10229_v5 = vadd.f32 %v5573_v12, %v3496_v2  ;;  %v5575_v42 = vpop.f32.mrb[9].mxu0  ;;  %v10233_v20 = vadd.f32 %v5702_v25, %v3504_v8  ;;  %v5704_v37 = vpop.f32.mrb[9].mxu1  ;;  %v6132_v12 = vld [vmem:[#allocation11 + $0x2c8] sm:$0xff] }
 0x3ba   :  { %v10230_v21 = vadd.f32 %v5575_v42, %v3500_v4  ;;  %v5577_v22 = vpop.f32.mrb[10].mxu0  ;;  %8400 = vmatpush1.bf16.msra.mxu0 %v9837_v6  ;;  %v10234_v26 = vadd.f32 %v5704_v37, %v3508_v15  ;;  %v5706_v30 = vpop.f32.mrb[10].mxu1  ;;  %8529 = vmatpush1.bf16.msra.mxu1 %v9839_v58  ;;  %v6131_v58 = vld [vmem:[#allocation11 + $0x2c0] sm:$0xff] }
 0x3bb   :  { %v10231_v28 = vadd.f32 %v5577_v22, %v3496_v2  ;;  %v5579_v31 = vpop.f32.mrb[11].mxu0  ;;  %8401 = vmatprep.subr.bf16.mxu0 %v9846_v9  ;;  %v10235_v35 = vadd.f32 %v5706_v30, %v3504_v8  ;;  %v5708_v40 = vpop.f32.mrb[11].mxu1  ;;  %8530 = vmatprep.subr.bf16.mxu1 %v9848_v14  ;;  %v6127_v2 = vld [vmem:[#allocation11 + $0x2a0] sm:$0xff]  ;;  %v9869_v8 = vcombine.low %v6115_v46, %v6119_v57  ;;  %v6136_v14 = vld [vmem:[#allocation11 + $0x2e8] sm:$0xff] }
 0x3bc   :  { %v10197_v34 = vpack.c.bf16 %v10230_v21, %v10229_v5  ;;  %v10232_v36 = vadd.f32 %v5579_v31, %v3500_v4  ;;  %v10198_v45 = vpack.c.bf16 %v10234_v26, %v10233_v20  ;;  %v10236_v47 = vadd.f32 %v5708_v40, %v3508_v15  ;;  %v6135_v9 = vld [vmem:[#allocation11 + $0x2e0] sm:$0xff]  ;;  %v6144_v20 = vld [vmem:[#allocation11 + $0x328] sm:$0xff] }
 0x3bd   :  { %v9871_v4 = vcombine.low %v6116_v59, %v6120_v60  ;;  %v9878_v6 = vcombine.high %v6123_v1, %v6127_v2  ;;  %v9880_v15 = vcombine.high %v6124_v56, %v6128_v3  ;;  %v9877_v16 = vcombine.low %v6123_v1, %v6127_v2  ;;  %v6139_v42 = vld [vmem:[#allocation11 + $0x300] sm:$0xff]  ;;  %v6152_v30 = vld [vmem:[#allocation11 + $0x368] sm:$0xff] }
 0x3be   :  { %6017 = vst [vmem:[#allocation18] sm:$0xff] %v10197_v34  ;;  %v10201_v50 = vpack.c.bf16 %v10232_v36, %v10231_v28  ;;  %8402 = vmatpush1.bf16.msra.mxu0 %v9845_v13  ;;  %6018 = vst [vmem:[#allocation18 + $0x8] sm:$0xff] %v10198_v45  ;;  %v10202_v52 = vpack.c.bf16 %v10236_v47, %v10235_v35  ;;  %8531 = vmatpush1.bf16.msra.mxu1 %v9847_v24  ;;  %v6147_v24 = vld [vmem:[#allocation11 + $0x340] sm:$0xff]  ;;  %v6148_v28 = vld [vmem:[#allocation11 + $0x348] sm:$0xff] }
 0x3bf   :  { %8403 = vmatprep.subr.bf16.mxu0 %v9854_v33  ;;  %8532 = vmatprep.subr.bf16.mxu1 %v9856_v29  ;;  %v9886_v5 = vcombine.high %v6131_v58, %v6135_v9  ;;  %v9888_v25 = vcombine.high %v6132_v12, %v6136_v14  ;;  %v9885_v21 = vcombine.low %v6131_v58, %v6135_v9  ;;  %v6151_v26 = vld [vmem:[#allocation11 + $0x360] sm:$0xff]  ;;  %v6156_v29 = vld [vmem:[#allocation11 + $0x388] sm:$0xff]  ;;  %v6028_v58 = vld [vmem:[#allocation7 + $0x18] sm:$0xff] }
 0x3c0   :  { %6021 = vst [vmem:[#allocation18 + $0x20] sm:$0xff] %v10201_v50  ;;  %6022 = vst [vmem:[#allocation18 + $0x28] sm:$0xff] %v10202_v52  ;;  %v9887_v37 = vcombine.low %v6132_v12, %v6136_v14  ;;  %v9894_v22 = vcombine.high %v6139_v42, %v6143_v18  ;;  %v9896_v13 = vcombine.high %v6140_v19, %v6144_v20  ;;  %v6155_v36 = vld [vmem:[#allocation11 + $0x380] sm:$0xff]  ;;  %v6168_v52 = vld [vmem:[#allocation11 + $0x3e8] sm:$0xff] }
 0x3c1   :  { %v9893_v31 = vcombine.low %v6139_v42, %v6143_v18  ;;  %v9895_v33 = vcombine.low %v6140_v19, %v6144_v20  ;;  %v9902_v34 = vcombine.high %v6147_v24, %v6151_v26  ;;  %v9904_v35 = vcombine.high %v6148_v28, %v6152_v30  ;;  %v6159_v40 = vld [vmem:[#allocation11 + $0x3a0] sm:$0xff]  ;;  %v6172_v60 = vld [vmem:[#allocation11 + $0x408] sm:$0xff] }
 0x3c2   :  { %8404 = vmatpush1.bf16.msra.mxu0 %v9853_v51  ;;  %8533 = vmatpush1.bf16.msra.mxu1 %v9855_v53  ;;  %v9901_v44 = vcombine.low %v6147_v24, %v6151_v26  ;;  %v9903_v45 = vcombine.low %v6148_v28, %v6152_v30  ;;  %v9910_v47 = vcombine.high %v6155_v36, %v6159_v40  ;;  %v6167_v50 = vld [vmem:[#allocation11 + $0x3e0] sm:$0xff]  ;;  %v6164_v51 = vld [vmem:[#allocation11 + $0x3c8] sm:$0xff] }
 0x3c3   :  { %8405 = vmatprep.subr.bf16.mxu0 %v9862_v54  ;;  %8534 = vmatprep.subr.bf16.mxu1 %v9864_v55  ;;  %v9912_v48 = vcombine.high %v6156_v29, %v6160_v43  ;;  %v9909_v53 = vcombine.low %v6155_v36, %v6159_v40  ;;  %v9911_v54 = vcombine.low %v6156_v29, %v6160_v43  ;;  %v6171_v57 = vld [vmem:[#allocation11 + $0x400] sm:$0xff]  ;;  %v6034_v9 = vld [vmem:[#allocation7 + $0x48] sm:$0xff] }
 0x3c4   :  { %v9918_v55 = vcombine.high %v6163_v49, %v6167_v50  ;;  %v9920_v46 = vcombine.high %v6164_v51, %v6168_v52  ;;  %v6175_v59 = vld [vmem:[#allocation11 + $0x420] sm:$0xff]  ;;  %v9919_v1 = vcombine.low %v6164_v51, %v6168_v52  ;;  %v10985_v42 = vpack.c.bf16 %v6034_v9, %v6028_v58  ;;  %v6188_v18 = vld [vmem:[#allocation11 + $0x488] sm:$0xff] }
 0x3c5   :  { %v9926_v2 = vcombine.high %v6171_v57, %v6175_v59  ;;  %v6179_v3 = vld [vmem:[#allocation11 + $0x440] sm:$0xff]  ;;  %v9925_v12 = vcombine.low %v6171_v57, %v6175_v59  ;;  %v6192_v19 = vld [vmem:[#allocation11 + $0x4a8] sm:$0xff] }
 0x3c6   :  { %8406 = vmatpush1.bf16.msra.mxu0 %v9861_v61  ;;  %8535 = vmatpush1.bf16.msra.mxu1 %v9863_v62  ;;  %v6176_v61 = vld [vmem:[#allocation11 + $0x428] sm:$0xff]  ;;  %v9917_v62 = vcombine.low %v6163_v49, %v6167_v50  ;;  %v6199_v24 = vld [vmem:[#allocation11 + $0x4e0] sm:$0xff] }
 0x3c7   :  { %8407 = vmatprep.subr.bf16.mxu0 %v9870_v63  ;;  %8536 = vmatprep.subr.bf16.mxu1 %v9872_v0  ;;  %v6025_v63 = vld [vmem:[#allocation7] sm:$0xff]  ;;  %v6031_v0 = vld [vmem:[#allocation7 + $0x30] sm:$0xff]  ;;  %v9928_v56 = vcombine.high %v6172_v60, %v6176_v61  ;;  %v9927_v14 = vcombine.low %v6172_v60, %v6176_v61  ;;  %v6196_v26 = vld [vmem:[#allocation11 + $0x4c8] sm:$0xff] }
 0x3c8   :  { %v6200_v28 = vld [vmem:[#allocation11 + $0x4e8] sm:$0xff]  ;;  %v6207_v36 = vld [vmem:[#allocation11 + $0x520] sm:$0xff] }
 0x3c9   :  { %v6204_v40 = vld [vmem:[#allocation11 + $0x508] sm:$0xff]  ;;  %v6215_v49 = vld [vmem:[#allocation11 + $0x560] sm:$0xff] }
 0x3ca   :  { %8408 = vmatpush1.bf16.msra.mxu0 %v9869_v8  ;;  %8537 = vmatpush1.bf16.msra.mxu1 %v9871_v4  ;;  %v6183_v8 = vld [vmem:[#allocation11 + $0x460] sm:$0xff]  ;;  %v6180_v4 = vld [vmem:[#allocation11 + $0x448] sm:$0xff] }
 0x3cb   :  { %8409 = vmatprep.subr.bf16.mxu0 %v9878_v6  ;;  %8538 = vmatprep.subr.bf16.mxu1 %v9880_v15  ;;  %v10983_v6 = vpack.c.bf16 %v6031_v0, %v6025_v63  ;;  %v6184_v15 = vld [vmem:[#allocation11 + $0x468] sm:$0xff]  ;;  %v9933_v20 = vcombine.low %v6179_v3, %v6183_v8  ;;  %v6223_v57 = vld [vmem:[#allocation11 + $0x5a0] sm:$0xff] }
 0x3cc   :  { %v6208_v29 = vld [vmem:[#allocation11 + $0x528] sm:$0xff]  ;;  %v6235_v9 = vld [vmem:[#allocation11 + $0x600] sm:$0xff] }
 0x3cd   :  { %v6212_v50 = vld [vmem:[#allocation11 + $0x548] sm:$0xff] }
 0x3ce   :  { %8410 = vmatpush1.bf16.msra.mxu0 %v9877_v16  ;;  %8539 = vmatpush1.bf16.msra.mxu1 %v9879_v17  ;;  %v9934_v16 = vcombine.high %v6179_v3, %v6183_v8  ;;  %v9936_v17 = vcombine.high %v6180_v4, %v6184_v15  ;;  %v6216_v51 = vld [vmem:[#allocation11 + $0x568] sm:$0xff] }
 0x3cf   :  { %8411 = vmatprep.subr.bf16.mxu0 %v9886_v5  ;;  %8540 = vmatprep.subr.bf16.mxu1 %v9888_v25  ;;  %v6187_v5 = vld [vmem:[#allocation11 + $0x480] sm:$0xff]  ;;  %v6220_v59 = vld [vmem:[#allocation11 + $0x588] sm:$0xff] }
 0x3d0   :  { %v6191_v25 = vld [vmem:[#allocation11 + $0x4a0] sm:$0xff]  ;;  %v6224_v60 = vld [vmem:[#allocation11 + $0x5a8] sm:$0xff] }
 0x3d1   :  { %v9941_v30 = vcombine.low %v6187_v5, %v6191_v25  ;;  %v9976_v0 = vcombine.high %v6220_v59, %v6224_v60  ;;  %v6232_v3 = vld [vmem:[#allocation11 + $0x5e8] sm:$0xff] }
 0x3d2   :  { %8412 = vmatpush1.bf16.msra.mxu0 %v9885_v21  ;;  %8541 = vmatpush1.bf16.msra.mxu1 %v9887_v37  ;;  %v9935_v21 = vcombine.low %v6180_v4, %v6184_v15  ;;  %v9942_v37 = vcombine.high %v6187_v5, %v6191_v25  ;;  %v9975_v4 = vcombine.low %v6220_v59, %v6224_v60  ;;  %v6275_v60 = vld [vmem:[#allocation11 + $0x740] sm:$0xff] }
 0x3d3   :  { %8413 = vmatprep.subr.bf16.mxu0 %v9894_v22  ;;  %8542 = vmatprep.subr.bf16.mxu1 %v9896_v13  ;;  %v9944_v22 = vcombine.high %v6188_v18, %v6192_v19  ;;  %v6195_v13 = vld [vmem:[#allocation11 + $0x4c0] sm:$0xff] }
 0x3d4   :  { %v9949_v43 = vcombine.low %v6195_v13, %v6199_v24 }
 0x3d6   :  { %8414 = vmatpush1.bf16.msra.mxu0 %v9893_v31  ;;  %8543 = vmatpush1.bf16.msra.mxu1 %v9895_v33  ;;  %v9943_v31 = vcombine.low %v6188_v18, %v6192_v19  ;;  %v9950_v33 = vcombine.high %v6195_v13, %v6199_v24  ;;  %v6243_v19 = vld [vmem:[#allocation11 + $0x640] sm:$0xff] }
 0x3d7   :  { %8415 = vmatprep.subr.bf16.mxu0 %v9902_v34  ;;  %8544 = vmatprep.subr.bf16.mxu1 %v9904_v35  ;;  %v9952_v34 = vcombine.high %v6196_v26, %v6200_v28  ;;  %v6203_v35 = vld [vmem:[#allocation11 + $0x500] sm:$0xff] }
 0x3d8   :  { %v9957_v52 = vcombine.low %v6203_v35, %v6207_v36 }
 0x3da   :  { %8416 = vmatpush1.bf16.msra.mxu0 %v9901_v44  ;;  %8545 = vmatpush1.bf16.msra.mxu1 %v9903_v45  ;;  %v9951_v44 = vcombine.low %v6196_v26, %v6200_v28  ;;  %v9958_v45 = vcombine.high %v6203_v35, %v6207_v36  ;;  %v6251_v28 = vld [vmem:[#allocation11 + $0x680] sm:$0xff] }
 0x3db   :  { %8417 = vmatprep.subr.bf16.mxu0 %v9910_v47  ;;  %8546 = vmatprep.subr.bf16.mxu1 %v9912_v48  ;;  %v9960_v47 = vcombine.high %v6204_v40, %v6208_v29  ;;  %v6211_v48 = vld [vmem:[#allocation11 + $0x540] sm:$0xff] }
 0x3dc   :  { %v9965_v61 = vcombine.low %v6211_v48, %v6215_v49 }
 0x3de   :  { %8418 = vmatpush1.bf16.msra.mxu0 %v9909_v53  ;;  %8547 = vmatpush1.bf16.msra.mxu1 %v9911_v54  ;;  %v9959_v53 = vcombine.low %v6204_v40, %v6208_v29  ;;  %v9966_v54 = vcombine.high %v6211_v48, %v6215_v49  ;;  %v6259_v29 = vld [vmem:[#allocation11 + $0x6c0] sm:$0xff] }
 0x3df   :  { %8419 = vmatprep.subr.bf16.mxu0 %v9918_v55  ;;  %8548 = vmatprep.subr.bf16.mxu1 %v9920_v46  ;;  %v9968_v55 = vcombine.high %v6212_v50, %v6216_v51  ;;  %v6219_v46 = vld [vmem:[#allocation11 + $0x580] sm:$0xff] }
 0x3e0   :  { %v9974_v63 = vcombine.high %v6219_v46, %v6223_v57  ;;  %v9973_v8 = vcombine.low %v6219_v46, %v6223_v57 }
 0x3e2   :  { %8420 = vmatpush1.bf16.msra.mxu0 %v9917_v62  ;;  %8549 = vmatpush1.bf16.msra.mxu1 %v9919_v1  ;;  %v9967_v62 = vcombine.low %v6212_v50, %v6216_v51  ;;  %v6227_v1 = vld [vmem:[#allocation11 + $0x5c0] sm:$0xff] }
 0x3e3   :  { %8432 = vmatprep.subr.bf16.mxu0 %v9926_v2  ;;  %8561 = vmatprep.subr.bf16.mxu1 %v9928_v56  ;;  %v6231_v2 = vld [vmem:[#allocation11 + $0x5e0] sm:$0xff]  ;;  %v6228_v56 = vld [vmem:[#allocation11 + $0x5c8] sm:$0xff] }
 0x3e4   :  { %v9982_v15 = vcombine.high %v6227_v1, %v6231_v2  ;;  %v9984_v58 = vcombine.high %v6228_v56, %v6232_v3  ;;  %v9983_v5 = vcombine.low %v6228_v56, %v6232_v3  ;;  %v6267_v51 = vld [vmem:[#allocation11 + $0x700] sm:$0xff] }
 0x3e5   :  { %8422 = vmatmul.mubr.bf16.vlgmr.msra.gmra.mrb[16].mxu0 %v10983_v6  ;;  %8551 = vmatmul.mubr.bf16.vlgmr.msra.gmra.mrb[16].mxu1 %v10983_v6  ;;  %v6283_v3 = vld [vmem:[#allocation11 + $0x780] sm:$0xff] }
 0x3e6   :  { %8433 = vmatpush1.bf16.msra.mxu0 %v9925_v12  ;;  %8562 = vmatpush1.bf16.msra.mxu1 %v9927_v14  ;;  %v6239_v12 = vld [vmem:[#allocation11 + $0x620] sm:$0xff]  ;;  %v6236_v14 = vld [vmem:[#allocation11 + $0x608] sm:$0xff] }
 0x3e7   :  { %8434 = vmatprep.subr.bf16.mxu0 %v9934_v16  ;;  %8563 = vmatprep.subr.bf16.mxu1 %v9936_v17  ;;  %v6240_v16 = vld [vmem:[#allocation11 + $0x628] sm:$0xff]  ;;  %v9981_v17 = vcombine.low %v6227_v1, %v6231_v2  ;;  %v9990_v25 = vcombine.high %v6235_v9, %v6239_v12 }
 0x3e8   :  { %8464 = vmatprep.mubr.bf16.mxu0 %v10985_v42  ;;  %8593 = vmatprep.mubr.bf16.mxu1 %v10985_v42  ;;  %v9992_v18 = vcombine.high %v6236_v14, %v6240_v16  ;;  %v9991_v13 = vcombine.low %v6236_v14, %v6240_v16  ;;  %v6291_v16 = vld [vmem:[#allocation11 + $0x7c0] sm:$0xff] }
 0x3ea   :  { %8435 = vmatpush1.bf16.msra.mxu0 %v9933_v20  ;;  %8564 = vmatpush1.bf16.msra.mxu1 %v9935_v21  ;;  %v6247_v20 = vld [vmem:[#allocation11 + $0x660] sm:$0xff]  ;;  %v6244_v21 = vld [vmem:[#allocation11 + $0x648] sm:$0xff] }
 0x3eb   :  { %8436 = vmatprep.subr.bf16.mxu0 %v9942_v37  ;;  %8565 = vmatprep.subr.bf16.mxu1 %v9944_v22  ;;  %v6248_v37 = vld [vmem:[#allocation11 + $0x668] sm:$0xff]  ;;  %v9989_v22 = vcombine.low %v6235_v9, %v6239_v12  ;;  %v9998_v24 = vcombine.high %v6243_v19, %v6247_v20 }
 0x3ec   :  { %v10000_v26 = vcombine.high %v6244_v21, %v6248_v37  ;;  %v9999_v35 = vcombine.low %v6244_v21, %v6248_v37  ;;  %v6299_v37 = vld [vmem:[#allocation11 + $0x800] sm:$0xff] }
 0x3ee   :  { %8437 = vmatpush1.bf16.msra.mxu0 %v9941_v30  ;;  %8566 = vmatpush1.bf16.msra.mxu1 %v9943_v31  ;;  %v6255_v30 = vld [vmem:[#allocation11 + $0x6a0] sm:$0xff]  ;;  %v6252_v31 = vld [vmem:[#allocation11 + $0x688] sm:$0xff] }
 0x3ef   :  { %8438 = vmatprep.subr.bf16.mxu0 %v9950_v33  ;;  %8567 = vmatprep.subr.bf16.mxu1 %v9952_v34  ;;  %v6256_v33 = vld [vmem:[#allocation11 + $0x6a8] sm:$0xff]  ;;  %v9997_v34 = vcombine.low %v6243_v19, %v6247_v20  ;;  %v10006_v36 = vcombine.high %v6251_v28, %v6255_v30 }
 0x3f0   :  { %v10008_v40 = vcombine.high %v6252_v31, %v6256_v33  ;;  %v10007_v48 = vcombine.low %v6252_v31, %v6256_v33 }
 0x3f2   :  { %8439 = vmatpush1.bf16.msra.mxu0 %v9949_v43  ;;  %8568 = vmatpush1.bf16.msra.mxu1 %v9951_v44  ;;  %v6263_v43 = vld [vmem:[#allocation11 + $0x6e0] sm:$0xff]  ;;  %v6260_v44 = vld [vmem:[#allocation11 + $0x6c8] sm:$0xff] }
 0x3f3   :  { %8440 = vmatprep.subr.bf16.mxu0 %v9958_v45  ;;  %8569 = vmatprep.subr.bf16.mxu1 %v9960_v47  ;;  %v6264_v45 = vld [vmem:[#allocation11 + $0x6e8] sm:$0xff]  ;;  %v10005_v47 = vcombine.low %v6251_v28, %v6255_v30  ;;  %v10014_v49 = vcombine.high %v6259_v29, %v6263_v43  ;;  %v6027_v28 = vld [vmem:[#allocation7 + $0x10] sm:$0xff]  ;;  %v6033_v30 = vld [vmem:[#allocation7 + $0x40] sm:$0xff] }
 0x3f4   :  { %v10016_v50 = vcombine.high %v6260_v44, %v6264_v45  ;;  %v10015_v46 = vcombine.low %v6260_v44, %v6264_v45  ;;  %v6030_v44 = vld [vmem:[#allocation7 + $0x28] sm:$0xff]  ;;  %v6036_v45 = vld [vmem:[#allocation7 + $0x58] sm:$0xff] }
 0x3f6   :  { %8441 = vmatpush1.bf16.msra.mxu0 %v9957_v52  ;;  %8570 = vmatpush1.bf16.msra.mxu1 %v9959_v53  ;;  %v6271_v52 = vld [vmem:[#allocation11 + $0x720] sm:$0xff]  ;;  %v6268_v53 = vld [vmem:[#allocation11 + $0x708] sm:$0xff] }
 0x3f7   :  { %8442 = vmatprep.subr.bf16.mxu0 %v9966_v54  ;;  %8571 = vmatprep.subr.bf16.mxu1 %v9968_v55  ;;  %v6272_v54 = vld [vmem:[#allocation11 + $0x728] sm:$0xff]  ;;  %v10013_v55 = vcombine.low %v6259_v29, %v6263_v43  ;;  %v10022_v57 = vcombine.high %v6267_v51, %v6271_v52  ;;  %v10991_v29 = vpack.c.bf16 %v6033_v30, %v6027_v28 }
 0x3f8   :  { %v10024_v59 = vcombine.high %v6268_v53, %v6272_v54  ;;  %v10023_v1 = vcombine.low %v6268_v53, %v6272_v54  ;;  %v6312_v43 = vld [vmem:[#allocation11 + $0x868] sm:$0xff]  ;;  %v10993_v53 = vpack.c.bf16 %v6036_v45, %v6030_v44 }
 0x3f9   :  { %v6316_v54 = vld [vmem:[#allocation11 + $0x888] sm:$0xff] }
 0x3fa   :  { %8443 = vmatpush1.bf16.msra.mxu0 %v9965_v61  ;;  %8572 = vmatpush1.bf16.msra.mxu1 %v9967_v62  ;;  %v6279_v61 = vld [vmem:[#allocation11 + $0x760] sm:$0xff]  ;;  %v6276_v62 = vld [vmem:[#allocation11 + $0x748] sm:$0xff] }
 0x3fb   :  { %8444 = vmatprep.subr.bf16.mxu0 %v9974_v63  ;;  %8573 = vmatprep.subr.bf16.mxu1 %v9976_v0  ;;  %v6280_v63 = vld [vmem:[#allocation11 + $0x768] sm:$0xff]  ;;  %v10021_v0 = vcombine.low %v6267_v51, %v6271_v52  ;;  %v10030_v2 = vcombine.high %v6275_v60, %v6279_v61  ;;  %v6315_v51 = vld [vmem:[#allocation11 + $0x880] sm:$0xff] }
 0x3fc   :  { %v10032_v56 = vcombine.high %v6276_v62, %v6280_v63  ;;  %v10031_v9 = vcombine.low %v6276_v62, %v6280_v63  ;;  %v6319_v52 = vld [vmem:[#allocation11 + $0x8a0] sm:$0xff]  ;;  %v6324_v63 = vld [vmem:[#allocation11 + $0x8c8] sm:$0xff] }
 0x3fd   :  { %v6327_v62 = vld [vmem:[#allocation11 + $0x8e0] sm:$0xff] }
 0x3fe   :  { %8445 = vmatpush1.bf16.msra.mxu0 %v9973_v8  ;;  %8574 = vmatpush1.bf16.msra.mxu1 %v9975_v4  ;;  %v6287_v8 = vld [vmem:[#allocation11 + $0x7a0] sm:$0xff]  ;;  %v6284_v4 = vld [vmem:[#allocation11 + $0x788] sm:$0xff] }
 0x3ff   :  { %8446 = vmatprep.subr.bf16.mxu0 %v9982_v15  ;;  %8575 = vmatprep.subr.bf16.mxu1 %v9984_v58  ;;  %v6288_v15 = vld [vmem:[#allocation11 + $0x7a8] sm:$0xff]  ;;  %v10029_v58 = vcombine.low %v6275_v60, %v6279_v61  ;;  %v10038_v12 = vcombine.high %v6283_v3, %v6287_v8  ;;  %v6323_v61 = vld [vmem:[#allocation11 + $0x8c0] sm:$0xff] }
 0x400   :  { %v10040_v14 = vcombine.high %v6284_v4, %v6288_v15  ;;  %v10039_v19 = vcombine.low %v6284_v4, %v6288_v15  ;;  %v6335_v4 = vld [vmem:[#allocation11 + $0x920] sm:$0xff]  ;;  %v6332_v15 = vld [vmem:[#allocation11 + $0x908] sm:$0xff] }
 0x402   :  { %8447 = vmatpush1.bf16.msra.mxu0 %v9981_v17  ;;  %8576 = vmatpush1.bf16.msra.mxu1 %v9983_v5  ;;  %v6295_v17 = vld [vmem:[#allocation11 + $0x7e0] sm:$0xff]  ;;  %v6292_v5 = vld [vmem:[#allocation11 + $0x7c8] sm:$0xff] }
 0x403   :  { %8448 = vmatprep.subr.bf16.mxu0 %v9990_v25  ;;  %8577 = vmatprep.subr.bf16.mxu1 %v9992_v18  ;;  %v6296_v25 = vld [vmem:[#allocation11 + $0x7e8] sm:$0xff]  ;;  %v10037_v18 = vcombine.low %v6283_v3, %v6287_v8  ;;  %v10046_v20 = vcombine.high %v6291_v16, %v6295_v17  ;;  %v6331_v8 = vld [vmem:[#allocation11 + $0x900] sm:$0xff] }
 0x404   :  { %v10048_v21 = vcombine.high %v6292_v5, %v6296_v25  ;;  %v10047_v31 = vcombine.low %v6292_v5, %v6296_v25  ;;  %v6343_v5 = vld [vmem:[#allocation11 + $0x960] sm:$0xff]  ;;  %v6340_v25 = vld [vmem:[#allocation11 + $0x948] sm:$0xff] }
 0x406   :  { %8449 = vmatpush1.bf16.msra.mxu0 %v9989_v22  ;;  %8578 = vmatpush1.bf16.msra.mxu1 %v9991_v13  ;;  %v6303_v22 = vld [vmem:[#allocation11 + $0x820] sm:$0xff]  ;;  %v6300_v13 = vld [vmem:[#allocation11 + $0x808] sm:$0xff] }
 0x407   :  { %8450 = vmatprep.subr.bf16.mxu0 %v9998_v24  ;;  %8579 = vmatprep.subr.bf16.mxu1 %v10000_v26  ;;  %v6304_v24 = vld [vmem:[#allocation11 + $0x828] sm:$0xff]  ;;  %v10045_v26 = vcombine.low %v6291_v16, %v6295_v17  ;;  %v10054_v33 = vcombine.high %v6299_v37, %v6303_v22  ;;  %v6339_v17 = vld [vmem:[#allocation11 + $0x940] sm:$0xff] }
 0x408   :  { %v10093_v28 = vcombine.low %v6339_v17, %v6343_v5 }
 0x40a   :  { %8451 = vmatpush1.bf16.msra.mxu0 %v9997_v34  ;;  %8580 = vmatpush1.bf16.msra.mxu1 %v9999_v35  ;;  %v10056_v34 = vcombine.high %v6300_v13, %v6304_v24  ;;  %v6307_v35 = vld [vmem:[#allocation11 + $0x840] sm:$0xff] }
 0x40b   :  { %8452 = vmatprep.subr.bf16.mxu0 %v10006_v36  ;;  %8581 = vmatprep.subr.bf16.mxu1 %v10008_v40  ;;  %v6311_v36 = vld [vmem:[#allocation11 + $0x860] sm:$0xff]  ;;  %v6308_v40 = vld [vmem:[#allocation11 + $0x848] sm:$0xff] }
 0x40e   :  { %8453 = vmatpush1.bf16.msra.mxu0 %v10005_v47  ;;  %8582 = vmatpush1.bf16.msra.mxu1 %v10007_v48  ;;  %v10053_v47 = vcombine.low %v6299_v37, %v6303_v22  ;;  %v10055_v48 = vcombine.low %v6300_v13, %v6304_v24  ;;  %v6347_v22 = vld [vmem:[#allocation11 + $0x980] sm:$0xff]  ;;  %v6348_v24 = vld [vmem:[#allocation11 + $0x988] sm:$0xff] }
 0x40f   :  { %8454 = vmatprep.subr.bf16.mxu0 %v10014_v49  ;;  %8583 = vmatprep.subr.bf16.mxu1 %v10016_v50  ;;  %v10062_v49 = vcombine.high %v6307_v35, %v6311_v36  ;;  %v10064_v50 = vcombine.high %v6308_v40, %v6312_v43  ;;  %v6351_v13 = vld [vmem:[#allocation11 + $0x9a0] sm:$0xff] }
 0x412   :  { %8455 = vmatpush1.bf16.msra.mxu0 %v10013_v55  ;;  %8584 = vmatpush1.bf16.msra.mxu1 %v10015_v46  ;;  %v6320_v55 = vld [vmem:[#allocation11 + $0x8a8] sm:$0xff]  ;;  %v10061_v46 = vcombine.low %v6307_v35, %v6311_v36  ;;  %v6359_v35 = vld [vmem:[#allocation11 + $0x9e0] sm:$0xff] }
 0x413   :  { %8456 = vmatprep.subr.bf16.mxu0 %v10022_v57  ;;  %8585 = vmatprep.subr.bf16.mxu1 %v10024_v59  ;;  %v10063_v57 = vcombine.low %v6308_v40, %v6312_v43  ;;  %v10070_v59 = vcombine.high %v6315_v51, %v6319_v52  ;;  %v10072_v60 = vcombine.high %v6316_v54, %v6320_v55  ;;  %v6356_v36 = vld [vmem:[#allocation11 + $0x9c8] sm:$0xff] }
 0x414   :  { %v6360_v40 = vld [vmem:[#allocation11 + $0x9e8] sm:$0xff]  ;;  %v10101_v43 = vcombine.low %v6347_v22, %v6351_v13 }
 0x416   :  { %8457 = vmatpush1.bf16.msra.mxu0 %v10021_v0  ;;  %8586 = vmatpush1.bf16.msra.mxu1 %v10023_v1  ;;  %v6328_v0 = vld [vmem:[#allocation11 + $0x8e8] sm:$0xff]  ;;  %v10069_v1 = vcombine.low %v6315_v51, %v6319_v52 }
 0x417   :  { %8458 = vmatprep.subr.bf16.mxu0 %v10030_v2  ;;  %8587 = vmatprep.subr.bf16.mxu1 %v10032_v56  ;;  %v10071_v2 = vcombine.low %v6316_v54, %v6320_v55  ;;  %v10078_v56 = vcombine.high %v6323_v61, %v6327_v62  ;;  %v10080_v3 = vcombine.high %v6324_v63, %v6328_v0  ;;  %v6368_v51 = vld [vmem:[#allocation11 + $0xa28] sm:$0xff] }
 0x418   :  { %v10111_v54 = vcombine.low %v6356_v36, %v6360_v40 }
 0x41a   :  { %8459 = vmatpush1.bf16.msra.mxu0 %v10029_v58  ;;  %8588 = vmatpush1.bf16.msra.mxu1 %v10031_v9  ;;  %v6336_v58 = vld [vmem:[#allocation11 + $0x928] sm:$0xff]  ;;  %v10077_v9 = vcombine.low %v6323_v61, %v6327_v62 }
 0x41b   :  { %8460 = vmatprep.subr.bf16.mxu0 %v10038_v12  ;;  %8589 = vmatprep.subr.bf16.mxu1 %v10040_v14  ;;  %v10079_v12 = vcombine.low %v6324_v63, %v6328_v0  ;;  %v10086_v14 = vcombine.high %v6331_v8, %v6335_v4  ;;  %v10088_v16 = vcombine.high %v6332_v15, %v6336_v58  ;;  %v6376_v61 = vld [vmem:[#allocation11 + $0xa68] sm:$0xff] }
 0x41e   :  { %8461 = vmatpush1.bf16.msra.mxu0 %v10037_v18  ;;  %8590 = vmatpush1.bf16.msra.mxu1 %v10039_v19  ;;  %v6344_v18 = vld [vmem:[#allocation11 + $0x968] sm:$0xff]  ;;  %v10085_v19 = vcombine.low %v6331_v8, %v6335_v4 }
 0x41f   :  { %8462 = vmatprep.subr.bf16.mxu0 %v10046_v20  ;;  %8591 = vmatprep.subr.bf16.mxu1 %v10048_v21  ;;  %v10087_v20 = vcombine.low %v6332_v15, %v6336_v58  ;;  %v10094_v21 = vcombine.high %v6339_v17, %v6343_v5  ;;  %v10096_v37 = vcombine.high %v6340_v25, %v6344_v18  ;;  %v6384_v8 = vld [vmem:[#allocation11 + $0xaa8] sm:$0xff] }
 0x420   :  { %v10095_v30 = vcombine.low %v6340_v25, %v6344_v18  ;;  %v6392_v17 = vld [vmem:[#allocation11 + $0xae8] sm:$0xff] }
 0x422   :  { %8463 = vmatpush1.bf16.msra.mxu0 %v10045_v26  ;;  %8592 = vmatpush1.bf16.msra.mxu1 %v10047_v31  ;;  %v6352_v26 = vld [vmem:[#allocation11 + $0x9a8] sm:$0xff]  ;;  %v10102_v31 = vcombine.high %v6347_v22, %v6351_v13 }
 0x423   :  { %8475 = vmatprep.subr.bf16.mxu0 %v10054_v33  ;;  %8604 = vmatprep.subr.bf16.mxu1 %v10056_v34  ;;  %v10104_v33 = vcombine.high %v6348_v24, %v6352_v26  ;;  %v6355_v34 = vld [vmem:[#allocation11 + $0x9c0] sm:$0xff]  ;;  %v10103_v44 = vcombine.low %v6348_v24, %v6352_v26  ;;  %v6400_v22 = vld [vmem:[#allocation11 + $0xb28] sm:$0xff] }
 0x424   :  { %v10110_v45 = vcombine.high %v6355_v34, %v6359_v35  ;;  %v10109_v52 = vcombine.low %v6355_v34, %v6359_v35  ;;  %v6408_v34 = vld [vmem:[#allocation11 + $0xb68] sm:$0xff] }
 0x425   :  { %8465 = vmatmul.mubr.bf16.vlgmr.msra.gmra.mrb[16].mxu0 %v10991_v29  ;;  %8594 = vmatmul.mubr.bf16.vlgmr.msra.gmra.mrb[16].mxu1 %v10991_v29 }
 0x426   :  { %8476 = vmatpush1.bf16.msra.mxu0 %v10053_v47  ;;  %8605 = vmatpush1.bf16.msra.mxu1 %v10055_v48  ;;  %v10112_v47 = vcombine.high %v6356_v36, %v6360_v40  ;;  %v6363_v48 = vld [vmem:[#allocation11 + $0xa00] sm:$0xff] }
 0x427   :  { %8477 = vmatprep.subr.bf16.mxu0 %v10062_v49  ;;  %8606 = vmatprep.subr.bf16.mxu1 %v10064_v50  ;;  %v6367_v49 = vld [vmem:[#allocation11 + $0xa20] sm:$0xff]  ;;  %v6364_v50 = vld [vmem:[#allocation11 + $0xa08] sm:$0xff] }
 0x428   :  { %8507 = vmatprep.mubr.bf16.mxu0 %v10993_v53  ;;  %8636 = vmatprep.mubr.bf16.mxu1 %v10993_v53  ;;  %v10118_v55 = vcombine.high %v6363_v48, %v6367_v49  ;;  %v10117_v62 = vcombine.low %v6363_v48, %v6367_v49  ;;  %v10119_v63 = vcombine.low %v6364_v50, %v6368_v51  ;;  %v6416_v48 = vld [vmem:[#allocation11 + $0xba8] sm:$0xff] }
 0x42a   :  { %8478 = vmatpush1.bf16.msra.mxu0 %v10061_v46  ;;  %8607 = vmatpush1.bf16.msra.mxu1 %v10063_v57  ;;  %v10120_v46 = vcombine.high %v6364_v50, %v6368_v51  ;;  %v6371_v57 = vld [vmem:[#allocation11 + $0xa40] sm:$0xff] }
 0x42b   :  { %8479 = vmatprep.subr.bf16.mxu0 %v10070_v59  ;;  %8608 = vmatprep.subr.bf16.mxu1 %v10072_v60  ;;  %v6375_v59 = vld [vmem:[#allocation11 + $0xa60] sm:$0xff]  ;;  %v6372_v60 = vld [vmem:[#allocation11 + $0xa48] sm:$0xff] }
 0x42c   :  { %v10126_v0 = vcombine.high %v6371_v57, %v6375_v59  ;;  %v10125_v4 = vcombine.low %v6371_v57, %v6375_v59  ;;  %v10127_v15 = vcombine.low %v6372_v60, %v6376_v61  ;;  %v6424_v57 = vld [vmem:[#allocation11 + $0xbe8] sm:$0xff] }
 0x42e   :  { %8480 = vmatpush1.bf16.msra.mxu0 %v10069_v1  ;;  %8609 = vmatpush1.bf16.msra.mxu1 %v10071_v2  ;;  %v10128_v1 = vcombine.high %v6372_v60, %v6376_v61  ;;  %v6379_v2 = vld [vmem:[#allocation11 + $0xa80] sm:$0xff] }
 0x42f   :  { %8481 = vmatprep.subr.bf16.mxu0 %v10078_v56  ;;  %8610 = vmatprep.subr.bf16.mxu1 %v10080_v3  ;;  %v6383_v56 = vld [vmem:[#allocation11 + $0xaa0] sm:$0xff]  ;;  %v6380_v3 = vld [vmem:[#allocation11 + $0xa88] sm:$0xff] }
 0x430   :  { %v10134_v58 = vcombine.high %v6379_v2, %v6383_v56  ;;  %v10133_v5 = vcombine.low %v6379_v2, %v6383_v56  ;;  %v10135_v25 = vcombine.low %v6380_v3, %v6384_v8  ;;  %v6050_v2 = vld [vmem:[#allocation11 + $0x38] sm:$0xff] }
 0x432   :  { %8482 = vmatpush1.bf16.msra.mxu0 %v10077_v9  ;;  %8611 = vmatpush1.bf16.msra.mxu1 %v10079_v12  ;;  %v10136_v9 = vcombine.high %v6380_v3, %v6384_v8  ;;  %v6387_v12 = vld [vmem:[#allocation11 + $0xac0] sm:$0xff]  ;;  %v6035_v8 = vld [vmem:[#allocation7 + $0x50] sm:$0xff] }
 0x433   :  { %8483 = vmatprep.subr.bf16.mxu0 %v10086_v14  ;;  %8612 = vmatprep.subr.bf16.mxu1 %v10088_v16  ;;  %v6391_v14 = vld [vmem:[#allocation11 + $0xae0] sm:$0xff]  ;;  %v6388_v16 = vld [vmem:[#allocation11 + $0xac8] sm:$0xff] }
 0x434   :  { %v10142_v18 = vcombine.high %v6387_v12, %v6391_v14  ;;  %v10141_v13 = vcombine.low %v6387_v12, %v6391_v14  ;;  %v10143_v24 = vcombine.low %v6388_v16, %v6392_v17  ;;  %v6029_v3 = vld [vmem:[#allocation7 + $0x20] sm:$0xff]  ;;  %v6057_v12 = vld [vmem:[#allocation11 + $0x70] sm:$0xff] }
 0x435   :  { %v10999_v14 = vpack.c.bf16 %v6035_v8, %v6029_v3 }
 0x436   :  { %8484 = vmatpush1.bf16.msra.mxu0 %v10085_v19  ;;  %8613 = vmatpush1.bf16.msra.mxu1 %v10087_v20  ;;  %v10144_v19 = vcombine.high %v6388_v16, %v6392_v17  ;;  %v6395_v20 = vld [vmem:[#allocation11 + $0xb00] sm:$0xff]  ;;  %v6054_v16 = vld [vmem:[#allocation11 + $0x58] sm:$0xff] }
 0x437   :  { %8485 = vmatprep.subr.bf16.mxu0 %v10094_v21  ;;  %8614 = vmatprep.subr.bf16.mxu1 %v10096_v37  ;;  %v6399_v21 = vld [vmem:[#allocation11 + $0xb20] sm:$0xff]  ;;  %v6396_v37 = vld [vmem:[#allocation11 + $0xb08] sm:$0xff]  ;;  %v6058_v17 = vld [vmem:[#allocation11 + $0x78] sm:$0xff] }
 0x438   :  { %v10150_v26 = vcombine.high %v6395_v20, %v6399_v21  ;;  %v10149_v35 = vcombine.low %v6395_v20, %v6399_v21  ;;  %v10151_v36 = vcombine.low %v6396_v37, %v6400_v22  ;;  %v6061_v20 = vld [vmem:[#allocation11 + $0x90] sm:$0xff] }
 0x439   :  { %v6065_v21 = vld [vmem:[#allocation11 + $0xb0] sm:$0xff] }
 0x43a   :  { %8486 = vmatpush1.bf16.msra.mxu0 %v10093_v28  ;;  %8615 = vmatpush1.bf16.msra.mxu1 %v10095_v30  ;;  %v10152_v28 = vcombine.high %v6396_v37, %v6400_v22  ;;  %v6403_v30 = vld [vmem:[#allocation11 + $0xb40] sm:$0xff]  ;;  %v6062_v37 = vld [vmem:[#allocation11 + $0x98] sm:$0xff] }
 0x43b   :  { %8487 = vmatprep.subr.bf16.mxu0 %v10102_v31  ;;  %8616 = vmatprep.subr.bf16.mxu1 %v10104_v33  ;;  %v6407_v31 = vld [vmem:[#allocation11 + $0xb60] sm:$0xff]  ;;  %v6404_v33 = vld [vmem:[#allocation11 + $0xb48] sm:$0xff]  ;;  %v6066_v22 = vld [vmem:[#allocation11 + $0xb8] sm:$0xff] }
 0x43c   :  { %v10158_v40 = vcombine.high %v6403_v30, %v6407_v31  ;;  %v10157_v49 = vcombine.low %v6403_v30, %v6407_v31  ;;  %v10159_v50 = vcombine.low %v6404_v33, %v6408_v34  ;;  %v6069_v30 = vld [vmem:[#allocation11 + $0xd0] sm:$0xff] }
 0x43d   :  { %v6073_v31 = vld [vmem:[#allocation11 + $0xf0] sm:$0xff] }
 0x43e   :  { %8488 = vmatpush1.bf16.msra.mxu0 %v10101_v43  ;;  %8617 = vmatpush1.bf16.msra.mxu1 %v10103_v44  ;;  %v10160_v43 = vcombine.high %v6404_v33, %v6408_v34  ;;  %v6411_v44 = vld [vmem:[#allocation11 + $0xb80] sm:$0xff]  ;;  %v6070_v33 = vld [vmem:[#allocation11 + $0xd8] sm:$0xff] }
 0x43f   :  { %8489 = vmatprep.subr.bf16.mxu0 %v10110_v45  ;;  %8618 = vmatprep.subr.bf16.mxu1 %v10112_v47  ;;  %v6415_v45 = vld [vmem:[#allocation11 + $0xba0] sm:$0xff]  ;;  %v6412_v47 = vld [vmem:[#allocation11 + $0xb88] sm:$0xff]  ;;  %v6074_v34 = vld [vmem:[#allocation11 + $0xf8] sm:$0xff] }
 0x440   :  { %v10166_v51 = vcombine.high %v6411_v44, %v6415_v45  ;;  %v10165_v59 = vcombine.low %v6411_v44, %v6415_v45  ;;  %v10167_v60 = vcombine.low %v6412_v47, %v6416_v48  ;;  %v6077_v44 = vld [vmem:[#allocation11 + $0x110] sm:$0xff] }
 0x441   :  { %v6081_v45 = vld [vmem:[#allocation11 + $0x130] sm:$0xff] }
 0x442   :  { %8490 = vmatpush1.bf16.msra.mxu0 %v10109_v52  ;;  %8619 = vmatpush1.bf16.msra.mxu1 %v10111_v54  ;;  %v10168_v52 = vcombine.high %v6412_v47, %v6416_v48  ;;  %v6419_v54 = vld [vmem:[#allocation11 + $0xbc0] sm:$0xff]  ;;  %v6078_v47 = vld [vmem:[#allocation11 + $0x118] sm:$0xff] }
 0x443   :  { %8491 = vmatprep.subr.bf16.mxu0 %v10118_v55  ;;  %8620 = vmatprep.subr.bf16.mxu1 %v10120_v46  ;;  %v6423_v55 = vld [vmem:[#allocation11 + $0xbe0] sm:$0xff]  ;;  %v6420_v46 = vld [vmem:[#allocation11 + $0xbc8] sm:$0xff]  ;;  %v6082_v48 = vld [vmem:[#allocation11 + $0x138] sm:$0xff] }
 0x444   :  { %v10174_v61 = vcombine.high %v6419_v54, %v6423_v55  ;;  %v10173_v56 = vcombine.low %v6419_v54, %v6423_v55  ;;  %v6089_v54 = vld [vmem:[#allocation11 + $0x170] sm:$0xff]  ;;  %v6086_v55 = vld [vmem:[#allocation11 + $0x158] sm:$0xff] }
 0x446   :  { %8492 = vmatpush1.bf16.msra.mxu0 %v10117_v62  ;;  %8621 = vmatpush1.bf16.msra.mxu1 %v10119_v63  ;;  %v10176_v62 = vcombine.high %v6420_v46, %v6424_v57  ;;  %v6045_v63 = vld [vmem:[#allocation11 + $0x10] sm:$0xff] }
 0x447   :  { %8493 = vmatprep.subr.bf16.mxu0 %v10126_v0  ;;  %8622 = vmatprep.subr.bf16.mxu1 %v10128_v1  ;;  %v6049_v0 = vld [vmem:[#allocation11 + $0x30] sm:$0xff]  ;;  %v6046_v1 = vld [vmem:[#allocation11 + $0x18] sm:$0xff] }
 0x44a   :  { %8494 = vmatpush1.bf16.msra.mxu0 %v10125_v4  ;;  %8623 = vmatpush1.bf16.msra.mxu1 %v10127_v15  ;;  %v10175_v4 = vcombine.low %v6420_v46, %v6424_v57  ;;  %v9802_v15 = vcombine.high %v6045_v63, %v6049_v0  ;;  %v6090_v46 = vld [vmem:[#allocation11 + $0x178] sm:$0xff]  ;;  %v9833_v57 = vcombine.low %v6077_v44, %v6081_v45 }
 0x44b   :  { %8495 = vmatprep.subr.bf16.mxu0 %v10134_v58  ;;  %8624 = vmatprep.subr.bf16.mxu1 %v10136_v9  ;;  %v9804_v58 = vcombine.high %v6046_v1, %v6050_v2  ;;  %v6053_v9 = vld [vmem:[#allocation11 + $0x50] sm:$0xff] }
 0x44e   :  { %8496 = vmatpush1.bf16.msra.mxu0 %v10133_v5  ;;  %8625 = vmatpush1.bf16.msra.mxu1 %v10135_v25  ;;  %v9801_v5 = vcombine.low %v6045_v63, %v6049_v0  ;;  %v9803_v25 = vcombine.low %v6046_v1, %v6050_v2  ;;  %v6097_v63 = vld [vmem:[#allocation11 + $0x1b0] sm:$0xff]  ;;  %v10374_v0 = vld [vmem:[#allocation14] sm:$0xff]  ;;  %v6094_v2 = vld [vmem:[#allocation11 + $0x198] sm:$0xff] }
 0x44f   :  { %8497 = vmatprep.subr.bf16.mxu0 %v10142_v18  ;;  %8626 = vmatprep.subr.bf16.mxu1 %v10144_v19  ;;  %v9810_v18 = vcombine.high %v6053_v9, %v6057_v12  ;;  %v9812_v19 = vcombine.high %v6054_v16, %v6058_v17  ;;  %v3512_v1 = vrot.slane %v10374_v0, %v10950_v7 }
 0x450   :  { %v3520_v3 = vrot.slane %v10374_v0, %v10953_v10  ;;  %v3516_v8 = vrot.slane %v10374_v0, %v10956_v11 }
 0x452   :  { %8498 = vmatpush1.bf16.msra.mxu0 %v10141_v13  ;;  %8627 = vmatpush1.bf16.msra.mxu1 %v10143_v24  ;;  %v9809_v13 = vcombine.low %v6053_v9, %v6057_v12  ;;  %v9811_v24 = vcombine.low %v6054_v16, %v6058_v17  ;;  %v6101_v17 = vld [vmem:[#allocation11 + $0x1d0] sm:$0xff] }
 0x453   :  { %8499 = vmatprep.subr.bf16.mxu0 %v10150_v26  ;;  %8628 = vmatprep.subr.bf16.mxu1 %v10152_v28  ;;  %v9818_v26 = vcombine.high %v6061_v20, %v6065_v21  ;;  %v9820_v28 = vcombine.high %v6062_v37, %v6066_v22 }
 0x456   :  { %8500 = vmatpush1.bf16.msra.mxu0 %v10149_v35  ;;  %8629 = vmatpush1.bf16.msra.mxu1 %v10151_v36  ;;  %v9817_v35 = vcombine.low %v6061_v20, %v6065_v21  ;;  %v9819_v36 = vcombine.low %v6062_v37, %v6066_v22  ;;  %v6102_v20 = vld [vmem:[#allocation11 + $0x1d8] sm:$0xff] }
 0x457   :  { %8501 = vmatprep.subr.bf16.mxu0 %v10158_v40  ;;  %8630 = vmatprep.subr.bf16.mxu1 %v10160_v43  ;;  %v9826_v40 = vcombine.high %v6069_v30, %v6073_v31  ;;  %v9828_v43 = vcombine.high %v6070_v33, %v6074_v34  ;;  %v6106_v21 = vld [vmem:[#allocation11 + $0x1f8] sm:$0xff] }
 0x45a   :  { %8502 = vmatpush1.bf16.msra.mxu0 %v10157_v49  ;;  %8631 = vmatpush1.bf16.msra.mxu1 %v10159_v50  ;;  %v9825_v49 = vcombine.low %v6069_v30, %v6073_v31  ;;  %v9827_v50 = vcombine.low %v6070_v33, %v6074_v34 }
 0x45b   :  { %8503 = vmatprep.subr.bf16.mxu0 %v10166_v51  ;;  %8632 = vmatprep.subr.bf16.mxu1 %v10168_v52  ;;  %v9834_v51 = vcombine.high %v6077_v44, %v6081_v45  ;;  %v6085_v52 = vld [vmem:[#allocation11 + $0x150] sm:$0xff]  ;;  %v9860_v45 = vcombine.high %v6102_v20, %v6106_v21 }
 0x45e   :  { %8504 = vmatpush1.bf16.msra.mxu0 %v10165_v59  ;;  %8633 = vmatpush1.bf16.msra.mxu1 %v10167_v60  ;;  %v9835_v59 = vcombine.low %v6078_v47, %v6082_v48  ;;  %v9842_v60 = vcombine.high %v6085_v52, %v6089_v54 }
 0x45f   :  { %8505 = vmatprep.subr.bf16.mxu0 %v10174_v61  ;;  %8634 = vmatprep.subr.bf16.mxu1 %v10176_v62  ;;  %v9844_v61 = vcombine.high %v6086_v55, %v6090_v46  ;;  %v6093_v62 = vld [vmem:[#allocation11 + $0x190] sm:$0xff] }
 0x460   :  { %v9850_v9 = vcombine.high %v6093_v62, %v6097_v63 }
 0x462   :  { %8506 = vmatpush1.bf16.msra.mxu0 %v10173_v56  ;;  %8635 = vmatpush1.bf16.msra.mxu1 %v10175_v4  ;;  %v6098_v56 = vld [vmem:[#allocation11 + $0x1b8] sm:$0xff]  ;;  %v9841_v4 = vcombine.low %v6085_v52, %v6089_v54 }
 0x463   :  { %8647 = vmatprep.subr.bf16.mxu0 %v9802_v15  ;;  %8776 = vmatprep.subr.bf16.mxu1 %v9804_v58  ;;  %v3524_v15 = vrot.slane %v10374_v0, %v10959_v27  ;;  %v9843_v58 = vcombine.low %v6086_v55, %v6090_v46  ;;  %v9852_v16 = vcombine.high %v6094_v2, %v6098_v56 }
 0x464   :  { %v9859_v46 = vcombine.low %v6102_v20, %v6106_v21 }
 0x465   :  { %8508 = vmatmul.mubr.bf16.vlgmr.msra.gmra.mrb[16].mxu0 %v10999_v14  ;;  %8637 = vmatmul.mubr.bf16.vlgmr.msra.gmra.mrb[16].mxu1 %v10999_v14 }
 0x466   :  { %8648 = vmatpush1.bf16.msra.mxu0 %v9801_v5  ;;  %8777 = vmatpush1.bf16.msra.mxu1 %v9803_v25  ;;  %v6105_v5 = vld [vmem:[#allocation11 + $0x1f0] sm:$0xff] }
 0x467   :  { %8649 = vmatprep.subr.bf16.mxu0 %v9810_v18  ;;  %8778 = vmatprep.subr.bf16.mxu1 %v9812_v19  ;;  %v9857_v54 = vcombine.low %v6101_v17, %v6105_v5 }
 0x468   :  { %8679 = vmatprep.mubr.bf16.mxu0 %v10973_v23  ;;  %8808 = vmatprep.mubr.bf16.mxu1 %v10973_v23  ;;  %v9836_v23 = vcombine.high %v6078_v47, %v6082_v48  ;;  %v6109_v47 = vld [vmem:[#allocation11 + $0x210] sm:$0xff] }
 0x469   :  { %v6113_v48 = vld [vmem:[#allocation11 + $0x230] sm:$0xff] }
 0x46a   :  { %8650 = vmatpush1.bf16.msra.mxu0 %v9809_v13  ;;  %8779 = vmatpush1.bf16.msra.mxu1 %v9811_v24  ;;  %v9865_v0 = vcombine.low %v6109_v47, %v6113_v48 }
 0x46b   :  { %8651 = vmatprep.subr.bf16.mxu0 %v9818_v26  ;;  %8780 = vmatprep.subr.bf16.mxu1 %v9820_v28  ;;  %v9849_v26 = vcombine.low %v6093_v62, %v6097_v63  ;;  %v9851_v28 = vcombine.low %v6094_v2, %v6098_v56  ;;  %v6118_v62 = vld [vmem:[#allocation11 + $0x258] sm:$0xff] }
 0x46c   :  { %v6122_v63 = vld [vmem:[#allocation11 + $0x278] sm:$0xff] }
 0x46d   :  { %v9876_v56 = vcombine.high %v6118_v62, %v6122_v63 }
 0x46e   :  { %8652 = vmatpush1.bf16.msra.mxu0 %v9817_v35  ;;  %8781 = vmatpush1.bf16.msra.mxu1 %v9819_v36  ;;  %v9858_v35 = vcombine.high %v6101_v17, %v6105_v5  ;;  %v6133_v17 = vld [vmem:[#allocation11 + $0x2d0] sm:$0xff] }
 0x46f   :  { %8653 = vmatprep.subr.bf16.mxu0 %v9826_v40  ;;  %8782 = vmatprep.subr.bf16.mxu1 %v9828_v43  ;;  %v6137_v5 = vld [vmem:[#allocation11 + $0x2f0] sm:$0xff] }
 0x470   :  { %v9890_v21 = vcombine.high %v6133_v17, %v6137_v5 }
 0x472   :  { %8654 = vmatpush1.bf16.msra.mxu0 %v9825_v49  ;;  %8783 = vmatpush1.bf16.msra.mxu1 %v9827_v50 }
 0x473   :  { %8655 = vmatprep.subr.bf16.mxu0 %v9834_v51  ;;  %8784 = vmatprep.subr.bf16.mxu1 %v9836_v23  ;;  %v6110_v51 = vld [vmem:[#allocation11 + $0x218] sm:$0xff] }
 0x474   :  { %v6114_v23 = vld [vmem:[#allocation11 + $0x238] sm:$0xff] }
 0x476   :  { %8656 = vmatpush1.bf16.msra.mxu0 %v9833_v57  ;;  %8785 = vmatpush1.bf16.msra.mxu1 %v9835_v59  ;;  %v9866_v57 = vcombine.high %v6109_v47, %v6113_v48  ;;  %v9868_v59 = vcombine.high %v6110_v51, %v6114_v23  ;;  %v6157_v48 = vld [vmem:[#allocation11 + $0x390] sm:$0xff] }
 0x477   :  { %8657 = vmatprep.subr.bf16.mxu0 %v9842_v60  ;;  %8786 = vmatprep.subr.bf16.mxu1 %v9844_v61  ;;  %v6117_v60 = vld [vmem:[#allocation11 + $0x250] sm:$0xff] }
 0x478   :  { %v5831_v12 = vpop.f32.mrb[12].mxu0  ;;  %v5960_v18 = vpop.f32.mrb[12].mxu1  ;;  %v6121_v61 = vld [vmem:[#allocation11 + $0x270] sm:$0xff] }
 0x479   :  { %v10237_v25 = vadd.f32 %v5831_v12, %v3512_v1  ;;  %v5833_v19 = vpop.f32.mrb[13].mxu0  ;;  %v10241_v37 = vadd.f32 %v5960_v18, %v3520_v3  ;;  %v5962_v13 = vpop.f32.mrb[13].mxu1  ;;  %v9874_v2 = vcombine.high %v6117_v60, %v6121_v61  ;;  %v6138_v18 = vld [vmem:[#allocation11 + $0x2f8] sm:$0xff] }
 0x47a   :  { %v10238_v22 = vadd.f32 %v5833_v19, %v3516_v8  ;;  %v5835_v24 = vpop.f32.mrb[14].mxu0  ;;  %8658 = vmatpush1.bf16.msra.mxu0 %v9841_v4  ;;  %v10242_v30 = vadd.f32 %v5962_v13, %v3524_v15  ;;  %v5964_v33 = vpop.f32.mrb[14].mxu1  ;;  %8787 = vmatpush1.bf16.msra.mxu1 %v9843_v58  ;;  %v6126_v4 = vld [vmem:[#allocation11 + $0x298] sm:$0xff]  ;;  %v9873_v58 = vcombine.low %v6117_v60, %v6121_v61  ;;  %v6145_v13 = vld [vmem:[#allocation11 + $0x330] sm:$0xff] }
 0x47b   :  { %v10239_v31 = vadd.f32 %v5835_v24, %v3512_v1  ;;  %v5837_v34 = vpop.f32.mrb[15].mxu0  ;;  %8659 = vmatprep.subr.bf16.mxu0 %v9850_v9  ;;  %v10243_v40 = vadd.f32 %v5964_v33, %v3520_v3  ;;  %v5966_v44 = vpop.f32.mrb[15].mxu1  ;;  %8788 = vmatprep.subr.bf16.mxu1 %v9852_v16  ;;  %v9867_v1 = vcombine.low %v6110_v51, %v6114_v23  ;;  %v6125_v3 = vld [vmem:[#allocation11 + $0x290] sm:$0xff]  ;;  %v6142_v24 = vld [vmem:[#allocation11 + $0x318] sm:$0xff] }
 0x47c   :  { %v10199_v36 = vpack.c.bf16 %v10238_v22, %v10237_v25  ;;  %v10240_v43 = vadd.f32 %v5837_v34, %v3516_v8  ;;  %v10200_v49 = vpack.c.bf16 %v10242_v30, %v10241_v37  ;;  %v10244_v50 = vadd.f32 %v5966_v44, %v3524_v15  ;;  %v6129_v8 = vld [vmem:[#allocation11 + $0x2b0] sm:$0xff]  ;;  %v6130_v15 = vld [vmem:[#allocation11 + $0x2b8] sm:$0xff] }
 0x47d   :  { %v9875_v9 = vcombine.low %v6118_v62, %v6122_v63  ;;  %v9882_v12 = vcombine.high %v6125_v3, %v6129_v8  ;;  %v9884_v16 = vcombine.high %v6126_v4, %v6130_v15  ;;  %v6134_v25 = vld [vmem:[#allocation11 + $0x2d8] sm:$0xff]  ;;  %v9881_v19 = vcombine.low %v6125_v3, %v6129_v8  ;;  %v6141_v22 = vld [vmem:[#allocation11 + $0x310] sm:$0xff] }
 0x47e   :  { %6019 = vst [vmem:[#allocation18 + $0x10] sm:$0xff] %v10199_v36  ;;  %v10203_v52 = vpack.c.bf16 %v10240_v43, %v10239_v31  ;;  %8660 = vmatpush1.bf16.msra.mxu0 %v9849_v26  ;;  %6020 = vst [vmem:[#allocation18 + $0x18] sm:$0xff] %v10200_v49  ;;  %v10204_v55 = vpack.c.bf16 %v10244_v50, %v10243_v40  ;;  %8789 = vmatpush1.bf16.msra.mxu1 %v9851_v28  ;;  %v6146_v26 = vld [vmem:[#allocation11 + $0x338] sm:$0xff]  ;;  %v6149_v34 = vld [vmem:[#allocation11 + $0x350] sm:$0xff] }
 0x47f   :  { %8661 = vmatprep.subr.bf16.mxu0 %v9858_v35  ;;  %8790 = vmatprep.subr.bf16.mxu1 %v9860_v45  ;;  %v9883_v20 = vcombine.low %v6126_v4, %v6130_v15  ;;  %v9892_v37 = vcombine.high %v6134_v25, %v6138_v18  ;;  %v9889_v28 = vcombine.low %v6133_v17, %v6137_v5  ;;  %v6153_v35 = vld [vmem:[#allocation11 + $0x370] sm:$0xff]  ;;  %v6150_v36 = vld [vmem:[#allocation11 + $0x358] sm:$0xff] }
 0x480   :  { %6023 = vst [vmem:[#allocation18 + $0x30] sm:$0xff] %v10203_v52  ;;  %6024 = vst [vmem:[#allocation18 + $0x38] sm:$0xff] %v10204_v55  ;;  %v9891_v30 = vcombine.low %v6134_v25, %v6138_v18  ;;  %v9898_v31 = vcombine.high %v6141_v22, %v6145_v13  ;;  %v9900_v33 = vcombine.high %v6142_v24, %v6146_v26  ;;  %v6154_v40 = vld [vmem:[#allocation11 + $0x378] sm:$0xff]  ;;  %v6161_v49 = vld [vmem:[#allocation11 + $0x3b0] sm:$0xff] }
 0x481   :  { %v9897_v43 = vcombine.low %v6141_v22, %v6145_v13  ;;  %v9899_v44 = vcombine.low %v6142_v24, %v6146_v26  ;;  %v9906_v45 = vcombine.high %v6149_v34, %v6153_v35  ;;  %v9908_v47 = vcombine.high %v6150_v36, %v6154_v40  ;;  %v6158_v50 = vld [vmem:[#allocation11 + $0x398] sm:$0xff] }
 0x482   :  { %8662 = vmatpush1.bf16.msra.mxu0 %v9857_v54  ;;  %8791 = vmatpush1.bf16.msra.mxu1 %v9859_v46  ;;  %v6162_v51 = vld [vmem:[#allocation11 + $0x3b8] sm:$0xff]  ;;  %v9905_v23 = vcombine.low %v6149_v34, %v6153_v35  ;;  %v9907_v52 = vcombine.low %v6150_v36, %v6154_v40  ;;  %v9914_v54 = vcombine.high %v6157_v48, %v6161_v49  ;;  %v6165_v46 = vld [vmem:[#allocation11 + $0x3d0] sm:$0xff] }
 0x483   :  { %8663 = vmatprep.subr.bf16.mxu0 %v9866_v57  ;;  %8792 = vmatprep.subr.bf16.mxu1 %v9868_v59  ;;  %v9916_v55 = vcombine.high %v6158_v50, %v6162_v51  ;;  %v6169_v57 = vld [vmem:[#allocation11 + $0x3f0] sm:$0xff]  ;;  %v6166_v59 = vld [vmem:[#allocation11 + $0x3d8] sm:$0xff]  ;;  %v9913_v61 = vcombine.low %v6157_v48, %v6161_v49  ;;  %v9915_v62 = vcombine.low %v6158_v50, %v6162_v51 }
 0x484   :  { %v6170_v60 = vld [vmem:[#allocation11 + $0x3f8] sm:$0xff]  ;;  %v9922_v63 = vcombine.high %v6165_v46, %v6169_v57  ;;  %v9921_v8 = vcombine.low %v6165_v46, %v6169_v57  ;;  %v6213_v51 = vld [vmem:[#allocation11 + $0x550] sm:$0xff] }
 0x485   :  { %v6178_v3 = vld [vmem:[#allocation11 + $0x438] sm:$0xff]  ;;  %v9923_v4 = vcombine.low %v6166_v59, %v6170_v60 }
 0x486   :  { %8664 = vmatpush1.bf16.msra.mxu0 %v9865_v0  ;;  %8793 = vmatpush1.bf16.msra.mxu1 %v9867_v1  ;;  %v9924_v0 = vcombine.high %v6166_v59, %v6170_v60  ;;  %v6173_v1 = vld [vmem:[#allocation11 + $0x410] sm:$0xff]  ;;  %v6186_v17 = vld [vmem:[#allocation11 + $0x478] sm:$0xff] }
 0x487   :  { %8665 = vmatprep.subr.bf16.mxu0 %v9874_v2  ;;  %8794 = vmatprep.subr.bf16.mxu1 %v9876_v56  ;;  %v6177_v2 = vld [vmem:[#allocation11 + $0x430] sm:$0xff]  ;;  %v6174_v56 = vld [vmem:[#allocation11 + $0x418] sm:$0xff] }
 0x488   :  { %v9930_v15 = vcombine.high %v6173_v1, %v6177_v2  ;;  %v9929_v5 = vcombine.low %v6173_v1, %v6177_v2  ;;  %v9931_v25 = vcombine.low %v6174_v56, %v6178_v3  ;;  %v6194_v22 = vld [vmem:[#allocation11 + $0x4b8] sm:$0xff]  ;;  %v6221_v60 = vld [vmem:[#allocation11 + $0x590] sm:$0xff] }
 0x489   :  { %v6202_v34 = vld [vmem:[#allocation11 + $0x4f8] sm:$0xff] }
 0x48a   :  { %8666 = vmatpush1.bf16.msra.mxu0 %v9873_v58  ;;  %8795 = vmatpush1.bf16.msra.mxu1 %v9875_v9  ;;  %v9932_v58 = vcombine.high %v6174_v56, %v6178_v3  ;;  %v6181_v9 = vld [vmem:[#allocation11 + $0x450] sm:$0xff] }
 0x48b   :  { %8667 = vmatprep.subr.bf16.mxu0 %v9882_v12  ;;  %8796 = vmatprep.subr.bf16.mxu1 %v9884_v16  ;;  %v6185_v12 = vld [vmem:[#allocation11 + $0x470] sm:$0xff]  ;;  %v6182_v16 = vld [vmem:[#allocation11 + $0x458] sm:$0xff] }
 0x48c   :  { %v9938_v18 = vcombine.high %v6181_v9, %v6185_v12  ;;  %v9937_v13 = vcombine.low %v6181_v9, %v6185_v12  ;;  %v9939_v24 = vcombine.low %v6182_v16, %v6186_v17  ;;  %v6229_v3 = vld [vmem:[#allocation11 + $0x5d0] sm:$0xff] }
 0x48e   :  { %8668 = vmatpush1.bf16.msra.mxu0 %v9881_v19  ;;  %8797 = vmatpush1.bf16.msra.mxu1 %v9883_v20  ;;  %v9940_v19 = vcombine.high %v6182_v16, %v6186_v17  ;;  %v6189_v20 = vld [vmem:[#allocation11 + $0x490] sm:$0xff] }
 0x48f   :  { %8669 = vmatprep.subr.bf16.mxu0 %v9890_v21  ;;  %8798 = vmatprep.subr.bf16.mxu1 %v9892_v37  ;;  %v6193_v21 = vld [vmem:[#allocation11 + $0x4b0] sm:$0xff]  ;;  %v6190_v37 = vld [vmem:[#allocation11 + $0x498] sm:$0xff] }
 0x490   :  { %v9946_v26 = vcombine.high %v6189_v20, %v6193_v21  ;;  %v9945_v35 = vcombine.low %v6189_v20, %v6193_v21  ;;  %v6237_v17 = vld [vmem:[#allocation11 + $0x610] sm:$0xff] }
 0x492   :  { %8670 = vmatpush1.bf16.msra.mxu0 %v9889_v28  ;;  %8799 = vmatpush1.bf16.msra.mxu1 %v9891_v30  ;;  %v9948_v28 = vcombine.high %v6190_v37, %v6194_v22  ;;  %v6197_v30 = vld [vmem:[#allocation11 + $0x4d0] sm:$0xff] }
 0x493   :  { %8671 = vmatprep.subr.bf16.mxu0 %v9898_v31  ;;  %8800 = vmatprep.subr.bf16.mxu1 %v9900_v33  ;;  %v6201_v31 = vld [vmem:[#allocation11 + $0x4f0] sm:$0xff]  ;;  %v6198_v33 = vld [vmem:[#allocation11 + $0x4d8] sm:$0xff] }
 0x494   :  { %v9954_v36 = vcombine.high %v6197_v30, %v6201_v31  ;;  %v9956_v40 = vcombine.high %v6198_v33, %v6202_v34  ;;  %v9953_v48 = vcombine.low %v6197_v30, %v6201_v31  ;;  %v9955_v49 = vcombine.low %v6198_v33, %v6202_v34  ;;  %v6253_v34 = vld [vmem:[#allocation11 + $0x690] sm:$0xff] }
 0x496   :  { %8672 = vmatpush1.bf16.msra.mxu0 %v9897_v43  ;;  %8801 = vmatpush1.bf16.msra.mxu1 %v9899_v44  ;;  %v6205_v43 = vld [vmem:[#allocation11 + $0x510] sm:$0xff] }
 0x497   :  { %8673 = vmatprep.subr.bf16.mxu0 %v9906_v45  ;;  %8802 = vmatprep.subr.bf16.mxu1 %v9908_v47  ;;  %v6209_v44 = vld [vmem:[#allocation11 + $0x530] sm:$0xff]  ;;  %v6206_v45 = vld [vmem:[#allocation11 + $0x518] sm:$0xff] }
 0x498   :  { %v6210_v47 = vld [vmem:[#allocation11 + $0x538] sm:$0xff]  ;;  %v9962_v50 = vcombine.high %v6205_v43, %v6209_v44 }
 0x499   :  { %v9963_v46 = vcombine.low %v6206_v45, %v6210_v47 }
 0x49a   :  { %8674 = vmatpush1.bf16.msra.mxu0 %v9905_v23  ;;  %8803 = vmatpush1.bf16.msra.mxu1 %v9907_v52  ;;  %v6217_v23 = vld [vmem:[#allocation11 + $0x570] sm:$0xff]  ;;  %v6214_v52 = vld [vmem:[#allocation11 + $0x558] sm:$0xff] }
 0x49b   :  { %8675 = vmatprep.subr.bf16.mxu0 %v9914_v54  ;;  %8804 = vmatprep.subr.bf16.mxu1 %v9916_v55  ;;  %v6218_v54 = vld [vmem:[#allocation11 + $0x578] sm:$0xff]  ;;  %v9961_v55 = vcombine.low %v6205_v43, %v6209_v44  ;;  %v9970_v57 = vcombine.high %v6213_v51, %v6217_v23 }
 0x49c   :  { %v9972_v59 = vcombine.high %v6214_v52, %v6218_v54  ;;  %v9971_v1 = vcombine.low %v6214_v52, %v6218_v54  ;;  %v6269_v54 = vld [vmem:[#allocation11 + $0x710] sm:$0xff] }
 0x49e   :  { %8676 = vmatpush1.bf16.msra.mxu0 %v9913_v61  ;;  %8805 = vmatpush1.bf16.msra.mxu1 %v9915_v62  ;;  %v6225_v61 = vld [vmem:[#allocation11 + $0x5b0] sm:$0xff]  ;;  %v6222_v62 = vld [vmem:[#allocation11 + $0x598] sm:$0xff] }
 0x49f   :  { %8677 = vmatprep.subr.bf16.mxu0 %v9922_v63  ;;  %8806 = vmatprep.subr.bf16.mxu1 %v9924_v0  ;;  %v6226_v63 = vld [vmem:[#allocation11 + $0x5b8] sm:$0xff]  ;;  %v9969_v0 = vcombine.low %v6213_v51, %v6217_v23  ;;  %v9978_v2 = vcombine.high %v6221_v60, %v6225_v61 }
 0x4a0   :  { %v9980_v56 = vcombine.high %v6222_v62, %v6226_v63  ;;  %v9979_v9 = vcombine.low %v6222_v62, %v6226_v63  ;;  %v6277_v63 = vld [vmem:[#allocation11 + $0x750] sm:$0xff] }
 0x4a2   :  { %8678 = vmatpush1.bf16.msra.mxu0 %v9921_v8  ;;  %8807 = vmatpush1.bf16.msra.mxu1 %v9923_v4  ;;  %v6233_v8 = vld [vmem:[#allocation11 + $0x5f0] sm:$0xff]  ;;  %v6230_v4 = vld [vmem:[#allocation11 + $0x5d8] sm:$0xff] }
 0x4a3   :  { %8690 = vmatprep.subr.bf16.mxu0 %v9930_v15  ;;  %8819 = vmatprep.subr.bf16.mxu1 %v9932_v58  ;;  %v6234_v15 = vld [vmem:[#allocation11 + $0x5f8] sm:$0xff]  ;;  %v9977_v58 = vcombine.low %v6221_v60, %v6225_v61  ;;  %v9986_v12 = vcombine.high %v6229_v3, %v6233_v8 }
 0x4a4   :  { %v9988_v16 = vcombine.high %v6230_v4, %v6234_v15  ;;  %v9987_v20 = vcombine.low %v6230_v4, %v6234_v15  ;;  %v6285_v15 = vld [vmem:[#allocation11 + $0x790] sm:$0xff] }
 0x4a5   :  { %8680 = vmatmul.mubr.bf16.vlgmr.msra.gmra.mrb[20].mxu0 %v10983_v6  ;;  %8809 = vmatmul.mubr.bf16.vlgmr.msra.gmra.mrb[20].mxu1 %v10983_v6  ;;  %v9947_v6 = vcombine.low %v6190_v37, %v6194_v22  ;;  %v6245_v22 = vld [vmem:[#allocation11 + $0x650] sm:$0xff] }
 0x4a6   :  { %8691 = vmatpush1.bf16.msra.mxu0 %v9929_v5  ;;  %8820 = vmatpush1.bf16.msra.mxu1 %v9931_v25  ;;  %v6241_v5 = vld [vmem:[#allocation11 + $0x630] sm:$0xff]  ;;  %v6238_v25 = vld [vmem:[#allocation11 + $0x618] sm:$0xff] }
 0x4a7   :  { %8692 = vmatprep.subr.bf16.mxu0 %v9938_v18  ;;  %8821 = vmatprep.subr.bf16.mxu1 %v9940_v19  ;;  %v6242_v18 = vld [vmem:[#allocation11 + $0x638] sm:$0xff]  ;;  %v9985_v19 = vcombine.low %v6229_v3, %v6233_v8  ;;  %v9994_v21 = vcombine.high %v6237_v17, %v6241_v5 }
 0x4a8   :  { %8722 = vmatprep.mubr.bf16.mxu0 %v10985_v42  ;;  %8851 = vmatprep.mubr.bf16.mxu1 %v10985_v42  ;;  %v9964_v42 = vcombine.high %v6206_v45, %v6210_v47  ;;  %v9996_v37 = vcombine.high %v6238_v25, %v6242_v18  ;;  %v9995_v30 = vcombine.low %v6238_v25, %v6242_v18  ;;  %v6261_v47 = vld [vmem:[#allocation11 + $0x6d0] sm:$0xff] }
 0x4a9   :  { %v6293_v18 = vld [vmem:[#allocation11 + $0x7d0] sm:$0xff] }
 0x4aa   :  { %8693 = vmatpush1.bf16.msra.mxu0 %v9937_v13  ;;  %8822 = vmatpush1.bf16.msra.mxu1 %v9939_v24  ;;  %v6249_v13 = vld [vmem:[#allocation11 + $0x670] sm:$0xff]  ;;  %v6246_v24 = vld [vmem:[#allocation11 + $0x658] sm:$0xff] }
 0x4ab   :  { %8694 = vmatprep.subr.bf16.mxu0 %v9946_v26  ;;  %8823 = vmatprep.subr.bf16.mxu1 %v9948_v28  ;;  %v6250_v26 = vld [vmem:[#allocation11 + $0x678] sm:$0xff]  ;;  %v9993_v28 = vcombine.low %v6237_v17, %v6241_v5  ;;  %v10002_v31 = vcombine.high %v6245_v22, %v6249_v13 }
 0x4ac   :  { %v10004_v33 = vcombine.high %v6246_v24, %v6250_v26  ;;  %v10003_v43 = vcombine.low %v6246_v24, %v6250_v26  ;;  %v6301_v26 = vld [vmem:[#allocation11 + $0x810] sm:$0xff] }
 0x4ae   :  { %8695 = vmatpush1.bf16.msra.mxu0 %v9945_v35  ;;  %8824 = vmatpush1.bf16.msra.mxu1 %v9947_v6  ;;  %v6257_v35 = vld [vmem:[#allocation11 + $0x6b0] sm:$0xff]  ;;  %v6254_v6 = vld [vmem:[#allocation11 + $0x698] sm:$0xff] }
 0x4af   :  { %8696 = vmatprep.subr.bf16.mxu0 %v9954_v36  ;;  %8825 = vmatprep.subr.bf16.mxu1 %v9956_v40  ;;  %v6258_v36 = vld [vmem:[#allocation11 + $0x6b8] sm:$0xff]  ;;  %v10001_v40 = vcombine.low %v6245_v22, %v6249_v13  ;;  %v10010_v44 = vcombine.high %v6253_v34, %v6257_v35 }
 0x4b0   :  { %v10012_v45 = vcombine.high %v6254_v6, %v6258_v36  ;;  %v10011_v51 = vcombine.low %v6254_v6, %v6258_v36  ;;  %v6309_v36 = vld [vmem:[#allocation11 + $0x850] sm:$0xff] }
 0x4b2   :  { %8697 = vmatpush1.bf16.msra.mxu0 %v9953_v48  ;;  %8826 = vmatpush1.bf16.msra.mxu1 %v9955_v49  ;;  %v6265_v48 = vld [vmem:[#allocation11 + $0x6f0] sm:$0xff]  ;;  %v6262_v49 = vld [vmem:[#allocation11 + $0x6d8] sm:$0xff] }
 0x4b3   :  { %8698 = vmatprep.subr.bf16.mxu0 %v9962_v50  ;;  %8827 = vmatprep.subr.bf16.mxu1 %v9964_v42  ;;  %v6266_v50 = vld [vmem:[#allocation11 + $0x6f8] sm:$0xff]  ;;  %v10009_v42 = vcombine.low %v6253_v34, %v6257_v35  ;;  %v10018_v23 = vcombine.high %v6261_v47, %v6265_v48 }
 0x4b4   :  { %v10020_v52 = vcombine.high %v6262_v49, %v6266_v50  ;;  %v10019_v60 = vcombine.low %v6262_v49, %v6266_v50  ;;  %v6317_v50 = vld [vmem:[#allocation11 + $0x890] sm:$0xff] }
 0x4b6   :  { %8699 = vmatpush1.bf16.msra.mxu0 %v9961_v55  ;;  %8828 = vmatpush1.bf16.msra.mxu1 %v9963_v46  ;;  %v6273_v55 = vld [vmem:[#allocation11 + $0x730] sm:$0xff]  ;;  %v6270_v46 = vld [vmem:[#allocation11 + $0x718] sm:$0xff] }
 0x4b7   :  { %8700 = vmatprep.subr.bf16.mxu0 %v9970_v57  ;;  %8829 = vmatprep.subr.bf16.mxu1 %v9972_v59  ;;  %v6274_v57 = vld [vmem:[#allocation11 + $0x738] sm:$0xff]  ;;  %v10017_v59 = vcombine.low %v6261_v47, %v6265_v48  ;;  %v10026_v61 = vcombine.high %v6269_v54, %v6273_v55 }
 0x4b8   :  { %v10028_v62 = vcombine.high %v6270_v46, %v6274_v57  ;;  %v10027_v3 = vcombine.low %v6270_v46, %v6274_v57  ;;  %v6325_v57 = vld [vmem:[#allocation11 + $0x8d0] sm:$0xff] }
 0x4ba   :  { %8701 = vmatpush1.bf16.msra.mxu0 %v9969_v0  ;;  %8830 = vmatpush1.bf16.msra.mxu1 %v9971_v1  ;;  %v6281_v0 = vld [vmem:[#allocation11 + $0x770] sm:$0xff]  ;;  %v6278_v1 = vld [vmem:[#allocation11 + $0x758] sm:$0xff] }
 0x4bb   :  { %8702 = vmatprep.subr.bf16.mxu0 %v9978_v2  ;;  %8831 = vmatprep.subr.bf16.mxu1 %v9980_v56  ;;  %v6282_v2 = vld [vmem:[#allocation11 + $0x778] sm:$0xff]  ;;  %v10025_v56 = vcombine.low %v6269_v54, %v6273_v55  ;;  %v10034_v8 = vcombine.high %v6277_v63, %v6281_v0 }
 0x4bc   :  { %v10036_v4 = vcombine.high %v6278_v1, %v6282_v2  ;;  %v10035_v17 = vcombine.low %v6278_v1, %v6282_v2  ;;  %v6333_v1 = vld [vmem:[#allocation11 + $0x910] sm:$0xff] }
 0x4bd   :  { %v6337_v2 = vld [vmem:[#allocation11 + $0x930] sm:$0xff] }
 0x4be   :  { %8703 = vmatpush1.bf16.msra.mxu0 %v9977_v58  ;;  %8832 = vmatpush1.bf16.msra.mxu1 %v9979_v9  ;;  %v6289_v58 = vld [vmem:[#allocation11 + $0x7b0] sm:$0xff]  ;;  %v6286_v9 = vld [vmem:[#allocation11 + $0x798] sm:$0xff] }
 0x4bf   :  { %8704 = vmatprep.subr.bf16.mxu0 %v9986_v12  ;;  %8833 = vmatprep.subr.bf16.mxu1 %v9988_v16  ;;  %v6290_v12 = vld [vmem:[#allocation11 + $0x7b8] sm:$0xff]  ;;  %v10033_v16 = vcombine.low %v6277_v63, %v6281_v0  ;;  %v10042_v5 = vcombine.high %v6285_v15, %v6289_v58 }
 0x4c0   :  { %v10044_v25 = vcombine.high %v6286_v9, %v6290_v12  ;;  %v10043_v22 = vcombine.low %v6286_v9, %v6290_v12  ;;  %v6345_v9 = vld [vmem:[#allocation11 + $0x970] sm:$0xff]  ;;  %v6342_v12 = vld [vmem:[#allocation11 + $0x958] sm:$0xff] }
 0x4c2   :  { %8705 = vmatpush1.bf16.msra.mxu0 %v9985_v19  ;;  %8834 = vmatpush1.bf16.msra.mxu1 %v9987_v20  ;;  %v6297_v19 = vld [vmem:[#allocation11 + $0x7f0] sm:$0xff]  ;;  %v6294_v20 = vld [vmem:[#allocation11 + $0x7d8] sm:$0xff] }
 0x4c3   :  { %8706 = vmatprep.subr.bf16.mxu0 %v9994_v21  ;;  %8835 = vmatprep.subr.bf16.mxu1 %v9996_v37  ;;  %v6298_v21 = vld [vmem:[#allocation11 + $0x7f8] sm:$0xff]  ;;  %v10041_v37 = vcombine.low %v6285_v15, %v6289_v58  ;;  %v10050_v13 = vcombine.high %v6293_v18, %v6297_v19  ;;  %v10090_v15 = vcombine.high %v6333_v1, %v6337_v2  ;;  %v6341_v58 = vld [vmem:[#allocation11 + $0x950] sm:$0xff] }
 0x4c4   :  { %v10052_v24 = vcombine.high %v6294_v20, %v6298_v21  ;;  %v10051_v34 = vcombine.low %v6294_v20, %v6298_v21  ;;  %v6353_v20 = vld [vmem:[#allocation11 + $0x9b0] sm:$0xff]  ;;  %v6350_v21 = vld [vmem:[#allocation11 + $0x998] sm:$0xff] }
 0x4c6   :  { %8707 = vmatpush1.bf16.msra.mxu0 %v9993_v28  ;;  %8836 = vmatpush1.bf16.msra.mxu1 %v9995_v30  ;;  %v6305_v28 = vld [vmem:[#allocation11 + $0x830] sm:$0xff]  ;;  %v6302_v30 = vld [vmem:[#allocation11 + $0x818] sm:$0xff] }
 0x4c7   :  { %8708 = vmatprep.subr.bf16.mxu0 %v10002_v31  ;;  %8837 = vmatprep.subr.bf16.mxu1 %v10004_v33  ;;  %v6306_v31 = vld [vmem:[#allocation11 + $0x838] sm:$0xff]  ;;  %v10049_v33 = vcombine.low %v6293_v18, %v6297_v19  ;;  %v10058_v35 = vcombine.high %v6301_v26, %v6305_v28  ;;  %v6349_v19 = vld [vmem:[#allocation11 + $0x990] sm:$0xff] }
 0x4c8   :  { %v10060_v6 = vcombine.high %v6302_v30, %v6306_v31  ;;  %v10059_v47 = vcombine.low %v6302_v30, %v6306_v31  ;;  %v6361_v30 = vld [vmem:[#allocation11 + $0x9f0] sm:$0xff]  ;;  %v6358_v31 = vld [vmem:[#allocation11 + $0x9d8] sm:$0xff] }
 0x4ca   :  { %8709 = vmatpush1.bf16.msra.mxu0 %v10001_v40  ;;  %8838 = vmatpush1.bf16.msra.mxu1 %v10003_v43  ;;  %v6313_v40 = vld [vmem:[#allocation11 + $0x870] sm:$0xff]  ;;  %v6310_v43 = vld [vmem:[#allocation11 + $0x858] sm:$0xff] }
 0x4cb   :  { %8710 = vmatprep.subr.bf16.mxu0 %v10010_v44  ;;  %8839 = vmatprep.subr.bf16.mxu1 %v10012_v45  ;;  %v6314_v44 = vld [vmem:[#allocation11 + $0x878] sm:$0xff]  ;;  %v10057_v45 = vcombine.low %v6301_v26, %v6305_v28  ;;  %v10066_v48 = vcombine.high %v6309_v36, %v6313_v40  ;;  %v6357_v28 = vld [vmem:[#allocation11 + $0x9d0] sm:$0xff] }
 0x4cc   :  { %v10068_v49 = vcombine.high %v6310_v43, %v6314_v44  ;;  %v10067_v54 = vcombine.low %v6310_v43, %v6314_v44  ;;  %v6369_v43 = vld [vmem:[#allocation11 + $0xa30] sm:$0xff]  ;;  %v6366_v44 = vld [vmem:[#allocation11 + $0xa18] sm:$0xff] }
 0x4ce   :  { %8711 = vmatpush1.bf16.msra.mxu0 %v10009_v42  ;;  %8840 = vmatpush1.bf16.msra.mxu1 %v10011_v51  ;;  %v6321_v42 = vld [vmem:[#allocation11 + $0x8b0] sm:$0xff]  ;;  %v6318_v51 = vld [vmem:[#allocation11 + $0x898] sm:$0xff] }
 0x4cf   :  { %8712 = vmatprep.subr.bf16.mxu0 %v10018_v23  ;;  %8841 = vmatprep.subr.bf16.mxu1 %v10020_v52  ;;  %v6322_v23 = vld [vmem:[#allocation11 + $0x8b8] sm:$0xff]  ;;  %v10065_v52 = vcombine.low %v6309_v36, %v6313_v40  ;;  %v10074_v55 = vcombine.high %v6317_v50, %v6321_v42  ;;  %v6365_v40 = vld [vmem:[#allocation11 + $0xa10] sm:$0xff] }
 0x4d0   :  { %v10076_v46 = vcombine.high %v6318_v51, %v6322_v23 }
 0x4d2   :  { %8713 = vmatpush1.bf16.msra.mxu0 %v10017_v59  ;;  %8842 = vmatpush1.bf16.msra.mxu1 %v10019_v60  ;;  %v6329_v59 = vld [vmem:[#allocation11 + $0x8f0] sm:$0xff]  ;;  %v6326_v60 = vld [vmem:[#allocation11 + $0x8d8] sm:$0xff] }
 0x4d3   :  { %8714 = vmatprep.subr.bf16.mxu0 %v10026_v61  ;;  %8843 = vmatprep.subr.bf16.mxu1 %v10028_v62  ;;  %v6330_v61 = vld [vmem:[#allocation11 + $0x8f8] sm:$0xff]  ;;  %v10073_v62 = vcombine.low %v6317_v50, %v6321_v42  ;;  %v10082_v63 = vcombine.high %v6325_v57, %v6329_v59  ;;  %v6373_v42 = vld [vmem:[#allocation11 + $0xa50] sm:$0xff] }
 0x4d4   :  { %v10084_v0 = vcombine.high %v6326_v60, %v6330_v61 }
 0x4d6   :  { %8715 = vmatpush1.bf16.msra.mxu0 %v10025_v56  ;;  %8844 = vmatpush1.bf16.msra.mxu1 %v10027_v3  ;;  %v6334_v56 = vld [vmem:[#allocation11 + $0x918] sm:$0xff] }
 0x4d7   :  { %8716 = vmatprep.subr.bf16.mxu0 %v10034_v8  ;;  %8845 = vmatprep.subr.bf16.mxu1 %v10036_v4  ;;  %v6338_v3 = vld [vmem:[#allocation11 + $0x938] sm:$0xff]  ;;  %v10081_v8 = vcombine.low %v6325_v57, %v6329_v59  ;;  %v10083_v4 = vcombine.low %v6326_v60, %v6330_v61  ;;  %v6381_v59 = vld [vmem:[#allocation11 + $0xa90] sm:$0xff] }
 0x4d8   :  { %v6385_v60 = vld [vmem:[#allocation11 + $0xab0] sm:$0xff]  ;;  %v6382_v61 = vld [vmem:[#allocation11 + $0xa98] sm:$0xff] }
 0x4da   :  { %8717 = vmatpush1.bf16.msra.mxu0 %v10033_v16  ;;  %8846 = vmatpush1.bf16.msra.mxu1 %v10035_v17  ;;  %v6346_v16 = vld [vmem:[#allocation11 + $0x978] sm:$0xff]  ;;  %v10089_v17 = vcombine.low %v6333_v1, %v6337_v2  ;;  %v6389_v2 = vld [vmem:[#allocation11 + $0xad0] sm:$0xff] }
 0x4db   :  { %8718 = vmatprep.subr.bf16.mxu0 %v10042_v5  ;;  %8847 = vmatprep.subr.bf16.mxu1 %v10044_v25  ;;  %v10091_v5 = vcombine.low %v6334_v56, %v6338_v3  ;;  %v10098_v25 = vcombine.high %v6341_v58, %v6345_v9  ;;  %v10100_v18 = vcombine.high %v6342_v12, %v6346_v16 }
 0x4de   :  { %8719 = vmatpush1.bf16.msra.mxu0 %v10041_v37  ;;  %8848 = vmatpush1.bf16.msra.mxu1 %v10043_v22  ;;  %v6354_v37 = vld [vmem:[#allocation11 + $0x9b8] sm:$0xff]  ;;  %v10097_v22 = vcombine.low %v6341_v58, %v6345_v9  ;;  %v6397_v9 = vld [vmem:[#allocation11 + $0xb10] sm:$0xff] }
 0x4df   :  { %8720 = vmatprep.subr.bf16.mxu0 %v10050_v13  ;;  %8849 = vmatprep.subr.bf16.mxu1 %v10052_v24  ;;  %v10099_v13 = vcombine.low %v6342_v12, %v6346_v16  ;;  %v10106_v24 = vcombine.high %v6349_v19, %v6353_v20  ;;  %v10108_v26 = vcombine.high %v6350_v21, %v6354_v37  ;;  %v6401_v12 = vld [vmem:[#allocation11 + $0xb30] sm:$0xff]  ;;  %v6398_v16 = vld [vmem:[#allocation11 + $0xb18] sm:$0xff] }
 0x4e2   :  { %8721 = vmatpush1.bf16.msra.mxu0 %v10049_v33  ;;  %8850 = vmatpush1.bf16.msra.mxu1 %v10051_v34  ;;  %v6362_v33 = vld [vmem:[#allocation11 + $0x9f8] sm:$0xff]  ;;  %v10105_v34 = vcombine.low %v6349_v19, %v6353_v20  ;;  %v6405_v20 = vld [vmem:[#allocation11 + $0xb50] sm:$0xff] }
 0x4e3   :  { %8733 = vmatprep.subr.bf16.mxu0 %v10058_v35  ;;  %8862 = vmatprep.subr.bf16.mxu1 %v10060_v6  ;;  %v10107_v35 = vcombine.low %v6350_v21, %v6354_v37  ;;  %v10114_v6 = vcombine.high %v6357_v28, %v6361_v30  ;;  %v10116_v36 = vcombine.high %v6358_v31, %v6362_v33  ;;  %v6409_v21 = vld [vmem:[#allocation11 + $0xb70] sm:$0xff]  ;;  %v6406_v37 = vld [vmem:[#allocation11 + $0xb58] sm:$0xff] }
 0x4e5   :  { %8723 = vmatmul.mubr.bf16.vlgmr.msra.gmra.mrb[20].mxu0 %v10991_v29  ;;  %8852 = vmatmul.mubr.bf16.vlgmr.msra.gmra.mrb[20].mxu1 %v10991_v29  ;;  %v10075_v29 = vcombine.low %v6318_v51, %v6322_v23  ;;  %v6377_v51 = vld [vmem:[#allocation11 + $0xa70] sm:$0xff]  ;;  %v6374_v23 = vld [vmem:[#allocation11 + $0xa58] sm:$0xff] }
 0x4e6   :  { %8734 = vmatpush1.bf16.msra.mxu0 %v10057_v45  ;;  %8863 = vmatpush1.bf16.msra.mxu1 %v10059_v47  ;;  %v6370_v45 = vld [vmem:[#allocation11 + $0xa38] sm:$0xff]  ;;  %v10113_v47 = vcombine.low %v6357_v28, %v6361_v30  ;;  %v6413_v30 = vld [vmem:[#allocation11 + $0xb90] sm:$0xff] }
 0x4e7   :  { %8735 = vmatprep.subr.bf16.mxu0 %v10066_v48  ;;  %8864 = vmatprep.subr.bf16.mxu1 %v10068_v49  ;;  %v10115_v48 = vcombine.low %v6358_v31, %v6362_v33  ;;  %v10122_v49 = vcombine.high %v6365_v40, %v6369_v43  ;;  %v10124_v50 = vcombine.high %v6366_v44, %v6370_v45  ;;  %v6417_v31 = vld [vmem:[#allocation11 + $0xbb0] sm:$0xff]  ;;  %v6414_v33 = vld [vmem:[#allocation11 + $0xb98] sm:$0xff] }
 0x4e8   :  { %8765 = vmatprep.mubr.bf16.mxu0 %v10993_v53  ;;  %8894 = vmatprep.mubr.bf16.mxu1 %v10993_v53  ;;  %v10092_v53 = vcombine.high %v6334_v56, %v6338_v3  ;;  %v6393_v56 = vld [vmem:[#allocation11 + $0xaf0] sm:$0xff]  ;;  %v6390_v3 = vld [vmem:[#allocation11 + $0xad8] sm:$0xff] }
 0x4ea   :  { %8736 = vmatpush1.bf16.msra.mxu0 %v10065_v52  ;;  %8865 = vmatpush1.bf16.msra.mxu1 %v10067_v54  ;;  %v6378_v52 = vld [vmem:[#allocation11 + $0xa78] sm:$0xff]  ;;  %v10121_v54 = vcombine.low %v6365_v40, %v6369_v43  ;;  %v6421_v43 = vld [vmem:[#allocation11 + $0xbd0] sm:$0xff] }
 0x4eb   :  { %8737 = vmatprep.subr.bf16.mxu0 %v10074_v55  ;;  %8866 = vmatprep.subr.bf16.mxu1 %v10076_v46  ;;  %v10123_v55 = vcombine.low %v6366_v44, %v6370_v45  ;;  %v10130_v46 = vcombine.high %v6373_v42, %v6377_v51  ;;  %v10132_v57 = vcombine.high %v6374_v23, %v6378_v52  ;;  %v6425_v44 = vld [vmem:[#allocation11 + $0xbf0] sm:$0xff]  ;;  %v6422_v45 = vld [vmem:[#allocation11 + $0xbd8] sm:$0xff] }
 0x4ee   :  { %8738 = vmatpush1.bf16.msra.mxu0 %v10073_v62  ;;  %8867 = vmatpush1.bf16.msra.mxu1 %v10075_v29  ;;  %v6386_v62 = vld [vmem:[#allocation11 + $0xab8] sm:$0xff]  ;;  %v10129_v29 = vcombine.low %v6373_v42, %v6377_v51  ;;  %v10177_v51 = vcombine.low %v6421_v43, %v6425_v44 }
 0x4ef   :  { %8739 = vmatprep.subr.bf16.mxu0 %v10082_v63  ;;  %8868 = vmatprep.subr.bf16.mxu1 %v10084_v0  ;;  %v10131_v63 = vcombine.low %v6374_v23, %v6378_v52  ;;  %v10138_v0 = vcombine.high %v6381_v59, %v6385_v60  ;;  %v10140_v1 = vcombine.high %v6382_v61, %v6386_v62  ;;  %v11019_v52 = vld [vmem:[#allocation16] sm:$0xff] }
 0x4f2   :  { %8740 = vmatpush1.bf16.msra.mxu0 %v10081_v8  ;;  %8869 = vmatpush1.bf16.msra.mxu1 %v10083_v4  ;;  %v6394_v8 = vld [vmem:[#allocation11 + $0xaf8] sm:$0xff]  ;;  %v10137_v4 = vcombine.low %v6381_v59, %v6385_v60 }
 0x4f3   :  { %8741 = vmatprep.subr.bf16.mxu0 %v10090_v15  ;;  %8870 = vmatprep.subr.bf16.mxu1 %v10092_v53  ;;  %v10139_v15 = vcombine.low %v6382_v61, %v6386_v62  ;;  %v10146_v53 = vcombine.high %v6389_v2, %v6393_v56  ;;  %v10148_v58 = vcombine.high %v6390_v3, %v6394_v8 }
 0x4f6   :  { %8742 = vmatpush1.bf16.msra.mxu0 %v10089_v17  ;;  %8871 = vmatpush1.bf16.msra.mxu1 %v10091_v5  ;;  %v6402_v17 = vld [vmem:[#allocation11 + $0xb38] sm:$0xff]  ;;  %v10145_v5 = vcombine.low %v6389_v2, %v6393_v56 }
 0x4f7   :  { %8743 = vmatprep.subr.bf16.mxu0 %v10098_v25  ;;  %8872 = vmatprep.subr.bf16.mxu1 %v10100_v18  ;;  %v10147_v25 = vcombine.low %v6390_v3, %v6394_v8  ;;  %v10154_v18 = vcombine.high %v6397_v9, %v6401_v12  ;;  %v10156_v19 = vcombine.high %v6398_v16, %v6402_v17 }
 0x4fa   :  { %8744 = vmatpush1.bf16.msra.mxu0 %v10097_v22  ;;  %8873 = vmatpush1.bf16.msra.mxu1 %v10099_v13  ;;  %v6410_v22 = vld [vmem:[#allocation11 + $0xb78] sm:$0xff]  ;;  %v10153_v13 = vcombine.low %v6397_v9, %v6401_v12 }
 0x4fb   :  { %8745 = vmatprep.subr.bf16.mxu0 %v10106_v24  ;;  %8874 = vmatprep.subr.bf16.mxu1 %v10108_v26  ;;  %v10155_v24 = vcombine.low %v6398_v16, %v6402_v17  ;;  %v10162_v26 = vcombine.high %v6405_v20, %v6409_v21  ;;  %v10164_v28 = vcombine.high %v6406_v37, %v6410_v22 }
 0x4fe   :  { %8746 = vmatpush1.bf16.msra.mxu0 %v10105_v34  ;;  %8875 = vmatpush1.bf16.msra.mxu1 %v10107_v35  ;;  %v6418_v34 = vld [vmem:[#allocation11 + $0xbb8] sm:$0xff]  ;;  %v10161_v35 = vcombine.low %v6405_v20, %v6409_v21 }
 0x4ff   :  { %8747 = vmatprep.subr.bf16.mxu0 %v10114_v6  ;;  %8876 = vmatprep.subr.bf16.mxu1 %v10116_v36  ;;  %v10163_v6 = vcombine.low %v6406_v37, %v6410_v22  ;;  %v10170_v36 = vcombine.high %v6413_v30, %v6417_v31  ;;  %v10172_v40 = vcombine.high %v6414_v33, %v6418_v34 }
 0x502   :  { %8748 = vmatpush1.bf16.msra.mxu0 %v10113_v47  ;;  %8877 = vmatpush1.bf16.msra.mxu1 %v10115_v48  ;;  %v6426_v47 = vld [vmem:[#allocation11 + $0xbf8] sm:$0xff]  ;;  %v10169_v48 = vcombine.low %v6413_v30, %v6417_v31 }
 0x503   :  { %8749 = vmatprep.subr.bf16.mxu0 %v10122_v49  ;;  %8878 = vmatprep.subr.bf16.mxu1 %v10124_v50  ;;  %v10171_v49 = vcombine.low %v6414_v33, %v6418_v34  ;;  %v10178_v50 = vcombine.high %v6421_v43, %v6425_v44  ;;  %v10180_v42 = vcombine.high %v6422_v45, %v6426_v47 }
 0x504   :  { %v10179_v23 = vcombine.low %v6422_v45, %v6426_v47 }
 0x506   :  { %8750 = vmatpush1.bf16.msra.mxu0 %v10121_v54  ;;  %8879 = vmatpush1.bf16.msra.mxu1 %v10123_v55  ;;  %v6432_v54 = vrot.slane %v11019_v52, %v10912_v32  ;;  %v6440_v55 = vrot.slane %v11019_v52, %v10915_v38 }
 0x507   :  { %8751 = vmatprep.subr.bf16.mxu0 %v10130_v46  ;;  %8880 = vmatprep.subr.bf16.mxu1 %v10132_v57  ;;  %v6436_v46 = vrot.slane %v11019_v52, %v10918_v39  ;;  %v6444_v57 = vrot.slane %v11019_v52, %v10921_v41 }
 0x50a   :  { %8752 = vmatpush1.bf16.msra.mxu0 %v10129_v29  ;;  %8881 = vmatpush1.bf16.msra.mxu1 %v10131_v63 }
 0x50b   :  { %8753 = vmatprep.subr.bf16.mxu0 %v10138_v0  ;;  %8882 = vmatprep.subr.bf16.mxu1 %v10140_v1 }
 0x50e   :  { %8754 = vmatpush1.bf16.msra.mxu0 %v10137_v4  ;;  %8883 = vmatpush1.bf16.msra.mxu1 %v10139_v15 }
 0x50f   :  { %8755 = vmatprep.subr.bf16.mxu0 %v10146_v53  ;;  %8884 = vmatprep.subr.bf16.mxu1 %v10148_v58 }
 0x512   :  { %8756 = vmatpush1.bf16.msra.mxu0 %v10145_v5  ;;  %8885 = vmatpush1.bf16.msra.mxu1 %v10147_v25 }
 0x513   :  { %8757 = vmatprep.subr.bf16.mxu0 %v10154_v18  ;;  %8886 = vmatprep.subr.bf16.mxu1 %v10156_v19 }
 0x516   :  { %8758 = vmatpush1.bf16.msra.mxu0 %v10153_v13  ;;  %8887 = vmatpush1.bf16.msra.mxu1 %v10155_v24 }
 0x517   :  { %8759 = vmatprep.subr.bf16.mxu0 %v10162_v26  ;;  %8888 = vmatprep.subr.bf16.mxu1 %v10164_v28 }
 0x51a   :  { %8760 = vmatpush1.bf16.msra.mxu0 %v10161_v35  ;;  %8889 = vmatpush1.bf16.msra.mxu1 %v10163_v6 }
 0x51b   :  { %8761 = vmatprep.subr.bf16.mxu0 %v10170_v36  ;;  %8890 = vmatprep.subr.bf16.mxu1 %v10172_v40 }
 0x51e   :  { %8762 = vmatpush1.bf16.msra.mxu0 %v10169_v48  ;;  %8891 = vmatpush1.bf16.msra.mxu1 %v10171_v49 }
 0x51f   :  { %8763 = vmatprep.subr.bf16.mxu0 %v10178_v50  ;;  %8892 = vmatprep.subr.bf16.mxu1 %v10180_v42 }
 0x522   :  { %8764 = vmatpush1.bf16.msra.mxu0 %v10177_v51  ;;  %8893 = vmatpush1.bf16.msra.mxu1 %v10179_v23 }
 0x525   :  { %8766 = vmatmul.mubr.bf16.vlgmr.msra.gmra.mrb[20].mxu0 %v10999_v14  ;;  %8895 = vmatmul.mubr.bf16.vlgmr.msra.gmra.mrb[20].mxu1 %v10999_v14 }
 0x538   :  { %v8509_v59 = vpop.f32.mrb[16].mxu0  ;;  %v8638_v61 = vpop.f32.mrb[16].mxu1 }
 0x539   :  { %v10245_v60 = vadd.f32 %v8509_v59, %v6432_v54  ;;  %v8511_v62 = vpop.f32.mrb[17].mxu0  ;;  %v10249_v29 = vadd.f32 %v8638_v61, %v6440_v55  ;;  %v8640_v63 = vpop.f32.mrb[17].mxu1 }
 0x53a   :  { %v10246_v14 = vadd.f32 %v8511_v62, %v6436_v46  ;;  %v8513_v0 = vpop.f32.mrb[18].mxu0  ;;  %v10250_v1 = vadd.f32 %v8640_v63, %v6444_v57  ;;  %v8642_v32 = vpop.f32.mrb[18].mxu1 }
 0x53b   :  { %v10247_v2 = vadd.f32 %v8513_v0, %v6432_v54  ;;  %v8515_v56 = vpop.f32.mrb[19].mxu0  ;;  %v10251_v38 = vadd.f32 %v8642_v32, %v6440_v55  ;;  %v8644_v4 = vpop.f32.mrb[19].mxu1 }
 0x53c   :  { %v10205_v3 = vpack.c.bf16 %v10246_v14, %v10245_v60  ;;  %v10248_v8 = vadd.f32 %v8515_v56, %v6436_v46  ;;  %v10206_v39 = vpack.c.bf16 %v10250_v1, %v10249_v29  ;;  %v10252_v15 = vadd.f32 %v8644_v4, %v6444_v57 }
 0x53e   :  { %8953 = vst [vmem:[#allocation20] sm:$0xff] %v10205_v3  ;;  %v10209_v41 = vpack.c.bf16 %v10248_v8, %v10247_v2  ;;  %8954 = vst [vmem:[#allocation20 + $0x8] sm:$0xff] %v10206_v39  ;;  %v10210_v53 = vpack.c.bf16 %v10252_v15, %v10251_v38 }
 0x540   :  { %8957 = vst [vmem:[#allocation20 + $0x20] sm:$0xff] %v10209_v41  ;;  %8958 = vst [vmem:[#allocation20 + $0x28] sm:$0xff] %v10210_v53 }
 0x541   :  { %10584 = shalt.err (!%p10581_p6)
}
 0x542   :  { %s10585_s27 = scalar_lea.hbm %s11092_s10, 1024 }
 0x543   :  { %p10586_p7 = scmp.ne.s32.totalorder %s11092_s10, %s10585_s27  ;;  %p10589_p8 = scmp.lt.u32.totalorder %s10585_s27, %s11092_s10 }
 0x545   :  { %p10591_p9 = pnand %p10589_p8, %p10586_p7 }
 0x547   :  { %10594 = shalt.err (!%p10591_p9)
}
 0x548   :  { %8984 = dma.vmem_to_hbm [thread:$0]  %s8979_s2, 1024, %s11092_s10, [#allocation19], %s10657_s1, %s10657_s1, %s10658_s18  }
 0x549   :  { %s10595_s20 = scalar_lea.vmem %s8967_s30, 1024  ;;  %p10600_p11 = scmp.lt.s32.totalorder %s8967_s30, %s8967_s30 }
 0x54a   :  { %p10596_p10 = scmp.ne.s32.totalorder %s8967_s30, %s10595_s20  ;;  %p10601_p12 = scmp.lt.s32.totalorder %s10595_s20, %s10595_s20 }
 0x54c   :  { %p10602_p13 = por %p10601_p12, %p10600_p11 }
 0x54e   :  { %p10603_p0 = pnand %p10602_p13, %p10596_p10 }
 0x550   :  { %10606 = shalt.err (!%p10603_p0)
}
 0x551   :  { %s10607_s25 = scalar_lea.hbm %s11091_s9, 1024 }
 0x552   :  { %p10608_p1 = scmp.ne.s32.totalorder %s11091_s9, %s10607_s25  ;;  %p10611_p2 = scmp.lt.u32.totalorder %s10607_s25, %s11091_s9 }
 0x554   :  { %p10613_p3 = pnand %p10611_p2, %p10608_p1 }
 0x556   :  { %10616 = shalt.err (!%p10613_p3)
}
 0x557   :  { %8972 = dma.vmem_to_hbm [thread:$0]  %s8967_s30, 1024, %s11091_s9, [#allocation4], %s10657_s1, %s10657_s1, %s10658_s18   ;;  %v6448_v58 = vrot.slane %v11019_v52, %v10950_v7  ;;  %v6456_v9 = vrot.slane %v11019_v52, %v10953_v10  ;;  %v6452_v12 = vrot.slane %v11019_v52, %v10956_v11  ;;  %v6460_v16 = vrot.slane %v11019_v52, %v10959_v27 }
 0x558   :  { %s10668_s9 = smov [#allocation20]  }
 0x559   :  { %s8990_s14 = sshll.u32 %s10668_s9, 4  ;;  %s8991_s14 = int_to_ptr.vmem [resolvable:$true] %s8990_s14 }
 0x55a   :  { %s10617_s6 = scalar_lea.vmem %s8991_s14, 1024  ;;  %p10622_p5 = scmp.lt.s32.totalorder %s8991_s14, %s8991_s14 }
 0x55b   :  { %p10618_p4 = scmp.ne.s32.totalorder %s8991_s14, %s10617_s6  ;;  %p10623_p6 = scmp.lt.s32.totalorder %s10617_s6, %s10617_s6 }
 0x55d   :  { %p10624_p7 = por %p10623_p6, %p10622_p5 }
 0x55f   :  { %p10625_p8 = pnand %p10624_p7, %p10618_p4 }
 0x5f8   :  { %v8767_v17 = vpop.f32.mrb[20].mxu0  ;;  %v8896_v25 = vpop.f32.mrb[20].mxu1 }
 0x5f9   :  { %v10253_v5 = vadd.f32 %v8767_v17, %v6448_v58  ;;  %v8769_v18 = vpop.f32.mrb[21].mxu0  ;;  %v10257_v19 = vadd.f32 %v8896_v25, %v6456_v9  ;;  %v8898_v21 = vpop.f32.mrb[21].mxu1 }
 0x5fa   :  { %v10254_v20 = vadd.f32 %v8769_v18, %v6452_v12  ;;  %v8771_v37 = vpop.f32.mrb[22].mxu0  ;;  %v10258_v22 = vadd.f32 %v8898_v21, %v6460_v16  ;;  %v8900_v7 = vpop.f32.mrb[22].mxu1 }
 0x5fb   :  { %v10255_v13 = vadd.f32 %v8771_v37, %v6448_v58  ;;  %v8773_v24 = vpop.f32.mrb[23].mxu0  ;;  %v10259_v10 = vadd.f32 %v8900_v7, %v6456_v9  ;;  %v8902_v30 = vpop.f32.mrb[23].mxu1 }
 0x5fc   :  { %v10207_v26 = vpack.c.bf16 %v10254_v20, %v10253_v5  ;;  %v10256_v28 = vadd.f32 %v8773_v24, %v6452_v12  ;;  %v10208_v11 = vpack.c.bf16 %v10258_v22, %v10257_v19  ;;  %v10260_v27 = vadd.f32 %v8902_v30, %v6460_v16 }
 0x5fe   :  { %8955 = vst [vmem:[#allocation20 + $0x10] sm:$0xff] %v10207_v26  ;;  %v10211_v31 = vpack.c.bf16 %v10256_v28, %v10255_v13  ;;  %8956 = vst [vmem:[#allocation20 + $0x18] sm:$0xff] %v10208_v11  ;;  %v10212_v33 = vpack.c.bf16 %v10260_v27, %v10259_v10 }
 0x600   :  { %8959 = vst [vmem:[#allocation20 + $0x30] sm:$0xff] %v10211_v31  ;;  %8960 = vst [vmem:[#allocation20 + $0x38] sm:$0xff] %v10212_v33 }
 0x601   :  { %10628 = shalt.err (!%p10625_p8)
}
 0x602   :  { %s10629_s2 = scalar_lea.hbm %s11093_s11, 1024 }
 0x603   :  { %p10630_p9 = scmp.ne.s32.totalorder %s11093_s11, %s10629_s2  ;;  %p10633_p10 = scmp.lt.u32.totalorder %s10629_s2, %s11093_s11 }
 0x605   :  { %p10635_p11 = pnand %p10633_p10, %p10630_p9 }
 0x607   :  { %10638 = shalt.err (!%p10635_p11)
}
 0x608   :  { %8996 = dma.vmem_to_hbm [thread:$0]  %s8991_s14, 1024, %s11093_s11, [#allocation19], %s10657_s1, %s10657_s1, %s10658_s18  }
 0x609   :  { %10649 = dma.done.wait [#allocation4], 1024  }
 0x60a   :  { %10650 = vsyncadd [#allocation4], 4294966272 }
 0x60b   :  { %10651 = dma.done.wait [#allocation19], 2048  }
 0x60c   :  { %10652 = vsyncadd [#allocation19], 4294965248 }
 0x60d   :  { %9006 = vsyncpa [#allocation3], 1 }
 0x60e   :  { %9007 = vsyncpa [#allocation6], 1 }
 0x60f   :  { %9008 = vsyncpa [#allocation9], 1 }
 0x610   :  { %9009 = vsyncpa [#allocation12], 1 }
 0x611   :  { %9010 = vsyncpa [#allocation15], 1 }
 0x612   :  { %9011 = vsyncpa [#allocation4], 1 }
 0x613   :  { %9012 = vsyncpa [#allocation19], 1 }

</bundles_post_ra>
